<compile_context>
chip_gen: v7x
topology: tpu7x:2x2x1
jax: 0.10.0
libtpu: 0.0.40
codegen_flags: <defaults>
</compile_context>

<pallas_src>
import jax
import jax.numpy as jnp
import numpy as np
from jax import lax
from jax.experimental import pallas as pl
from jax.experimental.pallas import tpu as pltpu

# ---------------- model hyper-params (small but structurally faithful) -------
DIM       = 32          # model dim
DIM_HEAD  = 16          # per-head dim
HEADS     = 4
FF_MULT   = 4
LAYERS    = 2           # Cross_model default is 4; small stack for the demo
B, NQ, NC = 2, 8, 8     # batch, query seq len, context seq len

INNER     = HEADS * DIM_HEAD            # 64
FF_INNER  = FF_MULT * DIM               # 128
SCALE     = DIM_HEAD ** -0.5
LN_EPS    = 1e-5

BNQ = B * NQ                            # 16  (batch folded into sublanes)
BNC = B * NC                            # 16
HQ  = HEADS * BNQ                       # 64  (heads stacked on sublanes)
NEG = jnp.float32(-1e9)                 # cross-batch block mask value

# ---------------- packed-slab layout (lane / row offsets) --------------------
QK_W    = INNER + DIM_HEAD                        # 80   [q | k]
CX_W    = INNER + 2 * FF_INNER                    # 320  cross-attn: [q | ff]
PX_W    = 2 * QK_W + DIM_HEAD + 2 * FF_INNER      # 432  PTB: [q|k | q_rot|k_rot | v | ff]
LW      = CX_W + PX_W                             # 752  per-layer lane block in w_in
CKV_OFF = LAYERS * LW                             # cross-attn [k|v] weights, all layers
OUT_K   = INNER + FF_INNER                        # 192  rows per fused output projection


# ---------------- in-kernel helpers ------------------------------------------
def _layernorm(x, w, b):
    # one-pass stats: mu and E[x^2] are independent reductions
    mu  = jnp.mean(x, axis=-1, keepdims=True)
    ex2 = jnp.mean(x * x, axis=-1, keepdims=True)
    var = ex2 - mu * mu
    return (x - mu) * lax.rsqrt(var + LN_EPS) * w + b


def _softmax_rows(sim):
    sim = sim - jnp.max(sim, axis=-1, keepdims=True)
    p = jnp.exp(sim)
    return p * pl.reciprocal(jnp.sum(p, axis=-1, keepdims=True), approx=True)  # EUP slot


def _stack_heads(q):      # (BNQ, HEADS*DH) -> (HEADS*BNQ, DH); head h at rows h*BNQ:(h+1)*BNQ
    return jnp.concatenate(
        [q[:, h * DIM_HEAD:(h + 1) * DIM_HEAD] for h in range(HEADS)], axis=0)


def _unstack_heads(o):    # (HEADS*BNQ, DH) -> (BNQ, HEADS*DH)
    return jnp.concatenate(
        [o[h * BNQ:(h + 1) * BNQ, :] for h in range(HEADS)], axis=1)


def _attend(q_stack, k, v, mask):
    # q_stack: (HEADS*BNQ, DH) heads on sublanes; k, v shared across heads (MQA)
    sim = lax.dot_general(q_stack, k, (((1,), (1,)), ((), ())),
                          preferred_element_type=jnp.float32) + mask
    attn = _softmax_rows(sim)
    o = jnp.dot(attn, v, preferred_element_type=jnp.float32)     # (HEADS*BNQ, DH)
    return _unstack_heads(o)                                     # (BNQ, INNER)


# ---------------- fused whole-stack kernel -----------------------------------
def fused_stack_kernel(tok_ref, mask_ref, rope_ref, w_in_ref, w_out_ref, ln_ref, out_ref):
    f32 = jnp.float32
    x     = tok_ref[:BNQ, :]          # (BNQ, DIM)
    ctx   = tok_ref[BNQ:, :]          # (BNC, DIM)
    cmask = mask_ref[:, :BNC]         # (HQ, BNC)  additive mask + cross-batch -1e9, head-tiled
    smask = mask_ref[:, BNC:]         # (HQ, BNQ)  cross-batch -1e9, head-tiled
    cos   = rope_ref[:, :QK_W]        # (BNQ, 80)  rotary cos for [q(heads) | k]
    sin   = rope_ref[:, QK_W:]        # (BNQ, 80)

    # Cross-attention K|V for ALL layers in one matmul (context is never re-normed).
    ckv_all = jnp.dot(ctx, w_in_ref[:, CKV_OFF:], preferred_element_type=f32)   # (BNC, L*2*DH)

    for l in range(LAYERS):           # unrolled: all slab offsets static
        base = l * LW

        # ---- Residual(CrossAttention, parallel_ff=True) ----
        xn = _layernorm(x, ln_ref[4 * l:4 * l + 1, :], ln_ref[4 * l + 1:4 * l + 2, :])
        proj = jnp.dot(xn, w_in_ref[:, base:base + CX_W], preferred_element_type=f32)  # (BNQ,320)
        q, ffh = proj[:, :INNER], proj[:, INNER:]                 # SCALE folded into q weights
        kv = ckv_all[:, l * 2 * DIM_HEAD:(l + 1) * 2 * DIM_HEAD]
        o = _attend(_stack_heads(q), kv[:, :DIM_HEAD], kv[:, DIM_HEAD:], cmask)
        gated = jax.nn.silu(ffh[:, FF_INNER:]) * ffh[:, :FF_INNER]                      # SwiGLU
        wo = w_out_ref[2 * l * OUT_K:(2 * l + 1) * OUT_K, :]                            # (192,DIM)
        x = jnp.dot(jnp.concatenate([o, gated], axis=1), wo,
                    preferred_element_type=f32) + x                                     # + residual

        # ---- Residual(ParallelTransformerBlock) ----
        xn = _layernorm(x, ln_ref[4 * l + 2:4 * l + 3, :], ln_ref[4 * l + 3:4 * l + 4, :])
        pb = base + CX_W
        proj = jnp.dot(xn, w_in_ref[:, pb:pb + PX_W], preferred_element_type=f32)       # (BNQ,432)
        # rotary: rotate_half folded into the q_rot / k_rot weight columns on the host
        qk = proj[:, :QK_W] * cos + proj[:, QK_W:2 * QK_W] * sin
        q, k = qk[:, :INNER], qk[:, INNER:]
        v = proj[:, 2 * QK_W:2 * QK_W + DIM_HEAD]
        ffh = proj[:, 2 * QK_W + DIM_HEAD:]
        o = _attend(_stack_heads(q), k, v, smask)
        gated = jax.nn.silu(ffh[:, FF_INNER:]) * ffh[:, :FF_INNER]
        wo = w_out_ref[(2 * l + 1) * OUT_K:(2 * l + 2) * OUT_K, :]
        x = jnp.dot(jnp.concatenate([o, gated], axis=1), wo,
                    preferred_element_type=f32) + x

    out_ref[...] = x
    # TODO(synk): at (16, 32) the final store is a masked vst; present a lane-dense
    # (last dim multiple of 128) output slab if BNQ/DIM grow.


# ---------------- host-side packing helpers ----------------------------------
def rotate_half_matrix():
    half = DIM_HEAD // 2
    m = np.zeros((DIM_HEAD, DIM_HEAD), np.float32)
    m[np.arange(half) + half, np.arange(half)] = -1.0
    m[np.arange(half), np.arange(half) + half] = 1.0
    return jnp.asarray(m)                       # t @ m == rotate_half(t)


def _rot_per_head(w, rot):                      # (DIM, HEADS*DH), rotate each head block
    wr = w.reshape(DIM, HEADS, DIM_HEAD)
    wr = jnp.einsum('dhk,km->dhm', wr, rot)
    return wr.reshape(DIM, HEADS * DIM_HEAD)


def build_masks(mask):
    eye = jnp.eye(B, dtype=bool)
    cm = jnp.where(eye[:, None, :, None], mask[:, :, None, :], NEG)        # (B,NQ,B,NC)
    cm = cm.reshape(BNQ, BNC).astype(jnp.float32)
    sm = jnp.where(eye[:, None, :, None], jnp.float32(0.0), NEG)           # (B,1,B,1)
    sm = jnp.broadcast_to(sm, (B, NQ, B, NQ)).reshape(BNQ, BNQ).astype(jnp.float32)
    # tile heads along sublanes (matches _stack_heads), lane-concat into one slab
    return jnp.concatenate([jnp.tile(cm, (HEADS, 1)), jnp.tile(sm, (HEADS, 1))], axis=1)


def build_rope(cos, sin):
    cos2d = jnp.tile(cos, (B, 1))                                          # (BNQ, DH)
    sin2d = jnp.tile(sin, (B, 1))
    cosq = jnp.concatenate([jnp.tile(cos2d, (1, HEADS)), cos2d], axis=1)   # (BNQ, 80)
    sinq = jnp.concatenate([jnp.tile(sin2d, (1, HEADS)), sin2d], axis=1)
    return jnp.concatenate([cosq, sinq], axis=1)                           # (BNQ, 160)


def pack_weights(params):
    rot = rotate_half_matrix()
    w_in_blocks, ckv_blocks, w_out_rows, ln_rows = [], [], [], []
    for cp, pp in params:
        # CrossAttention: input proj [q*scale | ff1], ctx proj [k|v], out proj [wo ; wff2]
        w_cx = jnp.concatenate([cp["wq"] * SCALE, cp["wff1"]], axis=1)             # (DIM, 320)
        ckv_blocks.append(cp["wkv"])                                               # (DIM, 32)
        w_out_rows.append(jnp.concatenate([cp["wo"], cp["wff2"]], axis=0))         # (192, DIM)
        ln_rows += [cp["ln_w"], cp["ln_b"]]
        # ParallelTransformerBlock: [q*s | k | (q*s)@rot | k@rot | v | ff], out [wao ; wffo]
        wq  = pp["w_fused"][:, :INNER] * SCALE
        wk  = pp["w_fused"][:, INNER:INNER + DIM_HEAD]
        wv  = pp["w_fused"][:, INNER + DIM_HEAD:INNER + 2 * DIM_HEAD]
        wff = pp["w_fused"][:, INNER + 2 * DIM_HEAD:]
        w_px = jnp.concatenate([wq, wk, _rot_per_head(wq, rot), wk @ rot, wv, wff], axis=1)
        w_in_blocks.append(jnp.concatenate([w_cx, w_px], axis=1))                  # (DIM, 752)
        w_out_rows.append(jnp.concatenate([pp["w_attn_out"], pp["w_ff_out"]], axis=0))
        ln_rows += [pp["ln_w"], pp["ln_b"]]
    w_in  = jnp.concatenate(w_in_blocks + ckv_blocks, axis=1)    # (DIM, LAYERS*752 + LAYERS*32)
    w_out = jnp.concatenate(w_out_rows, axis=0)                  # (2*LAYERS*192, DIM)
    ln    = jnp.concatenate(ln_rows, axis=0)                     # (4*LAYERS, DIM)
    return w_in, w_out, ln


def cross_model_forward(query_tokens, context_tokens, mask, params, cos, sin):
    tokens = jnp.concatenate([query_tokens.reshape(BNQ, DIM),
                              context_tokens.reshape(BNC, DIM)], axis=0)   # (BNQ+BNC, DIM)
    masks = build_masks(mask)                                              # (HQ, BNC+BNQ)
    rope = build_rope(cos, sin)                                            # (BNQ, 160)
    w_in, w_out, ln = pack_weights(params)

    vmem = pl.BlockSpec(memory_space=pltpu.MemorySpace.VMEM)
    # Single fused gridless kernel: whole working set (<1 MiB) resident in VMEM.
    # (At these shapes the work does not amortize cross-TensorCore coordination on v7x,
    #  so single-core is intentional.)
    out2d = pl.pallas_call(
        fused_stack_kernel,
        out_shape=jax.ShapeDtypeStruct((BNQ, DIM), jnp.float32),
        in_specs=[vmem] * 6,
        out_specs=vmem,
    )(tokens, masks, rope, w_in, w_out, ln)
    return out2d.reshape(B, NQ, DIM)


# ---------------- parameter construction (deterministic) ---------------------
def init_params(key):
    layers = []
    for _ in range(LAYERS):
        ks = jax.random.split(key, 8)
        key = ks[0]
        cross = {
            "ln_w": jnp.ones((1, DIM), jnp.float32),
            "ln_b": jnp.zeros((1, DIM), jnp.float32),
            "wq":   jax.random.normal(ks[1], (DIM, INNER), jnp.float32) * 0.02,
            "wkv":  jax.random.normal(ks[2], (DIM, 2 * DIM_HEAD), jnp.float32) * 0.02,
            "wo":   jax.random.normal(ks[3], (INNER, DIM), jnp.float32) * 0.02,
            "wff1": jax.random.normal(ks[4], (DIM, 2 * FF_INNER), jnp.float32) * 0.02,
            "wff2": jax.random.normal(ks[5], (FF_INNER, DIM), jnp.float32) * 0.02,
        }
        fused_dim = INNER + 2 * DIM_HEAD + 2 * FF_INNER
        ptb = {
            "ln_w": jnp.ones((1, DIM), jnp.float32),
            "ln_b": jnp.zeros((1, DIM), jnp.float32),
            "w_fused":    jax.random.normal(ks[6], (DIM, fused_dim), jnp.float32) * 0.02,
            "w_attn_out": jax.random.normal(ks[7], (INNER, DIM), jnp.float32) * 0.02,
            "w_ff_out":   jax.random.normal(jax.random.fold_in(ks[7], 1),
                                            (FF_INNER, DIM), jnp.float32) * 0.02,
        }
        layers.append((cross, ptb))
    return layers


def rotary_tables(n):
    inv_freq = 1.0 / (10000.0 ** (jnp.arange(0, DIM_HEAD, 2, dtype=jnp.float32) / DIM_HEAD))
    freqs = jnp.arange(n, dtype=jnp.float32)[:, None] * inv_freq[None, :]   # (n, DH/2)
    pos = jnp.concatenate([freqs, freqs], axis=-1)                          # (n, DH)
    return jnp.cos(pos), jnp.sin(pos)


# ---------------- pure-JAX reference (silent correctness check) --------------
def _ln_ref(x, w, b):
    mu = x.mean(-1, keepdims=True)
    var = ((x - mu) ** 2).mean(-1, keepdims=True)
    return (x - mu) * jax.lax.rsqrt(var + LN_EPS) * w + b


def _rot_half_ref(t):
    half = t.shape[-1] // 2
    return jnp.concatenate([-t[..., half:], t[..., :half]], axis=-1)


def cross_model_ref(x, ctx, mask, params, cos, sin):
    for cp, pp in params:
        # CrossAttention + residual
        xn = _ln_ref(x, cp["ln_w"][0], cp["ln_b"][0])
        q = (xn @ cp["wq"]) * SCALE
        kv = ctx @ cp["wkv"]
        k, v = kv[..., :DIM_HEAD], kv[..., DIM_HEAD:]
        qh = q.reshape(B, NQ, HEADS, DIM_HEAD).transpose(0, 2, 1, 3)
        sim = jnp.einsum('bhid,bjd->bhij', qh, k) + mask[:, None]
        sim = sim - sim.max(-1, keepdims=True)
        attn = jax.nn.softmax(sim, -1)
        o = jnp.einsum('bhij,bjd->bhid', attn, v).transpose(0, 2, 1, 3).reshape(B, NQ, INNER)
        out = o @ cp["wo"]
        ffh = xn @ cp["wff1"]
        out = out + (jax.nn.silu(ffh[..., FF_INNER:]) * ffh[..., :FF_INNER]) @ cp["wff2"]
        x = out + x
        # ParallelTransformerBlock + residual
        xn = _ln_ref(x, pp["ln_w"][0], pp["ln_b"][0])
        fused = xn @ pp["w_fused"]
        q = fused[..., :INNER]
        k = fused[..., INNER:INNER + DIM_HEAD]
        v = fused[..., INNER + DIM_HEAD:INNER + 2 * DIM_HEAD]
        ff = fused[..., INNER + 2 * DIM_HEAD:]
        qh = q.reshape(B, NQ, HEADS, DIM_HEAD).transpose(0, 2, 1, 3)
        qh = qh * cos + _rot_half_ref(qh) * sin
        k = k * cos + _rot_half_ref(k) * sin
        qh = qh * SCALE
        sim = jnp.einsum('bhid,bjd->bhij', qh, k)
        sim = sim - sim.max(-1, keepdims=True)
        attn = jax.nn.softmax(sim, -1)
        o = jnp.einsum('bhij,bjd->bhid', attn, v).transpose(0, 2, 1, 3).reshape(B, NQ, INNER)
        out = o @ pp["w_attn_out"]
        out = out + (jax.nn.silu(ff[..., FF_INNER:]) * ff[..., :FF_INNER]) @ pp["w_ff_out"]
        x = out + x
    return x


# ---------------- main --------------------------------------------------------
if __name__ == "__main__":
    key = jax.random.PRNGKey(0)
    k1, k2, k3, kp = jax.random.split(key, 4)

    query_tokens = jax.random.normal(k1, (B, NQ, DIM), jnp.float32)
    context_tokens = jax.random.normal(k2, (B, NC, DIM), jnp.float32)
    # additive attention mask (as used by CrossAttention: sim = sim + mask)
    mask = jnp.where(jax.random.uniform(k3, (B, NQ, NC)) > 0.2, 0.0, -1e4).astype(jnp.float32)

    params = init_params(kp)
    cos, sin = rotary_tables(NQ)

    out = cross_model_forward(query_tokens, context_tokens, mask, params, cos, sin)
    out = jax.block_until_ready(out)

    ref = cross_model_ref(query_tokens, context_tokens, mask, params, cos, sin)
    np.testing.assert_allclose(np.asarray(out), np.asarray(ref), atol=2e-3, rtol=2e-3)

    print("KERNEL_OK")
</pallas_src>

<mosaic_0001>
module attributes {stable_mosaic.version = 11 : i64} {
  func.func @fused_stack_kernel(%arg0: memref<32x32xf32, #tpu.memory_space<vmem>>, %arg1: memref<64x32xf32, #tpu.memory_space<vmem>>, %arg2: memref<16x160xf32, #tpu.memory_space<vmem>>, %arg3: memref<32x1568xf32, #tpu.memory_space<vmem>>, %arg4: memref<768x32xf32, #tpu.memory_space<vmem>>, %arg5: memref<8x32xf32, #tpu.memory_space<vmem>>, %arg6: memref<16x32xf32, #tpu.memory_space<vmem>>) attributes {dimension_semantics = [], scalar_prefetch = 0 : i64, scratch_operands = 0 : i64, tpu.core_type = #tpu.core_type<tc>} {
    %c0 = arith.constant 0 : index
    %c0_0 = arith.constant 0 : index
    %0 = vector.load %arg0[%c0, %c0_0] : memref<32x32xf32, #tpu.memory_space<vmem>>, vector<16x32xf32>
    %c16 = arith.constant 16 : index
    %c0_1 = arith.constant 0 : index
    %1 = vector.load %arg0[%c16, %c0_1] : memref<32x32xf32, #tpu.memory_space<vmem>>, vector<16x32xf32>
    %c0_2 = arith.constant 0 : index
    %c0_3 = arith.constant 0 : index
    %2 = vector.load %arg1[%c0_2, %c0_3] : memref<64x32xf32, #tpu.memory_space<vmem>>, vector<64x16xf32>
    %c0_4 = arith.constant 0 : index
    %c16_5 = arith.constant 16 : index
    %3 = vector.load %arg1[%c0_4, %c16_5] : memref<64x32xf32, #tpu.memory_space<vmem>>, vector<64x16xf32>
    %c0_6 = arith.constant 0 : index
    %c0_7 = arith.constant 0 : index
    %4 = vector.load %arg2[%c0_6, %c0_7] : memref<16x160xf32, #tpu.memory_space<vmem>>, vector<16x80xf32>
    %c0_8 = arith.constant 0 : index
    %c80 = arith.constant 80 : index
    %5 = vector.load %arg2[%c0_8, %c80] : memref<16x160xf32, #tpu.memory_space<vmem>>, vector<16x80xf32>
    %c0_9 = arith.constant 0 : index
    %c1504 = arith.constant 1504 : index
    %6 = vector.load %arg3[%c0_9, %c1504] : memref<32x1568xf32, #tpu.memory_space<vmem>>, vector<32x64xf32>
    %cst = arith.constant dense<0.000000e+00> : vector<16x64xf32>
    %7 = tpu.matmul %1, %6, %cst {dimension_numbers = #tpu.dot_dimension_numbers<[1], [0], [0], [1], [0, 0, 1, 1], [], []>} : vector<16x32xf32>, vector<32x64xf32>, vector<16x64xf32> -> vector<16x64xf32>
    %c0_10 = arith.constant 0 : index
    %c0_11 = arith.constant 0 : index
    %8 = vector.load %arg5[%c0_10, %c0_11] : memref<8x32xf32, #tpu.memory_space<vmem>>, vector<1x32xf32>
    %c1 = arith.constant 1 : index
    %c0_12 = arith.constant 0 : index
    %9 = vector.load %arg5[%c1, %c0_12] : memref<8x32xf32, #tpu.memory_space<vmem>>, vector<1x32xf32>
    %cst_13 = arith.constant dense<0.000000e+00> : vector<16xf32>
    %10 = vector.multi_reduction <add>, %0, %cst_13 [1] : vector<16x32xf32> to vector<16xf32>
    %11 = vector.shape_cast %10 : vector<16xf32> to vector<16x1xf32>
    %cst_14 = arith.constant 3.200000e+01 : f32
    %12 = vector.broadcast %cst_14 : f32 to vector<16x1xf32>
    %13 = arith.divf %11, %12 : vector<16x1xf32>
    %14 = arith.mulf %0, %0 : vector<16x32xf32>
    %cst_15 = arith.constant dense<0.000000e+00> : vector<16xf32>
    %15 = vector.multi_reduction <add>, %14, %cst_15 [1] : vector<16x32xf32> to vector<16xf32>
    %16 = vector.shape_cast %15 : vector<16xf32> to vector<16x1xf32>
    %cst_16 = arith.constant 3.200000e+01 : f32
    %17 = vector.broadcast %cst_16 : f32 to vector<16x1xf32>
    %18 = arith.divf %16, %17 : vector<16x1xf32>
    %19 = arith.mulf %13, %13 : vector<16x1xf32>
    %20 = arith.subf %18, %19 : vector<16x1xf32>
    %21 = vector.broadcast %13 : vector<16x1xf32> to vector<16x32xf32>
    %22 = arith.subf %0, %21 : vector<16x32xf32>
    %cst_17 = arith.constant 9.99999974E-6 : f32
    %23 = vector.broadcast %cst_17 : f32 to vector<16x1xf32>
    %24 = arith.addf %20, %23 : vector<16x1xf32>
    %25 = math.rsqrt %24 : vector<16x1xf32>
    %26 = vector.broadcast %25 : vector<16x1xf32> to vector<16x32xf32>
    %27 = arith.mulf %22, %26 : vector<16x32xf32>
    %28 = vector.broadcast %8 : vector<1x32xf32> to vector<16x32xf32>
    %29 = arith.mulf %27, %28 : vector<16x32xf32>
    %30 = vector.broadcast %9 : vector<1x32xf32> to vector<16x32xf32>
    %31 = arith.addf %29, %30 : vector<16x32xf32>
    %c0_18 = arith.constant 0 : index
    %c0_19 = arith.constant 0 : index
    %32 = vector.load %arg3[%c0_18, %c0_19] : memref<32x1568xf32, #tpu.memory_space<vmem>>, vector<32x320xf32>
    %cst_20 = arith.constant dense<0.000000e+00> : vector<16x320xf32>
    %33 = tpu.matmul %31, %32, %cst_20 {dimension_numbers = #tpu.dot_dimension_numbers<[1], [0], [0], [1], [0, 0, 1, 1], [], []>} : vector<16x32xf32>, vector<32x320xf32>, vector<16x320xf32> -> vector<16x320xf32>
    %34 = vector.extract_strided_slice %33 {offsets = [0, 0], sizes = [16, 64], strides = [1, 1]} : vector<16x320xf32> to vector<16x64xf32>
    %35 = vector.extract_strided_slice %33 {offsets = [0, 64], sizes = [16, 256], strides = [1, 1]} : vector<16x320xf32> to vector<16x256xf32>
    %36 = vector.extract_strided_slice %7 {offsets = [0, 0], sizes = [16, 32], strides = [1, 1]} : vector<16x64xf32> to vector<16x32xf32>
    %37 = vector.extract_strided_slice %34 {offsets = [0, 0], sizes = [16, 16], strides = [1, 1]} : vector<16x64xf32> to vector<16x16xf32>
    %38 = vector.extract_strided_slice %34 {offsets = [0, 16], sizes = [16, 16], strides = [1, 1]} : vector<16x64xf32> to vector<16x16xf32>
    %39 = vector.extract_strided_slice %34 {offsets = [0, 32], sizes = [16, 16], strides = [1, 1]} : vector<16x64xf32> to vector<16x16xf32>
    %40 = vector.extract_strided_slice %34 {offsets = [0, 48], sizes = [16, 16], strides = [1, 1]} : vector<16x64xf32> to vector<16x16xf32>
    %41 = tpu.concatenate %37, %38, %39, %40 in 0 : vector<16x16xf32>, vector<16x16xf32>, vector<16x16xf32>, vector<16x16xf32> -> vector<64x16xf32>
    %42 = vector.extract_strided_slice %36 {offsets = [0, 0], sizes = [16, 16], strides = [1, 1]} : vector<16x32xf32> to vector<16x16xf32>
    %43 = vector.extract_strided_slice %36 {offsets = [0, 16], sizes = [16, 16], strides = [1, 1]} : vector<16x32xf32> to vector<16x16xf32>
    %cst_21 = arith.constant dense<0.000000e+00> : vector<64x16xf32>
    %44 = tpu.matmul %41, %42, %cst_21 {dimension_numbers = #tpu.dot_dimension_numbers<[1], [1], [0], [0], [0, 0, 1, 0], [], []>} : vector<64x16xf32>, vector<16x16xf32>, vector<64x16xf32> -> vector<64x16xf32>
    %45 = arith.addf %44, %2 : vector<64x16xf32>
    %cst_22 = arith.constant dense<0xFF800000> : vector<64xf32>
    %46 = vector.multi_reduction <maximumf>, %45, %cst_22 [1] : vector<64x16xf32> to vector<64xf32>
    %47 = vector.shape_cast %46 : vector<64xf32> to vector<64x1xf32>
    %48 = vector.broadcast %47 : vector<64x1xf32> to vector<64x16xf32>
    %49 = arith.subf %45, %48 : vector<64x16xf32>
    %50 = math.exp %49 : vector<64x16xf32>
    %cst_23 = arith.constant dense<0.000000e+00> : vector<64xf32>
    %51 = vector.multi_reduction <add>, %50, %cst_23 [1] : vector<64x16xf32> to vector<64xf32>
    %52 = vector.shape_cast %51 : vector<64xf32> to vector<64x1xf32>
    %53 = tpu.reciprocal %52 {approx = true} : vector<64x1xf32> -> vector<64x1xf32>
    %54 = vector.broadcast %53 : vector<64x1xf32> to vector<64x16xf32>
    %55 = arith.mulf %50, %54 : vector<64x16xf32>
    %cst_24 = arith.constant dense<0.000000e+00> : vector<64x16xf32>
    %56 = tpu.matmul %55, %43, %cst_24 {dimension_numbers = #tpu.dot_dimension_numbers<[1], [0], [0], [1], [0, 0, 1, 1], [], []>} : vector<64x16xf32>, vector<16x16xf32>, vector<64x16xf32> -> vector<64x16xf32>
    %57 = vector.extract_strided_slice %56 {offsets = [0, 0], sizes = [16, 16], strides = [1, 1]} : vector<64x16xf32> to vector<16x16xf32>
    %58 = vector.extract_strided_slice %56 {offsets = [16, 0], sizes = [16, 16], strides = [1, 1]} : vector<64x16xf32> to vector<16x16xf32>
    %59 = vector.extract_strided_slice %56 {offsets = [32, 0], sizes = [16, 16], strides = [1, 1]} : vector<64x16xf32> to vector<16x16xf32>
    %60 = vector.extract_strided_slice %56 {offsets = [48, 0], sizes = [16, 16], strides = [1, 1]} : vector<64x16xf32> to vector<16x16xf32>
    %61 = tpu.concatenate %57, %58, %59, %60 in 1 : vector<16x16xf32>, vector<16x16xf32>, vector<16x16xf32>, vector<16x16xf32> -> vector<16x64xf32>
    %62 = vector.extract_strided_slice %35 {offsets = [0, 128], sizes = [16, 128], strides = [1, 1]} : vector<16x256xf32> to vector<16x128xf32>
    %63 = arith.negf %62 : vector<16x128xf32>
    %64 = math.exp %63 : vector<16x128xf32>
    %cst_25 = arith.constant 1.000000e+00 : f32
    %65 = vector.broadcast %cst_25 : f32 to vector<16x128xf32>
    %66 = arith.addf %65, %64 : vector<16x128xf32>
    %67 = arith.divf %65, %66 : vector<16x128xf32>
    %68 = arith.mulf %62, %67 : vector<16x128xf32>
    %69 = vector.extract_strided_slice %35 {offsets = [0, 0], sizes = [16, 128], strides = [1, 1]} : vector<16x256xf32> to vector<16x128xf32>
    %70 = arith.mulf %68, %69 : vector<16x128xf32>
    %c0_26 = arith.constant 0 : index
    %c0_27 = arith.constant 0 : index
    %71 = vector.load %arg4[%c0_26, %c0_27] : memref<768x32xf32, #tpu.memory_space<vmem>>, vector<192x32xf32>
    %72 = tpu.concatenate %61, %70 in 1 : vector<16x64xf32>, vector<16x128xf32> -> vector<16x192xf32>
    %cst_28 = arith.constant dense<0.000000e+00> : vector<16x32xf32>
    %73 = tpu.matmul %72, %71, %cst_28 {dimension_numbers = #tpu.dot_dimension_numbers<[1], [0], [0], [1], [0, 0, 1, 1], [], []>} : vector<16x192xf32>, vector<192x32xf32>, vector<16x32xf32> -> vector<16x32xf32>
    %74 = arith.addf %73, %0 : vector<16x32xf32>
    %c2 = arith.constant 2 : index
    %c0_29 = arith.constant 0 : index
    %75 = vector.load %arg5[%c2, %c0_29] : memref<8x32xf32, #tpu.memory_space<vmem>>, vector<1x32xf32>
    %c3 = arith.constant 3 : index
    %c0_30 = arith.constant 0 : index
    %76 = vector.load %arg5[%c3, %c0_30] : memref<8x32xf32, #tpu.memory_space<vmem>>, vector<1x32xf32>
    %cst_31 = arith.constant dense<0.000000e+00> : vector<16xf32>
    %77 = vector.multi_reduction <add>, %74, %cst_31 [1] : vector<16x32xf32> to vector<16xf32>
    %78 = vector.shape_cast %77 : vector<16xf32> to vector<16x1xf32>
    %cst_32 = arith.constant 3.200000e+01 : f32
    %79 = vector.broadcast %cst_32 : f32 to vector<16x1xf32>
    %80 = arith.divf %78, %79 : vector<16x1xf32>
    %81 = arith.mulf %74, %74 : vector<16x32xf32>
    %cst_33 = arith.constant dense<0.000000e+00> : vector<16xf32>
    %82 = vector.multi_reduction <add>, %81, %cst_33 [1] : vector<16x32xf32> to vector<16xf32>
    %83 = vector.shape_cast %82 : vector<16xf32> to vector<16x1xf32>
    %cst_34 = arith.constant 3.200000e+01 : f32
    %84 = vector.broadcast %cst_34 : f32 to vector<16x1xf32>
    %85 = arith.divf %83, %84 : vector<16x1xf32>
    %86 = arith.mulf %80, %80 : vector<16x1xf32>
    %87 = arith.subf %85, %86 : vector<16x1xf32>
    %88 = vector.broadcast %80 : vector<16x1xf32> to vector<16x32xf32>
    %89 = arith.subf %74, %88 : vector<16x32xf32>
    %cst_35 = arith.constant 9.99999974E-6 : f32
    %90 = vector.broadcast %cst_35 : f32 to vector<16x1xf32>
    %91 = arith.addf %87, %90 : vector<16x1xf32>
    %92 = math.rsqrt %91 : vector<16x1xf32>
    %93 = vector.broadcast %92 : vector<16x1xf32> to vector<16x32xf32>
    %94 = arith.mulf %89, %93 : vector<16x32xf32>
    %95 = vector.broadcast %75 : vector<1x32xf32> to vector<16x32xf32>
    %96 = arith.mulf %94, %95 : vector<16x32xf32>
    %97 = vector.broadcast %76 : vector<1x32xf32> to vector<16x32xf32>
    %98 = arith.addf %96, %97 : vector<16x32xf32>
    %c0_36 = arith.constant 0 : index
    %c320 = arith.constant 320 : index
    %99 = vector.load %arg3[%c0_36, %c320] : memref<32x1568xf32, #tpu.memory_space<vmem>>, vector<32x432xf32>
    %cst_37 = arith.constant dense<0.000000e+00> : vector<16x432xf32>
    %100 = tpu.matmul %98, %99, %cst_37 {dimension_numbers = #tpu.dot_dimension_numbers<[1], [0], [0], [1], [0, 0, 1, 1], [], []>} : vector<16x32xf32>, vector<32x432xf32>, vector<16x432xf32> -> vector<16x432xf32>
    %101 = vector.extract_strided_slice %100 {offsets = [0, 0], sizes = [16, 80], strides = [1, 1]} : vector<16x432xf32> to vector<16x80xf32>
    %102 = arith.mulf %101, %4 : vector<16x80xf32>
    %103 = vector.extract_strided_slice %100 {offsets = [0, 80], sizes = [16, 80], strides = [1, 1]} : vector<16x432xf32> to vector<16x80xf32>
    %104 = arith.mulf %103, %5 : vector<16x80xf32>
    %105 = arith.addf %102, %104 : vector<16x80xf32>
    %106 = vector.extract_strided_slice %105 {offsets = [0, 0], sizes = [16, 64], strides = [1, 1]} : vector<16x80xf32> to vector<16x64xf32>
    %107 = vector.extract_strided_slice %105 {offsets = [0, 64], sizes = [16, 16], strides = [1, 1]} : vector<16x80xf32> to vector<16x16xf32>
    %108 = vector.extract_strided_slice %100 {offsets = [0, 160], sizes = [16, 16], strides = [1, 1]} : vector<16x432xf32> to vector<16x16xf32>
    %109 = vector.extract_strided_slice %100 {offsets = [0, 176], sizes = [16, 256], strides = [1, 1]} : vector<16x432xf32> to vector<16x256xf32>
    %110 = vector.extract_strided_slice %106 {offsets = [0, 0], sizes = [16, 16], strides = [1, 1]} : vector<16x64xf32> to vector<16x16xf32>
    %111 = vector.extract_strided_slice %106 {offsets = [0, 16], sizes = [16, 16], strides = [1, 1]} : vector<16x64xf32> to vector<16x16xf32>
    %112 = vector.extract_strided_slice %106 {offsets = [0, 32], sizes = [16, 16], strides = [1, 1]} : vector<16x64xf32> to vector<16x16xf32>
    %113 = vector.extract_strided_slice %106 {offsets = [0, 48], sizes = [16, 16], strides = [1, 1]} : vector<16x64xf32> to vector<16x16xf32>
    %114 = tpu.concatenate %110, %111, %112, %113 in 0 : vector<16x16xf32>, vector<16x16xf32>, vector<16x16xf32>, vector<16x16xf32> -> vector<64x16xf32>
    %cst_38 = arith.constant dense<0.000000e+00> : vector<64x16xf32>
    %115 = tpu.matmul %114, %107, %cst_38 {dimension_numbers = #tpu.dot_dimension_numbers<[1], [1], [0], [0], [0, 0, 1, 0], [], []>} : vector<64x16xf32>, vector<16x16xf32>, vector<64x16xf32> -> vector<64x16xf32>
    %116 = arith.addf %115, %3 : vector<64x16xf32>
    %cst_39 = arith.constant dense<0xFF800000> : vector<64xf32>
    %117 = vector.multi_reduction <maximumf>, %116, %cst_39 [1] : vector<64x16xf32> to vector<64xf32>
    %118 = vector.shape_cast %117 : vector<64xf32> to vector<64x1xf32>
    %119 = vector.broadcast %118 : vector<64x1xf32> to vector<64x16xf32>
    %120 = arith.subf %116, %119 : vector<64x16xf32>
    %121 = math.exp %120 : vector<64x16xf32>
    %cst_40 = arith.constant dense<0.000000e+00> : vector<64xf32>
    %122 = vector.multi_reduction <add>, %121, %cst_40 [1] : vector<64x16xf32> to vector<64xf32>
    %123 = vector.shape_cast %122 : vector<64xf32> to vector<64x1xf32>
    %124 = tpu.reciprocal %123 {approx = true} : vector<64x1xf32> -> vector<64x1xf32>
    %125 = vector.broadcast %124 : vector<64x1xf32> to vector<64x16xf32>
    %126 = arith.mulf %121, %125 : vector<64x16xf32>
    %cst_41 = arith.constant dense<0.000000e+00> : vector<64x16xf32>
    %127 = tpu.matmul %126, %108, %cst_41 {dimension_numbers = #tpu.dot_dimension_numbers<[1], [0], [0], [1], [0, 0, 1, 1], [], []>} : vector<64x16xf32>, vector<16x16xf32>, vector<64x16xf32> -> vector<64x16xf32>
    %128 = vector.extract_strided_slice %127 {offsets = [0, 0], sizes = [16, 16], strides = [1, 1]} : vector<64x16xf32> to vector<16x16xf32>
    %129 = vector.extract_strided_slice %127 {offsets = [16, 0], sizes = [16, 16], strides = [1, 1]} : vector<64x16xf32> to vector<16x16xf32>
    %130 = vector.extract_strided_slice %127 {offsets = [32, 0], sizes = [16, 16], strides = [1, 1]} : vector<64x16xf32> to vector<16x16xf32>
    %131 = vector.extract_strided_slice %127 {offsets = [48, 0], sizes = [16, 16], strides = [1, 1]} : vector<64x16xf32> to vector<16x16xf32>
    %132 = tpu.concatenate %128, %129, %130, %131 in 1 : vector<16x16xf32>, vector<16x16xf32>, vector<16x16xf32>, vector<16x16xf32> -> vector<16x64xf32>
    %133 = vector.extract_strided_slice %109 {offsets = [0, 128], sizes = [16, 128], strides = [1, 1]} : vector<16x256xf32> to vector<16x128xf32>
    %134 = arith.negf %133 : vector<16x128xf32>
    %135 = math.exp %134 : vector<16x128xf32>
    %cst_42 = arith.constant 1.000000e+00 : f32
    %136 = vector.broadcast %cst_42 : f32 to vector<16x128xf32>
    %137 = arith.addf %136, %135 : vector<16x128xf32>
    %138 = arith.divf %136, %137 : vector<16x128xf32>
    %139 = arith.mulf %133, %138 : vector<16x128xf32>
    %140 = vector.extract_strided_slice %109 {offsets = [0, 0], sizes = [16, 128], strides = [1, 1]} : vector<16x256xf32> to vector<16x128xf32>
    %141 = arith.mulf %139, %140 : vector<16x128xf32>
    %c192 = arith.constant 192 : index
    %c0_43 = arith.constant 0 : index
    %142 = vector.load %arg4[%c192, %c0_43] : memref<768x32xf32, #tpu.memory_space<vmem>>, vector<192x32xf32>
    %143 = tpu.concatenate %132, %141 in 1 : vector<16x64xf32>, vector<16x128xf32> -> vector<16x192xf32>
    %cst_44 = arith.constant dense<0.000000e+00> : vector<16x32xf32>
    %144 = tpu.matmul %143, %142, %cst_44 {dimension_numbers = #tpu.dot_dimension_numbers<[1], [0], [0], [1], [0, 0, 1, 1], [], []>} : vector<16x192xf32>, vector<192x32xf32>, vector<16x32xf32> -> vector<16x32xf32>
    %145 = arith.addf %144, %74 : vector<16x32xf32>
    %c4 = arith.constant 4 : index
    %c0_45 = arith.constant 0 : index
    %146 = vector.load %arg5[%c4, %c0_45] : memref<8x32xf32, #tpu.memory_space<vmem>>, vector<1x32xf32>
    %c5 = arith.constant 5 : index
    %c0_46 = arith.constant 0 : index
    %147 = vector.load %arg5[%c5, %c0_46] : memref<8x32xf32, #tpu.memory_space<vmem>>, vector<1x32xf32>
    %cst_47 = arith.constant dense<0.000000e+00> : vector<16xf32>
    %148 = vector.multi_reduction <add>, %145, %cst_47 [1] : vector<16x32xf32> to vector<16xf32>
    %149 = vector.shape_cast %148 : vector<16xf32> to vector<16x1xf32>
    %cst_48 = arith.constant 3.200000e+01 : f32
    %150 = vector.broadcast %cst_48 : f32 to vector<16x1xf32>
    %151 = arith.divf %149, %150 : vector<16x1xf32>
    %152 = arith.mulf %145, %145 : vector<16x32xf32>
    %cst_49 = arith.constant dense<0.000000e+00> : vector<16xf32>
    %153 = vector.multi_reduction <add>, %152, %cst_49 [1] : vector<16x32xf32> to vector<16xf32>
    %154 = vector.shape_cast %153 : vector<16xf32> to vector<16x1xf32>
    %cst_50 = arith.constant 3.200000e+01 : f32
    %155 = vector.broadcast %cst_50 : f32 to vector<16x1xf32>
    %156 = arith.divf %154, %155 : vector<16x1xf32>
    %157 = arith.mulf %151, %151 : vector<16x1xf32>
    %158 = arith.subf %156, %157 : vector<16x1xf32>
    %159 = vector.broadcast %151 : vector<16x1xf32> to vector<16x32xf32>
    %160 = arith.subf %145, %159 : vector<16x32xf32>
    %cst_51 = arith.constant 9.99999974E-6 : f32
    %161 = vector.broadcast %cst_51 : f32 to vector<16x1xf32>
    %162 = arith.addf %158, %161 : vector<16x1xf32>
    %163 = math.rsqrt %162 : vector<16x1xf32>
    %164 = vector.broadcast %163 : vector<16x1xf32> to vector<16x32xf32>
    %165 = arith.mulf %160, %164 : vector<16x32xf32>
    %166 = vector.broadcast %146 : vector<1x32xf32> to vector<16x32xf32>
    %167 = arith.mulf %165, %166 : vector<16x32xf32>
    %168 = vector.broadcast %147 : vector<1x32xf32> to vector<16x32xf32>
    %169 = arith.addf %167, %168 : vector<16x32xf32>
    %c0_52 = arith.constant 0 : index
    %c752 = arith.constant 752 : index
    %170 = vector.load %arg3[%c0_52, %c752] : memref<32x1568xf32, #tpu.memory_space<vmem>>, vector<32x320xf32>
    %cst_53 = arith.constant dense<0.000000e+00> : vector<16x320xf32>
    %171 = tpu.matmul %169, %170, %cst_53 {dimension_numbers = #tpu.dot_dimension_numbers<[1], [0], [0], [1], [0, 0, 1, 1], [], []>} : vector<16x32xf32>, vector<32x320xf32>, vector<16x320xf32> -> vector<16x320xf32>
    %172 = vector.extract_strided_slice %171 {offsets = [0, 0], sizes = [16, 64], strides = [1, 1]} : vector<16x320xf32> to vector<16x64xf32>
    %173 = vector.extract_strided_slice %171 {offsets = [0, 64], sizes = [16, 256], strides = [1, 1]} : vector<16x320xf32> to vector<16x256xf32>
    %174 = vector.extract_strided_slice %7 {offsets = [0, 32], sizes = [16, 32], strides = [1, 1]} : vector<16x64xf32> to vector<16x32xf32>
    %175 = vector.extract_strided_slice %172 {offsets = [0, 0], sizes = [16, 16], strides = [1, 1]} : vector<16x64xf32> to vector<16x16xf32>
    %176 = vector.extract_strided_slice %172 {offsets = [0, 16], sizes = [16, 16], strides = [1, 1]} : vector<16x64xf32> to vector<16x16xf32>
    %177 = vector.extract_strided_slice %172 {offsets = [0, 32], sizes = [16, 16], strides = [1, 1]} : vector<16x64xf32> to vector<16x16xf32>
    %178 = vector.extract_strided_slice %172 {offsets = [0, 48], sizes = [16, 16], strides = [1, 1]} : vector<16x64xf32> to vector<16x16xf32>
    %179 = tpu.concatenate %175, %176, %177, %178 in 0 : vector<16x16xf32>, vector<16x16xf32>, vector<16x16xf32>, vector<16x16xf32> -> vector<64x16xf32>
    %180 = vector.extract_strided_slice %174 {offsets = [0, 0], sizes = [16, 16], strides = [1, 1]} : vector<16x32xf32> to vector<16x16xf32>
    %181 = vector.extract_strided_slice %174 {offsets = [0, 16], sizes = [16, 16], strides = [1, 1]} : vector<16x32xf32> to vector<16x16xf32>
    %cst_54 = arith.constant dense<0.000000e+00> : vector<64x16xf32>
    %182 = tpu.matmul %179, %180, %cst_54 {dimension_numbers = #tpu.dot_dimension_numbers<[1], [1], [0], [0], [0, 0, 1, 0], [], []>} : vector<64x16xf32>, vector<16x16xf32>, vector<64x16xf32> -> vector<64x16xf32>
    %183 = arith.addf %182, %2 : vector<64x16xf32>
    %cst_55 = arith.constant dense<0xFF800000> : vector<64xf32>
    %184 = vector.multi_reduction <maximumf>, %183, %cst_55 [1] : vector<64x16xf32> to vector<64xf32>
    %185 = vector.shape_cast %184 : vector<64xf32> to vector<64x1xf32>
    %186 = vector.broadcast %185 : vector<64x1xf32> to vector<64x16xf32>
    %187 = arith.subf %183, %186 : vector<64x16xf32>
    %188 = math.exp %187 : vector<64x16xf32>
    %cst_56 = arith.constant dense<0.000000e+00> : vector<64xf32>
    %189 = vector.multi_reduction <add>, %188, %cst_56 [1] : vector<64x16xf32> to vector<64xf32>
    %190 = vector.shape_cast %189 : vector<64xf32> to vector<64x1xf32>
    %191 = tpu.reciprocal %190 {approx = true} : vector<64x1xf32> -> vector<64x1xf32>
    %192 = vector.broadcast %191 : vector<64x1xf32> to vector<64x16xf32>
    %193 = arith.mulf %188, %192 : vector<64x16xf32>
    %cst_57 = arith.constant dense<0.000000e+00> : vector<64x16xf32>
    %194 = tpu.matmul %193, %181, %cst_57 {dimension_numbers = #tpu.dot_dimension_numbers<[1], [0], [0], [1], [0, 0, 1, 1], [], []>} : vector<64x16xf32>, vector<16x16xf32>, vector<64x16xf32> -> vector<64x16xf32>
    %195 = vector.extract_strided_slice %194 {offsets = [0, 0], sizes = [16, 16], strides = [1, 1]} : vector<64x16xf32> to vector<16x16xf32>
    %196 = vector.extract_strided_slice %194 {offsets = [16, 0], sizes = [16, 16], strides = [1, 1]} : vector<64x16xf32> to vector<16x16xf32>
    %197 = vector.extract_strided_slice %194 {offsets = [32, 0], sizes = [16, 16], strides = [1, 1]} : vector<64x16xf32> to vector<16x16xf32>
    %198 = vector.extract_strided_slice %194 {offsets = [48, 0], sizes = [16, 16], strides = [1, 1]} : vector<64x16xf32> to vector<16x16xf32>
    %199 = tpu.concatenate %195, %196, %197, %198 in 1 : vector<16x16xf32>, vector<16x16xf32>, vector<16x16xf32>, vector<16x16xf32> -> vector<16x64xf32>
    %200 = vector.extract_strided_slice %173 {offsets = [0, 128], sizes = [16, 128], strides = [1, 1]} : vector<16x256xf32> to vector<16x128xf32>
    %201 = arith.negf %200 : vector<16x128xf32>
    %202 = math.exp %201 : vector<16x128xf32>
    %cst_58 = arith.constant 1.000000e+00 : f32
    %203 = vector.broadcast %cst_58 : f32 to vector<16x128xf32>
    %204 = arith.addf %203, %202 : vector<16x128xf32>
    %205 = arith.divf %203, %204 : vector<16x128xf32>
    %206 = arith.mulf %200, %205 : vector<16x128xf32>
    %207 = vector.extract_strided_slice %173 {offsets = [0, 0], sizes = [16, 128], strides = [1, 1]} : vector<16x256xf32> to vector<16x128xf32>
    %208 = arith.mulf %206, %207 : vector<16x128xf32>
    %c384 = arith.constant 384 : index
    %c0_59 = arith.constant 0 : index
    %209 = vector.load %arg4[%c384, %c0_59] : memref<768x32xf32, #tpu.memory_space<vmem>>, vector<192x32xf32>
    %210 = tpu.concatenate %199, %208 in 1 : vector<16x64xf32>, vector<16x128xf32> -> vector<16x192xf32>
    %cst_60 = arith.constant dense<0.000000e+00> : vector<16x32xf32>
    %211 = tpu.matmul %210, %209, %cst_60 {dimension_numbers = #tpu.dot_dimension_numbers<[1], [0], [0], [1], [0, 0, 1, 1], [], []>} : vector<16x192xf32>, vector<192x32xf32>, vector<16x32xf32> -> vector<16x32xf32>
    %212 = arith.addf %211, %145 : vector<16x32xf32>
    %c6 = arith.constant 6 : index
    %c0_61 = arith.constant 0 : index
    %213 = vector.load %arg5[%c6, %c0_61] : memref<8x32xf32, #tpu.memory_space<vmem>>, vector<1x32xf32>
    %c7 = arith.constant 7 : index
    %c0_62 = arith.constant 0 : index
    %214 = vector.load %arg5[%c7, %c0_62] : memref<8x32xf32, #tpu.memory_space<vmem>>, vector<1x32xf32>
    %cst_63 = arith.constant dense<0.000000e+00> : vector<16xf32>
    %215 = vector.multi_reduction <add>, %212, %cst_63 [1] : vector<16x32xf32> to vector<16xf32>
    %216 = vector.shape_cast %215 : vector<16xf32> to vector<16x1xf32>
    %cst_64 = arith.constant 3.200000e+01 : f32
    %217 = vector.broadcast %cst_64 : f32 to vector<16x1xf32>
    %218 = arith.divf %216, %217 : vector<16x1xf32>
    %219 = arith.mulf %212, %212 : vector<16x32xf32>
    %cst_65 = arith.constant dense<0.000000e+00> : vector<16xf32>
    %220 = vector.multi_reduction <add>, %219, %cst_65 [1] : vector<16x32xf32> to vector<16xf32>
    %221 = vector.shape_cast %220 : vector<16xf32> to vector<16x1xf32>
    %cst_66 = arith.constant 3.200000e+01 : f32
    %222 = vector.broadcast %cst_66 : f32 to vector<16x1xf32>
    %223 = arith.divf %221, %222 : vector<16x1xf32>
    %224 = arith.mulf %218, %218 : vector<16x1xf32>
    %225 = arith.subf %223, %224 : vector<16x1xf32>
    %226 = vector.broadcast %218 : vector<16x1xf32> to vector<16x32xf32>
    %227 = arith.subf %212, %226 : vector<16x32xf32>
    %cst_67 = arith.constant 9.99999974E-6 : f32
    %228 = vector.broadcast %cst_67 : f32 to vector<16x1xf32>
    %229 = arith.addf %225, %228 : vector<16x1xf32>
    %230 = math.rsqrt %229 : vector<16x1xf32>
    %231 = vector.broadcast %230 : vector<16x1xf32> to vector<16x32xf32>
    %232 = arith.mulf %227, %231 : vector<16x32xf32>
    %233 = vector.broadcast %213 : vector<1x32xf32> to vector<16x32xf32>
    %234 = arith.mulf %232, %233 : vector<16x32xf32>
    %235 = vector.broadcast %214 : vector<1x32xf32> to vector<16x32xf32>
    %236 = arith.addf %234, %235 : vector<16x32xf32>
    %c0_68 = arith.constant 0 : index
    %c1072 = arith.constant 1072 : index
    %237 = vector.load %arg3[%c0_68, %c1072] : memref<32x1568xf32, #tpu.memory_space<vmem>>, vector<32x432xf32>
    %cst_69 = arith.constant dense<0.000000e+00> : vector<16x432xf32>
    %238 = tpu.matmul %236, %237, %cst_69 {dimension_numbers = #tpu.dot_dimension_numbers<[1], [0], [0], [1], [0, 0, 1, 1], [], []>} : vector<16x32xf32>, vector<32x432xf32>, vector<16x432xf32> -> vector<16x432xf32>
    %239 = vector.extract_strided_slice %238 {offsets = [0, 0], sizes = [16, 80], strides = [1, 1]} : vector<16x432xf32> to vector<16x80xf32>
    %240 = arith.mulf %239, %4 : vector<16x80xf32>
    %241 = vector.extract_strided_slice %238 {offsets = [0, 80], sizes = [16, 80], strides = [1, 1]} : vector<16x432xf32> to vector<16x80xf32>
    %242 = arith.mulf %241, %5 : vector<16x80xf32>
    %243 = arith.addf %240, %242 : vector<16x80xf32>
    %244 = vector.extract_strided_slice %243 {offsets = [0, 0], sizes = [16, 64], strides = [1, 1]} : vector<16x80xf32> to vector<16x64xf32>
    %245 = vector.extract_strided_slice %243 {offsets = [0, 64], sizes = [16, 16], strides = [1, 1]} : vector<16x80xf32> to vector<16x16xf32>
    %246 = vector.extract_strided_slice %238 {offsets = [0, 160], sizes = [16, 16], strides = [1, 1]} : vector<16x432xf32> to vector<16x16xf32>
    %247 = vector.extract_strided_slice %238 {offsets = [0, 176], sizes = [16, 256], strides = [1, 1]} : vector<16x432xf32> to vector<16x256xf32>
    %248 = vector.extract_strided_slice %244 {offsets = [0, 0], sizes = [16, 16], strides = [1, 1]} : vector<16x64xf32> to vector<16x16xf32>
    %249 = vector.extract_strided_slice %244 {offsets = [0, 16], sizes = [16, 16], strides = [1, 1]} : vector<16x64xf32> to vector<16x16xf32>
    %250 = vector.extract_strided_slice %244 {offsets = [0, 32], sizes = [16, 16], strides = [1, 1]} : vector<16x64xf32> to vector<16x16xf32>
    %251 = vector.extract_strided_slice %244 {offsets = [0, 48], sizes = [16, 16], strides = [1, 1]} : vector<16x64xf32> to vector<16x16xf32>
    %252 = tpu.concatenate %248, %249, %250, %251 in 0 : vector<16x16xf32>, vector<16x16xf32>, vector<16x16xf32>, vector<16x16xf32> -> vector<64x16xf32>
    %cst_70 = arith.constant dense<0.000000e+00> : vector<64x16xf32>
    %253 = tpu.matmul %252, %245, %cst_70 {dimension_numbers = #tpu.dot_dimension_numbers<[1], [1], [0], [0], [0, 0, 1, 0], [], []>} : vector<64x16xf32>, vector<16x16xf32>, vector<64x16xf32> -> vector<64x16xf32>
    %254 = arith.addf %253, %3 : vector<64x16xf32>
    %cst_71 = arith.constant dense<0xFF800000> : vector<64xf32>
    %255 = vector.multi_reduction <maximumf>, %254, %cst_71 [1] : vector<64x16xf32> to vector<64xf32>
    %256 = vector.shape_cast %255 : vector<64xf32> to vector<64x1xf32>
    %257 = vector.broadcast %256 : vector<64x1xf32> to vector<64x16xf32>
    %258 = arith.subf %254, %257 : vector<64x16xf32>
    %259 = math.exp %258 : vector<64x16xf32>
    %cst_72 = arith.constant dense<0.000000e+00> : vector<64xf32>
    %260 = vector.multi_reduction <add>, %259, %cst_72 [1] : vector<64x16xf32> to vector<64xf32>
    %261 = vector.shape_cast %260 : vector<64xf32> to vector<64x1xf32>
    %262 = tpu.reciprocal %261 {approx = true} : vector<64x1xf32> -> vector<64x1xf32>
    %263 = vector.broadcast %262 : vector<64x1xf32> to vector<64x16xf32>
    %264 = arith.mulf %259, %263 : vector<64x16xf32>
    %cst_73 = arith.constant dense<0.000000e+00> : vector<64x16xf32>
    %265 = tpu.matmul %264, %246, %cst_73 {dimension_numbers = #tpu.dot_dimension_numbers<[1], [0], [0], [1], [0, 0, 1, 1], [], []>} : vector<64x16xf32>, vector<16x16xf32>, vector<64x16xf32> -> vector<64x16xf32>
    %266 = vector.extract_strided_slice %265 {offsets = [0, 0], sizes = [16, 16], strides = [1, 1]} : vector<64x16xf32> to vector<16x16xf32>
    %267 = vector.extract_strided_slice %265 {offsets = [16, 0], sizes = [16, 16], strides = [1, 1]} : vector<64x16xf32> to vector<16x16xf32>
    %268 = vector.extract_strided_slice %265 {offsets = [32, 0], sizes = [16, 16], strides = [1, 1]} : vector<64x16xf32> to vector<16x16xf32>
    %269 = vector.extract_strided_slice %265 {offsets = [48, 0], sizes = [16, 16], strides = [1, 1]} : vector<64x16xf32> to vector<16x16xf32>
    %270 = tpu.concatenate %266, %267, %268, %269 in 1 : vector<16x16xf32>, vector<16x16xf32>, vector<16x16xf32>, vector<16x16xf32> -> vector<16x64xf32>
    %271 = vector.extract_strided_slice %247 {offsets = [0, 128], sizes = [16, 128], strides = [1, 1]} : vector<16x256xf32> to vector<16x128xf32>
    %272 = arith.negf %271 : vector<16x128xf32>
    %273 = math.exp %272 : vector<16x128xf32>
    %cst_74 = arith.constant 1.000000e+00 : f32
    %274 = vector.broadcast %cst_74 : f32 to vector<16x128xf32>
    %275 = arith.addf %274, %273 : vector<16x128xf32>
    %276 = arith.divf %274, %275 : vector<16x128xf32>
    %277 = arith.mulf %271, %276 : vector<16x128xf32>
    %278 = vector.extract_strided_slice %247 {offsets = [0, 0], sizes = [16, 128], strides = [1, 1]} : vector<16x256xf32> to vector<16x128xf32>
    %279 = arith.mulf %277, %278 : vector<16x128xf32>
    %c576 = arith.constant 576 : index
    %c0_75 = arith.constant 0 : index
    %280 = vector.load %arg4[%c576, %c0_75] : memref<768x32xf32, #tpu.memory_space<vmem>>, vector<192x32xf32>
    %281 = tpu.concatenate %270, %279 in 1 : vector<16x64xf32>, vector<16x128xf32> -> vector<16x192xf32>
    %cst_76 = arith.constant dense<0.000000e+00> : vector<16x32xf32>
    %282 = tpu.matmul %281, %280, %cst_76 {dimension_numbers = #tpu.dot_dimension_numbers<[1], [0], [0], [1], [0, 0, 1, 1], [], []>} : vector<16x192xf32>, vector<192x32xf32>, vector<16x32xf32> -> vector<16x32xf32>
    %283 = arith.addf %282, %212 : vector<16x32xf32>
    %c0_77 = arith.constant 0 : index
    %c0_78 = arith.constant 0 : index
    %284 = vector.load %arg6[%c0_77, %c0_78] : memref<16x32xf32, #tpu.memory_space<vmem>>, vector<16x32xf32>
    tpu.vector_store %arg6[%c0_77, %c0_78], %283 {strides = array<i32>} : memref<16x32xf32, #tpu.memory_space<vmem>>, vector<16x32xf32>,
    return
  }
}

</mosaic_0001>

<bundles_post_ra>
// kernel: tpu_custom_call.1
= control target key start
LH: loop header
LB: loop body
LE: loop exit
PB: predicated region body
PF: predicated region fallthrough
CT: control target
= control target key end

     0   :  { %vm72_vm0 = vcmask 261120   ;;  %s6025_s0 = inlined_call_operand.vmem [shape: f32[32,32], index: 0, kind: input, shape index: {}]   ;;  %s6026_s1 = inlined_call_operand.vmem [shape: f32[64,32], index: 1, kind: input, shape index: {}]   ;;  %s6027_s2 = inlined_call_operand.vmem [shape: f32[16,160], index: 2, kind: input, shape index: {}]   ;;  %s6028_s3 = inlined_call_operand.vmem [shape: f32[32,1568], index: 3, kind: input, shape index: {}]   ;;  %s6029_s4 = inlined_call_operand.vmem [shape: f32[768,32], index: 4, kind: input, shape index: {}]   ;;  %s6030_s5 = inlined_call_operand.vmem [shape: f32[8,32], index: 5, kind: input, shape index: {}]   ;;  %s6031_s6 = inlined_call_operand.hbm [shape: f32[16,32], index: 6, kind: output, shape index: {}]  }
   0x1   :  { %v4675_v0 = vld [vmem:[%s6025_s0 + $0x8] sm:$0xff]  ;;  %v4680_v1 = vld [vmem:[%s6025_s0] sm:$0xff] }
   0x2   :  { %v167_v2 = vsel %vm72_vm0, %v4675_v0, 0.0  ;;  %v164_v3 = vsel %vm72_vm0, %v4680_v1, 0.0  ;;  %v174_v4 = vmul.f32 %v4675_v0, %v4675_v0  ;;  %v173_v5 = vmul.f32 %v4680_v1, %v4680_v1 }
   0x3   :  { %168 = vadd.xlane.f32.xlu1 %v167_v2  ;;  %165 = vadd.xlane.f32.xlu0 %v164_v3 }
   0x4   :  { %v178_v6 = vsel %vm72_vm0, %v174_v4, 0.0  ;;  %v175_v7 = vsel %vm72_vm0, %v173_v5, 0.0 }
   0x5   :  { %11 = vsyncpa [#allocation3], 0  ;;  %v42_v8 = vld [vmem:[%s6028_s3 + $0xc0] sm:$0xff]  ;;  %v43_v9 = vld [vmem:[%s6028_s3 + $0xc8] sm:$0xff]  ;;  %s4625_s13 = smov 32   ;;  %vm391_vm1 = vcmask 130048  }
   0x6   :  { %v4181_v10 = vpack.i.bf16 %v43_v9, %v42_v8  ;;  %v44_v11 = vld [vmem:[%s6028_s3 + $0x128] sm:$0xff]  ;;  %v45_v12 = vld [vmem:[%s6028_s3 + $0x130] sm:$0xff]  ;;  %v40_v13 = vld [vmem:[%s6028_s3 + $0x58] sm:$0xff]  ;;  %s4627_s26 = smov 112   ;;  %s4628_s27 = smov 96   ;;  %vm829_vm3 = vcmask 523264  }
   0x7   :  { %179 = vadd.xlane.f32.xlu1 %v178_v6  ;;  %176 = vadd.xlane.f32.xlu0 %v175_v7  ;;  %v41_v14 = vld [vmem:[%s6028_s3 + $0x60] sm:$0xff]  ;;  %v4186_v15 = vpack.i.bf16 %v45_v12, %v44_v11  ;;  %v46_v17 = vld [vmem:[%s6028_s3 + $0x190] sm:$0xff]  ;;  %v47_v18 = vld [vmem:[%s6028_s3 + $0x198] sm:$0xff]  ;;  %v4626_v12 = vmov 0.0   ;;  %s4629_s28 = smov 80   ;;  %s4631_s30 = smov 16  }
   0x8   :  { %v4176_v16 = vpack.i.bf16 %v41_v14, %v40_v13  ;;  %v4191_v19 = vpack.i.bf16 %v47_v18, %v46_v17  ;;  %v26_v20 = vld [vmem:[%s6025_s0 + $0x10] sm:$0xff]  ;;  %v208_v50 = vld [vmem:[%s6028_s3 + $0x8] sm:$0xff]  ;;  %v207_v56 = vld [vmem:[%s6028_s3] sm:$0xff]  ;;  %s4632_s11 = smov 48   ;;  %s4633_s17 = smov 64   ;;  %vm770_vm4 = vcmask 392192  }
   0x9   :  { %3755 = vmatprep.mubr.msk.f32.mxu0 %vm72_vm0, %v26_v20  ;;  %v211_v51 = vld [vmem:[%s6028_s3 + $0x70] sm:$0xff]  ;;  %v210_v57 = vld [vmem:[%s6028_s3 + $0x68] sm:$0xff]  ;;  %v214_v58 = vld [vmem:[%s6028_s3 + $0xd8] sm:$0xff]  ;;  %vm2747_vm5 = vcmask 654336  }
   0xa   :  { %v3916_v55 = vpack.c.bf16 %v211_v51, %v208_v50  ;;  %v217_v59 = vld [vmem:[%s6028_s3 + $0x140] sm:$0xff]  ;;  %v27_v62 = vld [vmem:[%s6025_s0 + $0x18] sm:$0xff]  ;;  %v3918_v63 = vpack.c.bf16 %v210_v57, %v207_v56  ;;  %v213_v4 = vld [vmem:[%s6028_s3 + $0xd0] sm:$0xff] }
   0xb   :  { %v3920_v3 = vpack.c.bf16 %v217_v59, %v214_v58  ;;  %v216_v5 = vld [vmem:[%s6028_s3 + $0x138] sm:$0xff]  ;;  %v3529_v7 = vld [vmem:[%s6030_s5] ss:$0 sm:$0xff]  ;;  %v4766_v8 = vld [vmem:[%s6028_s3 + $0x10] sm:$0xff] }
   0xc   :  { %v4771_v9 = vld [vmem:[%s6028_s3 + $0x78] sm:$0xff]  ;;  %v3922_v11 = vpack.c.bf16 %v216_v5, %v213_v4  ;;  %v4785_v17 = vld [vmem:[%s6028_s3 + $0xe0] sm:$0xff]  ;;  %v4790_v18 = vld [vmem:[%s6028_s3 + $0x148] sm:$0xff] }
   0xd   :  { %v3924_v14 = vpack.c.bf16 %v4771_v9, %v4766_v8  ;;  %vm4801_vm2 = vmpackc.low %vm391_vm1, %vm391_vm1 }
  0x18   :  { %4182 = vrot.lane.b32.xlu1 %v4181_v10, %s4625_s13 }
  0x1c   :  { %4187 = vrot.lane.b32.xlu1 %v4186_v15, %s4625_s13 }
  0x1d   :  { %4177 = vrot.lane.b32.xlu0 %v4176_v16, %s4625_s13  ;;  %v3530_v16 = vld [vmem:[%s6030_s5 + $0x1] ss:$0 sm:$0xff] }
  0x20   :  { %4192 = vrot.lane.b32.xlu1 %v4191_v19, %s4625_s13 }
  0x90   :  { %v169_v21 = vpop.xlane.xlu1 %168  ;;  %v166_v22 = vpop.xlane.xlu0 %165 }
  0x91   :  { %v4724_v23 = vmul.f32 0.03125, %v169_v21  ;;  %v171_v24 = vmul.f32 0.03125, %v166_v22  ;;  %v3928_v21 = vpack.c.bf16 %v4790_v18, %v4785_v17 }
  0x93   :  { %v183_v25 = vmul.f32 %v171_v24, %v171_v24  ;;  %v184_v28 = vmul.f32 %v4724_v23, %v4724_v23  ;;  %v187_v61 = vsub.f32 %v4680_v1, %v171_v24  ;;  %v188_v10 = vsub.f32 %v4675_v0, %v4724_v23 }
  0x94   :  { %v180_v26 = vpop.xlane.xlu1 %179  ;;  %v177_v27 = vpop.xlane.xlu0 %176 }
  0x95   :  { %v182_v29 = vmul.f32 0.03125, %v180_v26  ;;  %v181_v30 = vmul.f32 0.03125, %v177_v27 }
  0x97   :  { %v186_v31 = vsub.f32 %v182_v29, %v184_v28  ;;  %v185_v32 = vsub.f32 %v181_v30, %v183_v25 }
  0x98   :  { %v4183_v33 = vpop.permute.xlu1 %4182  ;;  %v4178_v34 = vpop.permute.xlu0 %4177 }
  0x99   :  { %v189_v35 = vadd.f32 1e-05, %v185_v32  ;;  %v4185_v36 = vunpack.i.h.bf16 %v4183_v33  ;;  %v4184_v37 = vunpack.i.l.bf16 %v4183_v33  ;;  %v4180_v38 = vunpack.i.h.bf16 %v4178_v34 }
  0x9a   :  { %v4179_v39 = vunpack.i.l.bf16 %v4178_v34  ;;  %v190_v40 = vadd.f32 1e-05, %v186_v31 }
  0x9b   :  { %v74_v41 = vsel %vm72_vm0, %v4184_v37, %v4185_v36  ;;  %4381 = vrsqrt.f32 %v189_v35 }
  0x9c   :  { %v4188_v42 = vpop.permute.xlu1 %4187  ;;  %v73_v43 = vsel %vm72_vm0, %v4179_v39, %v4180_v38  ;;  %4383 = vrsqrt.f32 %v190_v40 }
  0x9d   :  { %v3908_v44 = vpack.c.bf16 %v74_v41, %v73_v43  ;;  %v4190_v45 = vunpack.i.h.bf16 %v4188_v42  ;;  %v4189_v46 = vunpack.i.l.bf16 %v4188_v42 }
  0x9f   :  { %3909 = vmatprep.subr.bf16.mxu0 %v3908_v44  ;;  %v75_v52 = vsel %vm72_vm0, %v4189_v46, %v4190_v45 }
  0xa0   :  { %3911 = vmatpush3.bf16.msra.mxu0 %v3908_v44  ;;  %v4193_v47 = vpop.permute.xlu1 %4192 }
  0xa1   :  { %v4195_v48 = vunpack.i.h.bf16 %v4193_v47  ;;  %v4194_v49 = vunpack.i.l.bf16 %v4193_v47 }
  0xa3   :  { %v76_v53 = vsel %vm72_vm0, %v4194_v49, %v4195_v48 }
  0xa4   :  { %v3912_v54 = vpack.c.bf16 %v76_v53, %v75_v52 }
  0xa5   :  { %v4382_v60 = vpop.eup %4381 }
  0xa6   :  { %3913 = vmatprep.subr.bf16.mxu0 %v3912_v54  ;;  %v193_v2 = vmul.f32 %v4382_v60, %v187_v61  ;;  %v4384_v6 = vpop.eup %4383 }
  0xa7   :  { %3915 = vmatpush3.bf16.msra.mxu0 %v3912_v54  ;;  %v194_v15 = vmul.f32 %v4384_v6, %v188_v10 }
  0xa8   :  { %3917 = vmatprep.subr.bf16.mxu0 %v3916_v55  ;;  %v199_v13 = vmul.f32 %v3529_v7, %v193_v2  ;;  %v4835_v2 = vld [vmem:[%s6026_s1 + $0x8] sm:$0xff] }
  0xa9   :  { %v200_v20 = vmul.f32 %v3529_v7, %v194_v15  ;;  %v4854_v15 = vld [vmem:[%s6026_s1 + $0x10] sm:$0xff] }
  0xaa   :  { %3756 = vmatmul.mubr.msk.f32.vlgmr.msra.gmra.mrb[0].mxu0 %vm72_vm0, %v27_v62  ;;  %v205_v19 = vadd.f32 %v3530_v16, %v199_v13  ;;  %v4849_v13 = vld [vmem:[%s6026_s1 + $0x18] sm:$0xff] }
  0xab   :  { %3919 = vmatpush1.bf16.msra.mxu0 %v3918_v63  ;;  %289 = vmatprep.mubr.f32.mxu0 %v4626_v12  ;;  %v206_v22 = vadd.f32 %v3530_v16, %v200_v20  ;;  %v4860_v20 = vld [vmem:[%s6026_s1 + $0x28] sm:$0xff] }
  0xac   :  { %3921 = vmatprep.subr.bf16.mxu0 %v3920_v3  ;;  %v4840_v3 = vld [vmem:[%s6026_s1] sm:$0xff] }
  0xaf   :  { %3923 = vmatpush1.bf16.msra.mxu0 %v3922_v11 }
  0xb0   :  { %3925 = vmatprep.subr.bf16.mxu0 %v3924_v14 }
  0xb2   :  { %3531 = vmatmul.mubr.msk.f32.vlgmr.msra.gmra.mrb[2].mxu0 %vm72_vm0, %v205_v19 }
  0xb3   :  { %3927 = vmatpush3.bf16.msra.mxu0 %v3924_v14  ;;  %295 = vmatprep.mubr.f32.mxu0 %v4626_v12 }
  0xb4   :  { %3929 = vmatprep.subr.bf16.mxu0 %v3928_v21 }
  0xb6   :  { %3532 = vmatmul.mubr.msk.f32.gmra.mrb[4].mxu0 %vm72_vm0, %v206_v22 }
  0xb7   :  { %3931 = vmatpush3.bf16.msra.mxu0 %v3928_v21  ;;  %3766 = vmatprep.mubr.msk.f32.mxu0 %vm72_vm0, %v205_v19 }
  0xba   :  { %3767 = vmatmul.mubr.msk.f32.vlgmr.msra.gmra.mrb[6].mxu0 %vm72_vm0, %v206_v22 }
 0x17d   :  { %v3757_v23 = vpop.f32.mrb[0].mxu0 }
 0x17e   :  { %v153_v24 = vpop.f32.mrb[1].mxu0 }
 0x17f   :  { %v4805_v26 = vpack.i.bf16 %v3757_v23, %v153_v24  ;;  %v3932_v27 = vpack.c.bf16 %v3757_v23, %v153_v24  ;;  %v4867_v24 = vld [vmem:[%s6026_s1 + $0x20] sm:$0xff] }
 0x181   :  { %3934 = vmatprep.subr.msk.bf16.mxu1 %vm4801_vm2, %v3932_v27 }
 0x182   :  { %3937 = vmatpush3.bf16.xpose.msk.msra.mxu1 %vm4801_vm2, %v3932_v27 }
 0x185   :  { %v291_v28 = vpop.f32.mrb[2].mxu0 }
 0x186   :  { %379 = vrot.lane.b32.xlu0 %v291_v28, %s4627_s26  ;;  %v293_v29 = vpop.f32.mrb[3].mxu0  ;;  %3773 = vmatprep.mubr.msk.f32.mxu1 %vm391_vm1, %v291_v28 }
 0x187   :  { %v3553_v30 = vmul.f32 -1.442695, %v293_v29 }
 0x189   :  { %4385 = vpow2.f32 %v3553_v30  ;;  %v297_v31 = vpop.f32.mrb[4].mxu0 }
 0x18a   :  { %383 = vrot.lane.b32.xlu0 %v291_v28, %s4628_s27  ;;  %381 = vrot.lane.b32.xlu1 %v297_v31, %s4627_s26  ;;  %v299_v32 = vpop.f32.mrb[5].mxu0 }
 0x18b   :  { %v3555_v33 = vmul.f32 -1.442695, %v299_v32  ;;  %3774 = vmatmul.mubr.msk.f32.vlgmr.msra.gmra.mrb[0].mxu1 %vm391_vm1, %v297_v31 }
 0x18d   :  { %4387 = vpow2.f32 %v3555_v33  ;;  %v3768_v34 = vpop.f32.mrb[6].mxu0 }
 0x18e   :  { %v3556_v35 = vmul.f32 -1.442695, %v3768_v34  ;;  %387 = vrot.lane.b32.xlu0 %v291_v28, %s4629_s28  ;;  %385 = vrot.lane.b32.xlu1 %v297_v31, %s4628_s27  ;;  %v368_v36 = vpop.f32.mrb[7].mxu0 }
 0x18f   :  { %v3554_v37 = vmul.f32 -1.442695, %v368_v36 }
 0x190   :  { %4389 = vpow2.f32 %v3556_v35 }
 0x191   :  { %4391 = vpow2.f32 %v3554_v37 }
 0x192   :  { %389 = vrot.lane.b32.xlu1 %v297_v31, %s4629_s28 }
 0x193   :  { %v4386_v38 = vpop.eup %4385 }
 0x194   :  { %v785_v39 = vadd.f32 1.0, %v4386_v38 }
 0x196   :  { %4393 = vrcp.f32 %v785_v39 }
 0x197   :  { %v4388_v40 = vpop.eup %4387 }
 0x198   :  { %v787_v41 = vadd.f32 1.0, %v4388_v40 }
 0x19a   :  { %v4390_v42 = vpop.eup %4389  ;;  %4395 = vrcp.f32 %v787_v41 }
 0x19b   :  { %v4392_v43 = vpop.eup %4391  ;;  %v788_v44 = vadd.f32 1.0, %v4390_v42 }
 0x19c   :  { %v786_v45 = vadd.f32 1.0, %v4392_v43 }
 0x19d   :  { %4397 = vrcp.f32 %v788_v44 }
 0x19e   :  { %4399 = vrcp.f32 %v786_v45 }
 0x1a0   :  { %v4394_v46 = vpop.eup %4393 }
 0x1a1   :  { %v797_v47 = vmul.f32 %v4394_v46, %v293_v29 }
 0x1a3   :  { %v4819_v48 = vmul.f32 %v797_v47, %v291_v28 }
 0x1a4   :  { %v4396_v49 = vpop.eup %4395 }
 0x1a5   :  { %v799_v50 = vmul.f32 %v4396_v49, %v299_v32 }
 0x1a7   :  { %v4398_v51 = vpop.eup %4397  ;;  %v4821_v52 = vmul.f32 %v799_v50, %v297_v31 }
 0x1a8   :  { %v4400_v53 = vpop.eup %4399  ;;  %v800_v54 = vmul.f32 %v4398_v51, %v3768_v34  ;;  %v4881_v34 = vld [vmem:[%s6026_s1 + $0x30] sm:$0xff] }
 0x1a9   :  { %v798_v55 = vmul.f32 %v4400_v53, %v368_v36 }
 0x1aa   :  { %v4823_v56 = vmul.f32 %v800_v54, %v299_v32 }
 0x1ab   :  { %v802_v57 = vmul.f32 %v798_v55, %v293_v29  ;;  %v4873_v29 = vld [vmem:[%s6026_s1 + $0x38] sm:$0xff] }
 0x1f8   :  { %v380_v58 = vpop.permute.xlu0 %379 }
 0x1f9   :  { %3776 = vmatprep.mubr.msk.f32.mxu1 %vm391_vm1, %v380_v58 }
 0x1fc   :  { %v384_v59 = vpop.permute.xlu0 %383  ;;  %v382_v60 = vpop.permute.xlu1 %381 }
 0x1fd   :  { %3777 = vmatmul.mubr.msk.f32.gmra.mrb[2].mxu1 %vm391_vm1, %v382_v60 }
 0x1fe   :  { %3779 = vmatprep.mubr.msk.f32.mxu1 %vm391_vm1, %v384_v59 }
 0x200   :  { %v388_v61 = vpop.permute.xlu0 %387  ;;  %v386_v62 = vpop.permute.xlu1 %385 }
 0x201   :  { %3780 = vmatmul.mubr.msk.f32.gmra.mrb[4].mxu1 %vm391_vm1, %v386_v62 }
 0x202   :  { %3782 = vmatprep.mubr.msk.f32.mxu1 %vm391_vm1, %v388_v61 }
 0x204   :  { %v390_v63 = vpop.permute.xlu1 %389 }
 0x205   :  { %3783 = vmatmul.mubr.msk.f32.gmra.mrb[6].mxu1 %vm391_vm1, %v390_v63 }
 0x206   :  { %3557 = vmatprep.mubr.msk.f32.mxu1 %vm829_vm3, %v802_v57 }
 0x25e   :  { %v3775_v4 = vpop.f32.mrb[0].mxu1 }
 0x25f   :  { %v486_v5 = vadd.f32 %v3775_v4, %v4835_v2  ;;  %v480_v6 = vpop.f32.mrb[1].mxu1 }
 0x260   :  { %v481_v7 = vadd.f32 %v480_v6, %v4840_v3 }
 0x261   :  { %v522_v10 = vsel %vm391_vm1, %v486_v5, -inf }
 0x262   :  { %523 = vmax.xlane.f32.xlu1 %v522_v10  ;;  %v519_v11 = vsel %vm391_vm1, %v481_v7, -inf }
 0x263   :  { %520 = vmax.xlane.f32.xlu0 %v519_v11 }
 0x2d0   :  { %v3778_v14 = vpop.f32.mrb[2].mxu1 }
 0x2d1   :  { %v496_v16 = vadd.f32 %v3778_v14, %v4849_v13  ;;  %v490_v19 = vpop.f32.mrb[3].mxu1 }
 0x2d2   :  { %v491_v21 = vadd.f32 %v490_v19, %v4854_v15 }
 0x2d3   :  { %v528_v22 = vsel %vm391_vm1, %v496_v16, -inf }
 0x2d4   :  { %v3781_v23 = vpop.f32.mrb[4].mxu1  ;;  %529 = vmax.xlane.f32.xlu0 %v528_v22  ;;  %v525_v32 = vsel %vm391_vm1, %v491_v21, -inf }
 0x2d5   :  { %v506_v27 = vadd.f32 %v3781_v23, %v4860_v20  ;;  %v500_v28 = vpop.f32.mrb[5].mxu1 }
 0x2d6   :  { %v501_v30 = vadd.f32 %v500_v28, %v4867_v24 }
 0x2d7   :  { %v534_v31 = vsel %vm391_vm1, %v506_v27, -inf }
 0x2d8   :  { %535 = vmax.xlane.f32.xlu1 %v534_v31  ;;  %v3784_v33 = vpop.f32.mrb[6].mxu1  ;;  %526 = vmax.xlane.f32.xlu0 %v525_v32  ;;  %v531_v39 = vsel %vm391_vm1, %v501_v30, -inf }
 0x2d9   :  { %v516_v35 = vadd.f32 %v3784_v33, %v4873_v29  ;;  %v510_v36 = vpop.f32.mrb[7].mxu1 }
 0x2da   :  { %v511_v37 = vadd.f32 %v510_v36, %v4881_v34 }
 0x2db   :  { %v540_v38 = vsel %vm391_vm1, %v516_v35, -inf }
 0x2dc   :  { %541 = vmax.xlane.f32.xlu1 %v540_v38  ;;  %532 = vmax.xlane.f32.xlu0 %v531_v39  ;;  %v537_v40 = vsel %vm391_vm1, %v511_v37, -inf }
 0x2e0   :  { %538 = vmax.xlane.f32.xlu0 %v537_v40 }
 0x2ef   :  { %v524_v41 = vpop.xlane.xlu1 %523 }
 0x2f0   :  { %v544_v42 = vsub.f32 %v486_v5, %v524_v41  ;;  %v521_v43 = vpop.xlane.xlu0 %520 }
 0x2f1   :  { %v543_v44 = vsub.f32 %v481_v7, %v521_v43 }
 0x2f2   :  { %v553_v45 = vmul.f32 1.442695, %v544_v42 }
 0x2f3   :  { %v551_v46 = vmul.f32 1.442695, %v543_v44 }
 0x2f4   :  { %4401 = vpow2.f32 %v553_v45 }
 0x2f5   :  { %4403 = vpow2.f32 %v551_v46 }
 0x2fe   :  { %v4888_v47 = vpop.eup %4401 }
 0x2ff   :  { %v4404_v49 = vpop.eup %4403  ;;  %v570_v50 = vsel %vm391_vm1, %v4888_v47, 0.0 }
 0x300   :  { %571 = vadd.xlane.f32.xlu1 %v570_v50  ;;  %v567_v51 = vsel %vm391_vm1, %v4404_v49, 0.0 }
 0x301   :  { %568 = vadd.xlane.f32.xlu0 %v567_v51 }
 0x361   :  { %v530_v53 = vpop.xlane.xlu0 %529 }
 0x362   :  { %v546_v54 = vsub.f32 %v496_v16, %v530_v53 }
 0x364   :  { %v557_v55 = vmul.f32 1.442695, %v546_v54 }
 0x365   :  { %v536_v57 = vpop.xlane.xlu1 %535  ;;  %v527_v58 = vpop.xlane.xlu0 %526 }
 0x366   :  { %4405 = vpow2.f32 %v557_v55  ;;  %v548_v59 = vsub.f32 %v506_v27, %v536_v57  ;;  %v545_v60 = vsub.f32 %v491_v21, %v527_v58 }
 0x368   :  { %v561_v61 = vmul.f32 1.442695, %v548_v59  ;;  %v555_v62 = vmul.f32 1.442695, %v545_v60 }
 0x369   :  { %v542_v63 = vpop.xlane.xlu1 %541  ;;  %v533_v4 = vpop.xlane.xlu0 %532 }
 0x36a   :  { %4407 = vpow2.f32 %v561_v61  ;;  %v550_v5 = vsub.f32 %v516_v35, %v542_v63  ;;  %v547_v6 = vsub.f32 %v501_v30, %v533_v4 }
 0x36b   :  { %4409 = vpow2.f32 %v555_v62 }
 0x36c   :  { %v565_v7 = vmul.f32 1.442695, %v550_v5  ;;  %v559_v10 = vmul.f32 1.442695, %v547_v6 }
 0x36d   :  { %v539_v11 = vpop.xlane.xlu0 %538 }
 0x36e   :  { %4411 = vpow2.f32 %v565_v7  ;;  %v549_v14 = vsub.f32 %v511_v37, %v539_v11  ;;  %v806_v11 = vld [vmem:[%s6029_s4 + $0x8] sm:$0xff] }
 0x36f   :  { %4413 = vpow2.f32 %v559_v10  ;;  %v805_v10 = vld [vmem:[%s6029_s4] sm:$0xff] }
 0x370   :  { %v4406_v16 = vpop.eup %4405  ;;  %v563_v19 = vmul.f32 1.442695, %v549_v14  ;;  %v807_v14 = vld [vmem:[%s6029_s4 + $0x10] sm:$0xff] }
 0x371   :  { %v576_v22 = vsel %vm391_vm1, %v4406_v16, 0.0 }
 0x372   :  { %4415 = vpow2.f32 %v563_v19  ;;  %577 = vadd.xlane.f32.xlu1 %v576_v22  ;;  %v3943_v19 = vpack.c.bf16 %v806_v11, %v805_v10  ;;  %v808_v22 = vld [vmem:[%s6029_s4 + $0x18] sm:$0xff]  ;;  %v963_v10 = vld [vmem:[%s6028_s3 + $0x88] sm:$0xff] }
 0x374   :  { %v4408_v21 = vpop.eup %4407 }
 0x375   :  { %v4410_v23 = vpop.eup %4409  ;;  %v582_v27 = vsel %vm391_vm1, %v4408_v21, 0.0 }
 0x376   :  { %583 = vadd.xlane.f32.xlu1 %v582_v27  ;;  %v573_v28 = vsel %vm391_vm1, %v4410_v23, 0.0  ;;  %v810_v27 = vld [vmem:[%s6029_s4 + $0x28] sm:$0xff] }
 0x377   :  { %574 = vadd.xlane.f32.xlu0 %v573_v28 }
 0x378   :  { %v4412_v30 = vpop.eup %4411 }
 0x379   :  { %v4414_v31 = vpop.eup %4413  ;;  %v588_v32 = vsel %vm391_vm1, %v4412_v30, 0.0 }
 0x37a   :  { %589 = vadd.xlane.f32.xlu1 %v588_v32  ;;  %v579_v33 = vsel %vm391_vm1, %v4414_v31, 0.0 }
 0x37b   :  { %580 = vadd.xlane.f32.xlu0 %v579_v33  ;;  %v813_v33 = vld [vmem:[%s6029_s4 + $0x40] sm:$0xff] }
 0x37c   :  { %v4416_v35 = vpop.eup %4415 }
 0x37d   :  { %v585_v36 = vsel %vm391_vm1, %v4416_v35, 0.0 }
 0x37f   :  { %586 = vadd.xlane.f32.xlu0 %v585_v36 }
 0x38d   :  { %v572_v40 = vpop.xlane.xlu1 %571 }
 0x38e   :  { %v569_v37 = vpop.xlane.xlu0 %568 }
 0x38f   :  { %4417 = vrcp.f32 %v569_v37  ;;  %v815_v37 = vld [vmem:[%s6029_s4 + $0x50] sm:$0xff] }
 0x390   :  { %4419 = vrcp.f32 %v572_v40  ;;  %v817_v40 = vld [vmem:[%s6029_s4 + $0x60] sm:$0xff] }
 0x395   :  { %4197 = vrot.lane.b32.xlu0 %v4805_v26, %s4627_s26 }
 0x399   :  { %v4418_v38 = vpop.eup %4417 }
 0x39a   :  { %v599_v39 = vmul.f32 %v4418_v38, %v4404_v49  ;;  %v4420_v49 = vpop.eup %4419  ;;  %v816_v38 = vld [vmem:[%s6029_s4 + $0x58] sm:$0xff] }
 0x39b   :  { %v600_v57 = vmul.f32 %v4420_v49, %v4888_v47 }
 0x39c   :  { %3789 = vmatprep.mubr.msk.f32.mxu0 %vm391_vm1, %v599_v39  ;;  %v3958_v39 = vpack.c.bf16 %v816_v38, %v815_v37 }
 0x3ff   :  { %v578_v42 = vpop.xlane.xlu1 %577 }
 0x403   :  { %v584_v45 = vpop.xlane.xlu1 %583 }
 0x404   :  { %v575_v41 = vpop.xlane.xlu0 %574 }
 0x405   :  { %4421 = vrcp.f32 %v575_v41  ;;  %v818_v41 = vld [vmem:[%s6029_s4 + $0x68] sm:$0xff] }
 0x406   :  { %4423 = vrcp.f32 %v578_v42  ;;  %v3961_v42 = vpack.c.bf16 %v818_v41, %v817_v40 }
 0x407   :  { %v590_v53 = vpop.xlane.xlu1 %589 }
 0x408   :  { %v581_v43 = vpop.xlane.xlu0 %580 }
 0x409   :  { %4425 = vrcp.f32 %v581_v43  ;;  %v819_v43 = vld [vmem:[%s6029_s4 + $0x70] sm:$0xff] }
 0x40a   :  { %4427 = vrcp.f32 %v584_v45 }
 0x40c   :  { %v587_v44 = vpop.xlane.xlu0 %586 }
 0x40d   :  { %4429 = vrcp.f32 %v587_v44  ;;  %v820_v44 = vld [vmem:[%s6029_s4 + $0x78] sm:$0xff] }
 0x40e   :  { %4431 = vrcp.f32 %v590_v53  ;;  %v3964_v45 = vpack.c.bf16 %v820_v44, %v819_v43  ;;  %v823_v53 = vld [vmem:[%s6029_s4 + $0x90] sm:$0xff] }
 0x40f   :  { %v4422_v55 = vpop.eup %4421 }
 0x410   :  { %v4198_v46 = vpop.permute.xlu0 %4197  ;;  %v4424_v58 = vpop.eup %4423  ;;  %v601_v59 = vmul.f32 %v4422_v55, %v4410_v23  ;;  %v809_v23 = vld [vmem:[%s6029_s4 + $0x20] sm:$0xff] }
 0x411   :  { %v4200_v50 = vunpack.i.h.bf16 %v4198_v46  ;;  %v4199_v51 = vunpack.i.l.bf16 %v4198_v46  ;;  %v602_v61 = vmul.f32 %v4424_v58, %v4406_v16  ;;  %v4630_v16 = vmov 0.0|0.0   ;;  %v821_v46 = vld [vmem:[%s6029_s4 + $0x80] sm:$0xff] }
 0x412   :  { %3942 = vmatprep.subr.bf16.mxu1 %v4630_v16  ;;  %v3949_v28 = vpack.c.bf16 %v810_v27, %v809_v23  ;;  %v825_v55 = vld [vmem:[%s6029_s4 + $0xa0] sm:$0xff]  ;;  %v4211_v27 = vpack.i.bf16 %v4771_v9, %v4766_v8 }
 0x413   :  { %v3938_v54 = vpack.c.bf16 %v4200_v50, %v4199_v51  ;;  %v4426_v60 = vpop.eup %4425  ;;  %3944 = vmatpush1.bf16.msra.mxu1 %v3943_v19  ;;  %v822_v50 = vld [vmem:[%s6029_s4 + $0x88] sm:$0xff] }
 0x414   :  { %v4428_v62 = vpop.eup %4427  ;;  %v603_v63 = vmul.f32 %v4426_v60, %v4414_v31  ;;  %3945 = vmatprep.subr.bf16.mxu1 %v4630_v16  ;;  %v812_v31 = vld [vmem:[%s6029_s4 + $0x38] sm:$0xff]  ;;  %v3967_v51 = vpack.c.bf16 %v822_v50, %v821_v46 }
 0x415   :  { %3939 = vmatprep.subr.bf16.mxu0 %v3938_v54  ;;  %v604_v5 = vmul.f32 %v4428_v62, %v4408_v21  ;;  %v3946_v21 = vpack.c.bf16 %v808_v22, %v807_v14  ;;  %v828_v60 = vld [vmem:[%s6029_s4 + $0xb8] sm:$0xff] }
 0x416   :  { %3941 = vmatpush3.bf16.msra.mxu0 %v3938_v54  ;;  %v824_v54 = vld [vmem:[%s6029_s4 + $0x98] sm:$0xff] }
 0x417   :  { %v4430_v4 = vpop.eup %4429  ;;  %3947 = vmatpush1.bf16.msra.mxu1 %v3946_v21  ;;  %v3970_v49 = vpack.c.bf16 %v824_v54, %v823_v53  ;;  %v958_v22 = vld [vmem:[%s6028_s3 + $0x18] sm:$0xff]  ;;  %v959_v21 = vld [vmem:[%s6028_s3 + $0x20] sm:$0xff] }
 0x418   :  { %v4432_v6 = vpop.eup %4431  ;;  %v605_v7 = vmul.f32 %v4430_v4, %v4416_v35  ;;  %3948 = vmatprep.subr.bf16.mxu1 %v4630_v16  ;;  %v814_v35 = vld [vmem:[%s6029_s4 + $0x48] sm:$0xff]  ;;  %v4201_v23 = vpack.i.bf16 %v959_v21, %v958_v22  ;;  %v4226_v21 = vpack.i.bf16 %v4790_v18, %v4785_v17 }
 0x419   :  { %3790 = vmatmul.mubr.msk.f32.vlgmr.msra.gmra.mrb[8].mxu0 %vm391_vm1, %v600_v57  ;;  %v606_v47 = vmul.f32 %v4432_v6, %v4412_v30  ;;  %v811_v30 = vld [vmem:[%s6029_s4 + $0x30] sm:$0xff]  ;;  %v3955_v36 = vpack.c.bf16 %v814_v35, %v813_v33  ;;  %v826_v57 = vld [vmem:[%s6029_s4 + $0xa8] sm:$0xff] }
 0x41a   :  { %3792 = vmatprep.mubr.msk.f32.mxu0 %vm391_vm1, %v601_v59  ;;  %v3952_v32 = vpack.c.bf16 %v812_v31, %v811_v30  ;;  %v3973_v58 = vpack.c.bf16 %v826_v57, %v825_v55  ;;  %v827_v59 = vld [vmem:[%s6029_s4 + $0xb0] sm:$0xff] }
 0x41b   :  { %3950 = vmatpush1.bf16.msra.mxu1 %v3949_v28  ;;  %v966_v28 = vld [vmem:[%s6028_s3 + $0xe8] sm:$0xff]  ;;  %v967_v30 = vld [vmem:[%s6028_s3 + $0xf0] sm:$0xff] }
 0x41c   :  { %3951 = vmatprep.subr.bf16.mxu1 %v4630_v16  ;;  %v4216_v31 = vpack.i.bf16 %v967_v30, %v966_v28 }
 0x41d   :  { %3793 = vmatmul.mubr.msk.f32.gmra.mrb[10].mxu0 %vm391_vm1, %v602_v61  ;;  %v3976_v61 = vpack.c.bf16 %v828_v60, %v827_v59 }
 0x41e   :  { %3795 = vmatprep.mubr.msk.f32.mxu0 %vm391_vm1, %v603_v63 }
 0x41f   :  { %3953 = vmatpush1.bf16.msra.mxu1 %v3952_v32 }
 0x420   :  { %3954 = vmatprep.subr.bf16.mxu1 %v4630_v16 }
 0x421   :  { %3796 = vmatmul.mubr.msk.f32.gmra.mrb[12].mxu0 %vm391_vm1, %v604_v5 }
 0x422   :  { %3798 = vmatprep.mubr.msk.f32.mxu0 %vm391_vm1, %v605_v7 }
 0x423   :  { %3956 = vmatpush1.bf16.msra.mxu1 %v3955_v36 }
 0x424   :  { %3957 = vmatprep.subr.bf16.mxu1 %v4630_v16 }
 0x425   :  { %3799 = vmatmul.mubr.msk.f32.gmra.mrb[14].mxu0 %vm391_vm1, %v606_v47  ;;  %v962_v47 = vld [vmem:[%s6028_s3 + $0x80] sm:$0xff] }
 0x426   :  { %1119 = vmatprep.mubr.f32.mxu0 %v4626_v12  ;;  %v4206_v19 = vpack.i.bf16 %v963_v10, %v962_v47 }
 0x427   :  { %3959 = vmatpush1.bf16.msra.mxu1 %v3958_v39 }
 0x428   :  { %3960 = vmatprep.subr.bf16.mxu1 %v4630_v16 }
 0x42b   :  { %3962 = vmatpush1.bf16.msra.mxu1 %v3961_v42 }
 0x42c   :  { %3963 = vmatprep.subr.bf16.mxu1 %v4630_v16 }
 0x42f   :  { %3965 = vmatpush1.bf16.msra.mxu1 %v3964_v45 }
 0x430   :  { %3966 = vmatprep.subr.bf16.mxu1 %v4630_v16 }
 0x433   :  { %3968 = vmatpush1.bf16.msra.mxu1 %v3967_v51 }
 0x434   :  { %3969 = vmatprep.subr.bf16.mxu1 %v4630_v16 }
 0x437   :  { %3971 = vmatpush1.bf16.msra.mxu1 %v3970_v49 }
 0x438   :  { %3972 = vmatprep.subr.bf16.mxu1 %v4630_v16 }
 0x43b   :  { %3974 = vmatpush1.bf16.msra.mxu1 %v3973_v58 }
 0x43c   :  { %3975 = vmatprep.subr.bf16.mxu1 %v4630_v16 }
 0x43f   :  { %3977 = vmatpush1.bf16.msra.mxu1 %v3976_v61 }
 0x440   :  { %4004 = vmatprep.subr.bf16.mxu1 %v4630_v16 }
 0x4ec   :  { %v3791_v62 = vpop.f32.mrb[8].mxu0 }
 0x4ed   :  { %v703_v63 = vpop.f32.mrb[9].mxu0 }
 0x4f0   :  { %v3794_v4 = vpop.f32.mrb[10].mxu0 }
 0x4f1   :  { %746 = vrot.lane.b32.xlu0 %v3794_v4, %s4631_s30  ;;  %v713_v5 = vpop.f32.mrb[11].mxu0 }
 0x4f2   :  { %744 = vrot.lane.b32.xlu1 %v713_v5, %s4631_s30 }
 0x4f4   :  { %v3797_v6 = vpop.f32.mrb[12].mxu0 }
 0x4f5   :  { %v723_v7 = vpop.f32.mrb[13].mxu0 }
 0x4f6   :  { %752 = vrot.lane.b32.xlu1 %v723_v7, %s4625_s13 }
 0x4f8   :  { %v3800_v11 = vpop.f32.mrb[14].mxu0 }
 0x4f9   :  { %762 = vrot.lane.b32.xlu0 %v3800_v11, %s4632_s11  ;;  %v733_v14 = vpop.f32.mrb[15].mxu0 }
 0x4fa   :  { %760 = vrot.lane.b32.xlu1 %v733_v14, %s4632_s11 }
 0x4fd   :  { %4207 = vrot.lane.b32.xlu0 %v4206_v19, %s4633_s17  ;;  %v970_v19 = vld [vmem:[%s6028_s3 + $0x150] sm:$0xff] }
 0x4fe   :  { %754 = vrot.lane.b32.xlu1 %v3797_v6, %s4625_s13 }
 0x502   :  { %4202 = vrot.lane.b32.xlu1 %v4201_v23, %s4633_s17 }
 0x506   :  { %4212 = vrot.lane.b32.xlu1 %v4211_v27, %s4633_s17 }
 0x50a   :  { %4217 = vrot.lane.b32.xlu1 %v4216_v31, %s4633_s17 }
 0x563   :  { %v747_v36 = vpop.permute.xlu0 %746 }
 0x564   :  { %v745_v32 = vpop.permute.xlu1 %744  ;;  %v767_v39 = vsel %vm391_vm1, %v3791_v62, %v747_v36 }
 0x565   :  { %v766_v35 = vsel %vm391_vm1, %v703_v63, %v745_v32 }
 0x568   :  { %v753_v33 = vpop.permute.xlu1 %752 }
 0x569   :  { %v768_v8 = vsel %vm72_vm0, %v766_v35, %v753_v33 }
 0x56b   :  { %v763_v41 = vpop.permute.xlu0 %762 }
 0x56c   :  { %v761_v9 = vpop.permute.xlu1 %760 }
 0x56d   :  { %v771_v37 = vsel %vm770_vm4, %v768_v8, %v761_v9 }
 0x56e   :  { %v830_v38 = vsel %vm829_vm3, %v771_v37, %v4819_v48 }
 0x56f   :  { %903 = vmatmul.mubr.f32.vlgmr.msra.gmra.mrb[8].mxu1 %v830_v38  ;;  %v5040_v46 = vpop.permute.xlu0 %4207 }
 0x570   :  { %3558 = vmatprep.mubr.msk.f32.mxu1 %vm829_vm3, %v4823_v56  ;;  %v755_v40 = vpop.permute.xlu1 %754  ;;  %v4210_v56 = vunpack.i.h.bf16 %v5040_v46  ;;  %v4209_v51 = vunpack.i.l.bf16 %v5040_v46 }
 0x571   :  { %v769_v42 = vsel %vm72_vm0, %v767_v39, %v755_v40 }
 0x572   :  { %v772_v43 = vsel %vm770_vm4, %v769_v42, %v763_v41 }
 0x573   :  { %v831_v44 = vsel %vm829_vm3, %v772_v43, %v4821_v52  ;;  %v1025_v52 = vsel %vm829_vm3, %v4209_v51, %v4210_v56 }
 0x574   :  { %908 = vmatmul.mubr.f32.gmra.mrb[10].mxu1 %v831_v44  ;;  %v5038_v45 = vpop.permute.xlu1 %4202 }
 0x575   :  { %v4205_v48 = vunpack.i.h.bf16 %v5038_v45  ;;  %v4204_v50 = vunpack.i.l.bf16 %v5038_v45 }
 0x577   :  { %v1022_v53 = vsel %vm829_vm3, %v4204_v50, %v4205_v48 }
 0x578   :  { %v4213_v54 = vpop.permute.xlu1 %4212  ;;  %v3978_v49 = vpack.c.bf16 %v1025_v52, %v1022_v53 }
 0x579   :  { %v4215_v55 = vunpack.i.h.bf16 %v4213_v54  ;;  %v4214_v57 = vunpack.i.l.bf16 %v4213_v54 }
 0x57a   :  { %3979 = vmatprep.subr.bf16.mxu0 %v3978_v49 }
 0x57b   :  { %v1024_v58 = vsel %vm829_vm3, %v4215_v55, %v4209_v51  ;;  %v1021_v59 = vsel %vm829_vm3, %v4214_v57, %v4204_v50 }
 0x57c   :  { %v3980_v60 = vpack.c.bf16 %v1024_v58, %v1021_v59  ;;  %v5080_v23 = vpop.permute.xlu1 %4217 }
 0x57d   :  { %v4220_v31 = vunpack.i.h.bf16 %v5080_v23  ;;  %v4219_v32 = vunpack.i.l.bf16 %v5080_v23 }
 0x57e   :  { %3981 = vmatpush1.bf16.msra.mxu0 %v3980_v60  ;;  %v3559_v60 = vld [vmem:[%s6030_s5 + $0x2] ss:$0 sm:$0xff] }
 0x57f   :  { %v1028_v39 = vsel %vm829_vm3, %v4219_v32, %v4220_v31 }
 0x642   :  { %v904_v61 = vpop.f32.mrb[8].mxu1 }
 0x643   :  { %v5055_v62 = vadd.f32 %v904_v61, %v4680_v1  ;;  %v906_v63 = vpop.f32.mrb[9].mxu1 }
 0x644   :  { %v3560_v63 = vld [vmem:[%s6030_s5 + $0x3] ss:$0 sm:$0xff] }
 0x645   :  { %v915_v4 = vsel %vm72_vm0, %v5055_v62, 0.0  ;;  %v923_v5 = vmul.f32 %v5055_v62, %v5055_v62 }
 0x646   :  { %916 = vadd.xlane.f32.xlu1 %v915_v4 }
 0x647   :  { %v909_v6 = vpop.f32.mrb[10].mxu1  ;;  %v925_v7 = vsel %vm72_vm0, %v923_v5, 0.0 }
 0x648   :  { %v5063_v47 = vadd.f32 %v909_v6, %v4675_v0  ;;  %926 = vadd.xlane.f32.xlu0 %v925_v7  ;;  %v911_v10 = vpop.f32.mrb[11].mxu1  ;;  %v971_v0 = vld [vmem:[%s6028_s3 + $0x158] sm:$0xff] }
 0x649   :  { %v4221_v22 = vpack.i.bf16 %v971_v0, %v970_v19  ;;  %v38_v19 = vld [vmem:[%s6027_s2 + $0x8] sm:$0xff] }
 0x64a   :  { %v918_v1 = vsel %vm72_vm0, %v5063_v47, 0.0  ;;  %v924_v11 = vmul.f32 %v5063_v47, %v5063_v47 }
 0x64c   :  { %919 = vadd.xlane.f32.xlu0 %v918_v1  ;;  %v928_v14 = vsel %vm72_vm0, %v924_v11, 0.0 }
 0x650   :  { %929 = vadd.xlane.f32.xlu0 %v928_v14  ;;  %v36_v14 = vld [vmem:[%s6027_s2] sm:$0xff] }
 0x657   :  { %4222 = vrot.lane.b32.xlu1 %v4221_v22, %s4633_s17 }
 0x666   :  { %4227 = vrot.lane.b32.xlu0 %v4226_v21, %s4633_s17 }
 0x6d3   :  { %v917_v27 = vpop.xlane.xlu1 %916 }
 0x6d4   :  { %v921_v28 = vmul.f32 0.03125, %v917_v27 }
 0x6d5   :  { %v927_v30 = vpop.xlane.xlu0 %926 }
 0x6d6   :  { %v933_v33 = vmul.f32 %v921_v28, %v921_v28  ;;  %v931_v35 = vmul.f32 0.03125, %v927_v30  ;;  %v937_v57 = vsub.f32 %v5055_v62, %v921_v28  ;;  %v37_v28 = vld [vmem:[%s6027_s2 + $0x10] sm:$0xff]  ;;  %v39_v30 = vld [vmem:[%s6027_s2 + $0x18] sm:$0xff] }
 0x6d7   :  { %v5084_v8 = vpop.permute.xlu1 %4222 }
 0x6d8   :  { %v935_v9 = vsub.f32 %v931_v35, %v933_v33  ;;  %v4225_v36 = vunpack.i.h.bf16 %v5084_v8  ;;  %v4224_v17 = vunpack.i.l.bf16 %v5084_v8  ;;  %v960_v33 = vld [vmem:[%s6028_s3 + $0x28] sm:$0xff]  ;;  %v964_v35 = vld [vmem:[%s6028_s3 + $0x90] sm:$0xff] }
 0x6d9   :  { %v920_v18 = vpop.xlane.xlu0 %919 }
 0x6da   :  { %v939_v37 = vadd.f32 1e-05, %v935_v9  ;;  %v922_v38 = vmul.f32 0.03125, %v920_v18  ;;  %v1031_v40 = vsel %vm829_vm3, %v4224_v17, %v4225_v36  ;;  %v968_v18 = vld [vmem:[%s6028_s3 + $0xf8] sm:$0xff] }
 0x6db   :  { %v3982_v41 = vpack.c.bf16 %v1031_v40, %v1028_v39  ;;  %v5149_v40 = vpack.i.bf16 %v964_v35, %v960_v33 }
 0x6dc   :  { %4433 = vrsqrt.f32 %v939_v37  ;;  %v934_v43 = vmul.f32 %v922_v38, %v922_v38  ;;  %v938_v6 = vsub.f32 %v5063_v47, %v922_v38  ;;  %v972_v37 = vld [vmem:[%s6028_s3 + $0x160] sm:$0xff] }
 0x6dd   :  { %v930_v42 = vpop.xlane.xlu0 %929  ;;  %3983 = vmatprep.subr.bf16.mxu0 %v3982_v41  ;;  %v5152_v41 = vpack.i.bf16 %v972_v37, %v968_v18 }
 0x6de   :  { %v932_v44 = vmul.f32 0.03125, %v930_v42 }
 0x6e0   :  { %v936_v50 = vsub.f32 %v932_v44, %v934_v43 }
 0x6e1   :  { %v4228_v51 = vpop.permute.xlu0 %4227 }
 0x6e2   :  { %v940_v53 = vadd.f32 1e-05, %v936_v50  ;;  %v4230_v52 = vunpack.i.h.bf16 %v4228_v51  ;;  %v4229_v54 = vunpack.i.l.bf16 %v4228_v51 }
 0x6e4   :  { %4435 = vrsqrt.f32 %v940_v53  ;;  %v1027_v49 = vsel %vm829_vm3, %v4229_v54, %v4219_v32  ;;  %v1030_v55 = vsel %vm829_vm3, %v4230_v52, %v4224_v17 }
 0x6e5   :  { %v3984_v58 = vpack.c.bf16 %v1030_v55, %v1027_v49 }
 0x6e6   :  { %v4434_v59 = vpop.eup %4433 }
 0x6e7   :  { %v943_v61 = vmul.f32 %v4434_v59, %v937_v57  ;;  %3985 = vmatpush1.bf16.msra.mxu0 %v3984_v58 }
 0x6e9   :  { %v949_v4 = vmul.f32 %v3559_v60, %v943_v61 }
 0x6eb   :  { %v5103_v5 = vadd.f32 %v3560_v63, %v949_v4 }
 0x6ed   :  { %3561 = vmatmul.mubr.msk.f32.vlgmr.msra.gmra.mrb[16].mxu0 %vm72_vm0, %v5103_v5 }
 0x6ee   :  { %v4436_v7 = vpop.eup %4435  ;;  %1125 = vmatprep.mubr.f32.mxu0 %v4626_v12 }
 0x6ef   :  { %v944_v10 = vmul.f32 %v4436_v7, %v938_v6 }
 0x6f1   :  { %v950_v1 = vmul.f32 %v3559_v60, %v944_v10 }
 0x6f3   :  { %v5109_v11 = vadd.f32 %v3560_v63, %v950_v1 }
 0x6f5   :  { %3562 = vmatmul.mubr.msk.f32.gmra.mrb[18].mxu0 %vm72_vm0, %v5109_v11 }
 0x6f6   :  { %1196 = vmatprep.mubr.f32.mxu0 %v4626_v12 }
 0x7c0   :  { %v1121_v0 = vpop.f32.mrb[16].mxu0 }
 0x7c1   :  { %v1209_v22 = vmul.f32 %v1121_v0, %v36_v14  ;;  %v5120_v21 = vpop.f32.mrb[17].mxu0 }
 0x7c2   :  { %v1211_v27 = vmul.f32 %v5120_v21, %v38_v19 }
 0x7c3   :  { %1217 = vrot.lane.b32.xlu1 %v1209_v22, %s4632_s11 }
 0x7c4   :  { %1219 = vrot.lane.b32.xlu0 %v1211_v27, %s4632_s11 }
 0x7c8   :  { %v1127_v32 = vpop.f32.mrb[18].mxu0 }
 0x7c9   :  { %v1210_v9 = vmul.f32 %v1127_v32, %v37_v28  ;;  %v5137_v17 = vpop.f32.mrb[19].mxu0 }
 0x7ca   :  { %v4246_v38 = vpack.i.bf16 %v5137_v17, %v5120_v21  ;;  %v1212_v39 = vmul.f32 %v5137_v17, %v39_v30 }
 0x7cb   :  { %1221 = vrot.lane.b32.xlu1 %v1210_v9, %s4632_s11 }
 0x7cc   :  { %1223 = vrot.lane.b32.xlu0 %v1212_v39, %s4632_s11 }
 0x7cf   :  { %4232 = vrot.lane.b32.xlu1 %v5149_v40, %s4633_s17 }
 0x7d0   :  { %4237 = vrot.lane.b32.xlu0 %v5152_v41, %s4633_s17 }
 0x835   :  { %v1218_v42 = vpop.permute.xlu1 %1217 }
 0x836   :  { %v1220_v43 = vpop.permute.xlu0 %1219 }
 0x837   :  { %v1225_v44 = vsel %vm770_vm4, %v1218_v42, %v1220_v43 }
 0x838   :  { %v1229_v50 = vadd.f32 %v1225_v44, %v1209_v22 }
 0x83a   :  { %1233 = vrot.lane.b32.xlu0 %v1229_v50, %s4627_s26 }
 0x83d   :  { %v1222_v51 = vpop.permute.xlu1 %1221 }
 0x83e   :  { %1237 = vrot.lane.b32.xlu0 %v1229_v50, %s4628_s27  ;;  %v1224_v53 = vpop.permute.xlu0 %1223 }
 0x83f   :  { %v1226_v52 = vsel %vm770_vm4, %v1222_v51, %v1224_v53 }
 0x840   :  { %v1230_v54 = vadd.f32 %v1226_v52, %v1210_v9 }
 0x841   :  { %v4233_v49 = vpop.permute.xlu1 %4232 }
 0x842   :  { %v4235_v55 = vunpack.i.h.bf16 %v4233_v49  ;;  %v4234_v57 = vunpack.i.l.bf16 %v4233_v49  ;;  %1241 = vrot.lane.b32.xlu0 %v1229_v50, %s4629_s28  ;;  %v4238_v58 = vpop.permute.xlu0 %4237  ;;  %v4241_v59 = vpack.i.bf16 %v1230_v54, %v1229_v50 }
 0x843   :  { %v4240_v60 = vunpack.i.h.bf16 %v4238_v58  ;;  %v4239_v61 = vunpack.i.l.bf16 %v4238_v58 }
 0x844   :  { %v1026_v63 = vsel %vm829_vm3, %v4210_v56, %v4235_v55  ;;  %v1023_v4 = vsel %vm829_vm3, %v4205_v48, %v4234_v57  ;;  %4242 = vrot.lane.b32.xlu1 %v4241_v59, %s4633_s17  ;;  %v3986_v6 = vpack.c.bf16 %v4235_v55, %v4234_v57 }
 0x845   :  { %v3988_v7 = vpack.c.bf16 %v1026_v63, %v1023_v4  ;;  %v3990_v10 = vpack.c.bf16 %v4240_v60, %v4239_v61  ;;  %v1032_v1 = vsel %vm829_vm3, %v4225_v36, %v4240_v60  ;;  %v1029_v14 = vsel %vm829_vm3, %v4220_v31, %v4239_v61 }
 0x846   :  { %3987 = vmatprep.subr.bf16.mxu0 %v3986_v6  ;;  %1257 = vrot.lane.b32.xlu0 %v4840_v3, %s4627_s26  ;;  %v3992_v45 = vpack.c.bf16 %v1032_v1, %v1029_v14 }
 0x847   :  { %3989 = vmatpush1.bf16.msra.mxu0 %v3988_v7 }
 0x848   :  { %1235 = vrot.lane.b32.xlu1 %v1230_v54, %s4627_s26  ;;  %3991 = vmatprep.subr.bf16.mxu0 %v3990_v10 }
 0x84a   :  { %1261 = vrot.lane.b32.xlu0 %v4854_v15, %s4627_s26 }
 0x84b   :  { %3993 = vmatpush1.bf16.msra.mxu0 %v3992_v45 }
 0x84c   :  { %1239 = vrot.lane.b32.xlu1 %v1230_v54, %s4628_s27 }
 0x84e   :  { %3563 = vmatmul.mubr.msk.f32.vlgmr.msra.gmra.mrb[20].mxu0 %vm72_vm0, %v5103_v5  ;;  %1265 = vrot.lane.b32.xlu0 %v4867_v24, %s4627_s26 }
 0x84f   :  { %1202 = vmatprep.mubr.f32.mxu0 %v4626_v12 }
 0x850   :  { %1243 = vrot.lane.b32.xlu1 %v1230_v54, %s4629_s28 }
 0x852   :  { %3564 = vmatmul.mubr.msk.f32.gmra.mrb[22].mxu0 %vm72_vm0, %v5109_v11  ;;  %1269 = vrot.lane.b32.xlu0 %v4881_v34, %s4627_s26 }
 0x853   :  { %3805 = vmatprep.mubr.msk.f32.mxu0 %vm391_vm1, %v1229_v50 }
 0x854   :  { %1259 = vrot.lane.b32.xlu1 %v4835_v2, %s4627_s26 }
 0x858   :  { %1263 = vrot.lane.b32.xlu1 %v4849_v13, %s4627_s26 }
 0x85c   :  { %1267 = vrot.lane.b32.xlu1 %v4860_v20, %s4627_s26 }
 0x860   :  { %1271 = vrot.lane.b32.xlu1 %v4873_v29, %s4627_s26 }
 0x8ac   :  { %v1234_v2 = vpop.permute.xlu0 %1233 }
 0x8b0   :  { %v1238_v13 = vpop.permute.xlu0 %1237 }
 0x8b4   :  { %v1242_v29 = vpop.permute.xlu0 %1241 }
 0x8b6   :  { %v4243_v3 = vpop.permute.xlu1 %4242 }
 0x8b7   :  { %v4245_v15 = vunpack.i.h.bf16 %v4243_v3  ;;  %v4244_v24 = vunpack.i.l.bf16 %v4243_v3 }
 0x8b8   :  { %v5224_v55 = vpop.permute.xlu0 %1257 }
 0x8b9   :  { %v3994_v46 = vpack.c.bf16 %v4245_v15, %v4244_v24 }
 0x8ba   :  { %v1236_v34 = vpop.permute.xlu1 %1235 }
 0x8bb   :  { %3996 = vmatprep.subr.msk.bf16.mxu0 %vm4801_vm2, %v3994_v46 }
 0x8bc   :  { %3999 = vmatpush3.bf16.xpose.msk.msra.mxu0 %vm4801_vm2, %v3994_v46  ;;  %v5229_v61 = vpop.permute.xlu0 %1261 }
 0x8be   :  { %v1240_v20 = vpop.permute.xlu1 %1239 }
 0x8c0   :  { %v5237_v45 = vpop.permute.xlu0 %1265 }
 0x8c2   :  { %v1244_v48 = vpop.permute.xlu1 %1243 }
 0x8c3   :  { %3806 = vmatmul.mubr.msk.f32.vlgmr.msra.gmra.mrb[24].mxu0 %vm391_vm1, %v1230_v54 }
 0x8c4   :  { %3808 = vmatprep.mubr.msk.f32.mxu0 %vm391_vm1, %v1234_v2 }
 0x8c6   :  { %v5222_v49 = vpop.permute.xlu1 %1259 }
 0x8c7   :  { %3809 = vmatmul.mubr.msk.f32.gmra.mrb[26].mxu0 %vm391_vm1, %v1236_v34 }
 0x8c8   :  { %3811 = vmatprep.mubr.msk.f32.mxu0 %vm391_vm1, %v1238_v13 }
 0x8ca   :  { %v5226_v57 = vpop.permute.xlu1 %1263 }
 0x8cb   :  { %3812 = vmatmul.mubr.msk.f32.gmra.mrb[28].mxu0 %vm391_vm1, %v1240_v20 }
 0x8cc   :  { %3814 = vmatprep.mubr.msk.f32.mxu0 %vm391_vm1, %v1242_v29 }
 0x8ce   :  { %v5234_v10 = vpop.permute.xlu1 %1267 }
 0x8cf   :  { %3815 = vmatmul.mubr.msk.f32.gmra.mrb[30].mxu0 %vm391_vm1, %v1244_v48 }
 0x8d2   :  { %v5242_v34 = vpop.permute.xlu1 %1271 }
 0x921   :  { %v1198_v56 = vpop.f32.mrb[20].mxu0 }
 0x922   :  { %v3583_v23 = vmul.f32 -1.442695, %v1198_v56  ;;  %v1200_v31 = vpop.f32.mrb[21].mxu0 }
 0x923   :  { %v3584_v8 = vmul.f32 -1.442695, %v1200_v31 }
 0x924   :  { %4437 = vpow2.f32 %v3583_v23  ;;  %v5248_v23 = vpop.permute.xlu0 %1269 }
 0x925   :  { %4439 = vpow2.f32 %v3584_v8  ;;  %v1204_v36 = vpop.f32.mrb[22].mxu0 }
 0x926   :  { %v3585_v5 = vmul.f32 -1.442695, %v1204_v36  ;;  %v1206_v11 = vpop.f32.mrb[23].mxu0 }
 0x927   :  { %v3586_v19 = vmul.f32 -1.442695, %v1206_v11 }
 0x928   :  { %4441 = vpow2.f32 %v3585_v5 }
 0x929   :  { %4443 = vpow2.f32 %v3586_v19 }
 0x92e   :  { %v4438_v0 = vpop.eup %4437 }
 0x92f   :  { %v4440_v22 = vpop.eup %4439  ;;  %v1673_v27 = vadd.f32 1.0, %v4438_v0 }
 0x930   :  { %v1674_v28 = vadd.f32 1.0, %v4440_v22 }
 0x931   :  { %4445 = vrcp.f32 %v1673_v27 }
 0x932   :  { %v4442_v30 = vpop.eup %4441  ;;  %4447 = vrcp.f32 %v1674_v28 }
 0x933   :  { %v4444_v32 = vpop.eup %4443  ;;  %v1675_v33 = vadd.f32 1.0, %v4442_v30 }
 0x934   :  { %v1676_v35 = vadd.f32 1.0, %v4444_v32 }
 0x935   :  { %4449 = vrcp.f32 %v1675_v33 }
 0x936   :  { %4451 = vrcp.f32 %v1676_v35 }
 0x93b   :  { %v4446_v9 = vpop.eup %4445 }
 0x93c   :  { %v4448_v18 = vpop.eup %4447  ;;  %v1685_v37 = vmul.f32 %v4446_v9, %v1198_v56 }
 0x93d   :  { %v1686_v39 = vmul.f32 %v4448_v18, %v1200_v31 }
 0x93e   :  { %v5213_v42 = vmul.f32 %v1685_v37, %v5120_v21 }
 0x93f   :  { %v4450_v43 = vpop.eup %4449  ;;  %v5215_v44 = vmul.f32 %v1686_v39, %v1198_v56 }
 0x940   :  { %v4452_v50 = vpop.eup %4451  ;;  %v1687_v51 = vmul.f32 %v4450_v43, %v1204_v36 }
 0x941   :  { %v1688_v53 = vmul.f32 %v4452_v50, %v1206_v11 }
 0x942   :  { %v5218_v52 = vmul.f32 %v1687_v51, %v5137_v17 }
 0x943   :  { %v5220_v54 = vmul.f32 %v1688_v53, %v1204_v36 }
 0x996   :  { %v3807_v58 = vpop.f32.mrb[24].mxu0 }
 0x997   :  { %v1373_v59 = vadd.f32 %v3807_v58, %v5222_v49  ;;  %v1367_v60 = vpop.f32.mrb[25].mxu0 }
 0x998   :  { %v1368_v63 = vadd.f32 %v1367_v60, %v5224_v55 }
 0x999   :  { %v1409_v4 = vsel %vm391_vm1, %v1373_v59, -inf }
 0x99a   :  { %1410 = vmax.xlane.f32.xlu1 %v1409_v4  ;;  %v3810_v6 = vpop.f32.mrb[26].mxu0  ;;  %v1406_v7 = vsel %vm391_vm1, %v1368_v63, -inf }
 0x99b   :  { %v1383_v1 = vadd.f32 %v3810_v6, %v5226_v57  ;;  %v1377_v14 = vpop.f32.mrb[27].mxu0  ;;  %1407 = vmax.xlane.f32.xlu0 %v1406_v7 }
 0x99c   :  { %v1378_v15 = vadd.f32 %v1377_v14, %v5229_v61 }
 0x99d   :  { %v1415_v3 = vsel %vm391_vm1, %v1383_v1, -inf }
 0x99e   :  { %v3813_v24 = vpop.f32.mrb[28].mxu0  ;;  %v1412_v48 = vsel %vm391_vm1, %v1378_v15, -inf }
 0x99f   :  { %v1393_v46 = vadd.f32 %v3813_v24, %v5234_v10  ;;  %v1387_v2 = vpop.f32.mrb[29].mxu0  ;;  %1416 = vmax.xlane.f32.xlu0 %v1415_v3 }
 0x9a0   :  { %v1388_v20 = vadd.f32 %v1387_v2, %v5237_v45 }
 0x9a1   :  { %v1421_v13 = vsel %vm391_vm1, %v1393_v46, -inf }
 0x9a2   :  { %1422 = vmax.xlane.f32.xlu1 %v1421_v13  ;;  %v3816_v29 = vpop.f32.mrb[30].mxu0  ;;  %v1418_v5 = vsel %vm391_vm1, %v1388_v20, -inf }
 0x9a3   :  { %v1403_v56 = vadd.f32 %v3816_v29, %v5242_v34  ;;  %v1397_v31 = vpop.f32.mrb[31].mxu0  ;;  %1413 = vmax.xlane.f32.xlu0 %v1412_v48 }
 0x9a4   :  { %v1398_v36 = vadd.f32 %v1397_v31, %v5248_v23 }
 0x9a5   :  { %v1427_v8 = vsel %vm391_vm1, %v1403_v56, -inf }
 0x9a6   :  { %1428 = vmax.xlane.f32.xlu1 %v1427_v8  ;;  %v1424_v11 = vsel %vm391_vm1, %v1398_v36, -inf }
 0x9a7   :  { %1419 = vmax.xlane.f32.xlu0 %v1418_v5 }
 0x9ab   :  { %1425 = vmax.xlane.f32.xlu0 %v1424_v11 }
 0xa27   :  { %v1411_v19 = vpop.xlane.xlu1 %1410 }
 0xa28   :  { %v1431_v0 = vsub.f32 %v1373_v59, %v1411_v19  ;;  %v1408_v22 = vpop.xlane.xlu0 %1407 }
 0xa29   :  { %v1430_v27 = vsub.f32 %v1368_v63, %v1408_v22 }
 0xa2a   :  { %v1440_v28 = vmul.f32 1.442695, %v1431_v0 }
 0xa2b   :  { %v1438_v30 = vmul.f32 1.442695, %v1430_v27 }
 0xa2c   :  { %4453 = vpow2.f32 %v1440_v28  ;;  %v1417_v32 = vpop.xlane.xlu0 %1416 }
 0xa2d   :  { %4455 = vpow2.f32 %v1438_v30  ;;  %v1433_v33 = vsub.f32 %v1383_v1, %v1417_v32 }
 0xa2f   :  { %v1444_v35 = vmul.f32 1.442695, %v1433_v33  ;;  %v1423_v9 = vpop.xlane.xlu1 %1422 }
 0xa30   :  { %v1435_v18 = vsub.f32 %v1393_v46, %v1423_v9  ;;  %v1414_v37 = vpop.xlane.xlu0 %1413 }
 0xa31   :  { %4457 = vpow2.f32 %v1444_v35  ;;  %v1432_v39 = vsub.f32 %v1378_v15, %v1414_v37 }
 0xa32   :  { %v1448_v43 = vmul.f32 1.442695, %v1435_v18 }
 0xa33   :  { %v1442_v50 = vmul.f32 1.442695, %v1432_v39  ;;  %v1429_v51 = vpop.xlane.xlu1 %1428 }
 0xa34   :  { %4459 = vpow2.f32 %v1448_v43  ;;  %v1437_v53 = vsub.f32 %v1403_v56, %v1429_v51  ;;  %v1420_v58 = vpop.xlane.xlu0 %1419 }
 0xa35   :  { %4461 = vpow2.f32 %v1442_v50  ;;  %v1434_v59 = vsub.f32 %v1388_v20, %v1420_v58 }
 0xa36   :  { %v5254_v60 = vpop.eup %4453  ;;  %v1452_v63 = vmul.f32 1.442695, %v1437_v53 }
 0xa37   :  { %v4456_v4 = vpop.eup %4455  ;;  %v1446_v6 = vmul.f32 1.442695, %v1434_v59  ;;  %v1457_v7 = vsel %vm391_vm1, %v5254_v60, 0.0 }
 0xa38   :  { %4463 = vpow2.f32 %v1452_v63  ;;  %1458 = vadd.xlane.f32.xlu1 %v1457_v7  ;;  %v1426_v1 = vpop.xlane.xlu0 %1425  ;;  %v1454_v14 = vsel %vm391_vm1, %v4456_v4, 0.0 }
 0xa39   :  { %4465 = vpow2.f32 %v1446_v6  ;;  %v1436_v3 = vsub.f32 %v1398_v36, %v1426_v1  ;;  %1455 = vadd.xlane.f32.xlu0 %v1454_v14  ;;  %v1693_v1 = vld [vmem:[%s6029_s4 + $0xc0] sm:$0xff]  ;;  %v1694_v14 = vld [vmem:[%s6029_s4 + $0xc8] sm:$0xff] }
 0xa3b   :  { %v4458_v15 = vpop.eup %4457  ;;  %v1450_v24 = vmul.f32 1.442695, %v1436_v3  ;;  %v1695_v3 = vld [vmem:[%s6029_s4 + $0xd0] sm:$0xff] }
 0xa3c   :  { %v1463_v46 = vsel %vm391_vm1, %v4458_v15, 0.0 }
 0xa3d   :  { %4467 = vpow2.f32 %v1450_v24  ;;  %1464 = vadd.xlane.f32.xlu1 %v1463_v46  ;;  %v1696_v24 = vld [vmem:[%s6029_s4 + $0xd8] sm:$0xff] }
 0xa3e   :  { %v4460_v2 = vpop.eup %4459  ;;  %v4008_v46 = vpack.c.bf16 %v1696_v24, %v1695_v3  ;;  %v1863_v24 = vld [vmem:[%s6028_s3 + $0x98] sm:$0xff] }
 0xa3f   :  { %v4462_v13 = vpop.eup %4461  ;;  %v1469_v20 = vsel %vm391_vm1, %v4460_v2, 0.0 }
 0xa40   :  { %v1460_v29 = vsel %vm391_vm1, %v4462_v13, 0.0 }
 0xa41   :  { %1470 = vadd.xlane.f32.xlu1 %v1469_v20  ;;  %1461 = vadd.xlane.f32.xlu0 %v1460_v29  ;;  %v1699_v29 = vld [vmem:[%s6029_s4 + $0xf0] sm:$0xff] }
 0xa42   :  { %v4464_v48 = vpop.eup %4463 }
 0xa43   :  { %v4466_v56 = vpop.eup %4465  ;;  %v1475_v31 = vsel %vm391_vm1, %v4464_v48, 0.0 }
 0xa44   :  { %v1466_v8 = vsel %vm391_vm1, %v4466_v56, 0.0 }
 0xa45   :  { %1476 = vadd.xlane.f32.xlu1 %v1475_v31  ;;  %1467 = vadd.xlane.f32.xlu0 %v1466_v8  ;;  %v1701_v31 = vld [vmem:[%s6029_s4 + $0x100] sm:$0xff]  ;;  %v1702_v8 = vld [vmem:[%s6029_s4 + $0x108] sm:$0xff] }
 0xa47   :  { %v4468_v36 = vpop.eup %4467 }
 0xa48   :  { %v1472_v5 = vsel %vm391_vm1, %v4468_v36, 0.0 }
 0xa49   :  { %1473 = vadd.xlane.f32.xlu0 %v1472_v5  ;;  %v1703_v5 = vld [vmem:[%s6029_s4 + $0x110] sm:$0xff] }
 0xa56   :  { %1723 = vrot.lane.b32.xlu1 %v5215_v44, %s4631_s30 }
 0xa5f   :  { %4247 = vrot.lane.b32.xlu0 %v4246_v38, %s4628_s27 }
 0xa63   :  { %1721 = vrot.lane.b32.xlu0 %v5213_v42, %s4631_s30 }
 0xa67   :  { %1725 = vrot.lane.b32.xlu0 %v5218_v52, %s4631_s30 }
 0xac5   :  { %v1459_v11 = vpop.xlane.xlu1 %1458 }
 0xac6   :  { %v1456_v19 = vpop.xlane.xlu0 %1455 }
 0xac7   :  { %4469 = vrcp.f32 %v1456_v19 }
 0xac8   :  { %4471 = vrcp.f32 %v1459_v11  ;;  %v1704_v11 = vld [vmem:[%s6029_s4 + $0x118] sm:$0xff] }
 0xac9   :  { %v4020_v19 = vpack.c.bf16 %v1704_v11, %v1703_v5 }
 0xaca   :  { %v1465_v0 = vpop.xlane.xlu1 %1464 }
 0xace   :  { %v1462_v22 = vpop.xlane.xlu0 %1461  ;;  %v1471_v28 = vpop.xlane.xlu1 %1470 }
 0xacf   :  { %4473 = vrcp.f32 %v1462_v22  ;;  %v1706_v22 = vld [vmem:[%s6029_s4 + $0x128] sm:$0xff] }
 0xad0   :  { %4475 = vrcp.f32 %v1465_v0  ;;  %v1705_v0 = vld [vmem:[%s6029_s4 + $0x120] sm:$0xff] }
 0xad1   :  { %v4470_v27 = vpop.eup %4469 }
 0xad2   :  { %v1468_v30 = vpop.xlane.xlu0 %1467  ;;  %v1486_v44 = vmul.f32 %v4470_v27, %v4456_v4  ;;  %v1477_v17 = vpop.xlane.xlu1 %1476  ;;  %v4023_v27 = vpack.c.bf16 %v1706_v22, %v1705_v0 }
 0xad3   :  { %4477 = vrcp.f32 %v1468_v30  ;;  %v4472_v33 = vpop.eup %4471  ;;  %v1708_v30 = vld [vmem:[%s6029_s4 + $0x138] sm:$0xff] }
 0xad4   :  { %3821 = vmatprep.mubr.msk.f32.mxu0 %vm391_vm1, %v1486_v44  ;;  %4479 = vrcp.f32 %v1471_v28  ;;  %v1487_v39 = vmul.f32 %v4472_v33, %v5254_v60  ;;  %v1707_v28 = vld [vmem:[%s6029_s4 + $0x130] sm:$0xff]  ;;  %v1713_v33 = vld [vmem:[%s6029_s4 + $0x160] sm:$0xff] }
 0xad5   :  { %v4026_v44 = vpack.c.bf16 %v1708_v30, %v1707_v28 }
 0xad6   :  { %v1474_v21 = vpop.xlane.xlu0 %1473  ;;  %v1724_v35 = vpop.permute.xlu1 %1723 }
 0xad7   :  { %4481 = vrcp.f32 %v1474_v21  ;;  %v1709_v21 = vld [vmem:[%s6029_s4 + $0x140] sm:$0xff] }
 0xad8   :  { %4483 = vrcp.f32 %v1477_v17  ;;  %v1710_v17 = vld [vmem:[%s6029_s4 + $0x148] sm:$0xff] }
 0xad9   :  { %v4474_v18 = vpop.eup %4473 }
 0xada   :  { %v4248_v38 = vpop.permute.xlu0 %4247  ;;  %v4476_v43 = vpop.eup %4475  ;;  %v1488_v50 = vmul.f32 %v4474_v18, %v4462_v13  ;;  %v1698_v13 = vld [vmem:[%s6029_s4 + $0xe8] sm:$0xff] }
 0xadb   :  { %v4250_v42 = vunpack.i.h.bf16 %v4248_v38  ;;  %v4249_v52 = vunpack.i.l.bf16 %v4248_v38  ;;  %v1489_v53 = vmul.f32 %v4476_v43, %v4458_v15  ;;  %v4005_v15 = vpack.c.bf16 %v1694_v14, %v1693_v1  ;;  %v1715_v43 = vld [vmem:[%s6029_s4 + $0x170] sm:$0xff]  ;;  %v1860_v1 = vld [vmem:[%s6028_s3 + $0x38] sm:$0xff] }
 0xadc   :  { %v4029_v38 = vpack.c.bf16 %v1710_v17, %v1709_v21 }
 0xadd   :  { %v4000_v32 = vpack.c.bf16 %v4250_v42, %v4249_v52  ;;  %v4478_v51 = vpop.eup %4477  ;;  %4006 = vmatpush1.bf16.msra.mxu1 %v4005_v15  ;;  %v1711_v42 = vld [vmem:[%s6029_s4 + $0x150] sm:$0xff]  ;;  %v1712_v52 = vld [vmem:[%s6029_s4 + $0x158] sm:$0xff] }
 0xade   :  { %v5276_v9 = vpop.permute.xlu0 %1721  ;;  %v4480_v58 = vpop.eup %4479  ;;  %v1490_v59 = vmul.f32 %v4478_v51, %v4466_v56  ;;  %4007 = vmatprep.subr.bf16.mxu1 %v4630_v16 }
 0xadf   :  { %v1729_v37 = vsel %vm391_vm1, %v5276_v9, %v1724_v35  ;;  %4001 = vmatprep.subr.bf16.mxu0 %v4000_v32  ;;  %v1491_v4 = vmul.f32 %v4480_v58, %v4460_v2  ;;  %v1697_v2 = vld [vmem:[%s6029_s4 + $0xe0] sm:$0xff]  ;;  %v1714_v35 = vld [vmem:[%s6029_s4 + $0x168] sm:$0xff] }
 0xae0   :  { %4003 = vmatpush3.bf16.msra.mxu0 %v4000_v32  ;;  %3587 = vmatprep.mubr.msk.f32.mxu1 %vm829_vm3, %v1729_v37  ;;  %v4011_v20 = vpack.c.bf16 %v1698_v13, %v1697_v2  ;;  %v4032_v32 = vpack.c.bf16 %v1712_v52, %v1711_v42  ;;  %v4035_v18 = vpack.c.bf16 %v1714_v35, %v1713_v33  ;;  %v1867_v13 = vld [vmem:[%s6028_s3 + $0x100] sm:$0xff] }
 0xae1   :  { %v4482_v63 = vpop.eup %4481  ;;  %4009 = vmatpush1.bf16.msra.mxu1 %v4008_v46  ;;  %v1864_v46 = vld [vmem:[%s6028_s3 + $0xa0] sm:$0xff] }
 0xae2   :  { %v4484_v6 = vpop.eup %4483  ;;  %v1492_v7 = vmul.f32 %v4482_v63, %v4468_v36  ;;  %4010 = vmatprep.subr.bf16.mxu1 %v4630_v16  ;;  %v4017_v36 = vpack.c.bf16 %v1702_v8, %v1701_v31  ;;  %v4271_v2 = vpack.i.bf16 %v1864_v46, %v1863_v24  ;;  %v1726_v28 = vpop.permute.xlu0 %1725 }
 0xae3   :  { %3822 = vmatmul.mubr.msk.f32.vlgmr.msra.gmra.mrb[32].mxu0 %vm391_vm1, %v1487_v39  ;;  %v1493_v60 = vmul.f32 %v4484_v6, %v4464_v48  ;;  %v1700_v48 = vld [vmem:[%s6029_s4 + $0xf8] sm:$0xff] }
 0xae4   :  { %3824 = vmatprep.mubr.msk.f32.mxu0 %vm391_vm1, %v1488_v50  ;;  %v4014_v56 = vpack.c.bf16 %v1700_v48, %v1699_v29  ;;  %v1716_v50 = vld [vmem:[%s6029_s4 + $0x178] sm:$0xff] }
 0xae5   :  { %4012 = vmatpush1.bf16.msra.mxu1 %v4011_v20  ;;  %v4038_v51 = vpack.c.bf16 %v1716_v50, %v1715_v43  ;;  %v1868_v20 = vld [vmem:[%s6028_s3 + $0x108] sm:$0xff] }
 0xae6   :  { %4013 = vmatprep.subr.bf16.mxu1 %v4630_v16  ;;  %v4281_v29 = vpack.i.bf16 %v1868_v20, %v1867_v13  ;;  %v1869_v13 = vld [vmem:[%s6028_s3 + $0x110] sm:$0xff] }
 0xae7   :  { %3825 = vmatmul.mubr.msk.f32.gmra.mrb[34].mxu0 %vm391_vm1, %v1489_v53 }
 0xae8   :  { %3827 = vmatprep.mubr.msk.f32.mxu0 %vm391_vm1, %v1490_v59 }
 0xae9   :  { %4015 = vmatpush1.bf16.msra.mxu1 %v4014_v56 }
 0xaea   :  { %4016 = vmatprep.subr.bf16.mxu1 %v4630_v16 }
 0xaeb   :  { %3828 = vmatmul.mubr.msk.f32.gmra.mrb[36].mxu0 %vm391_vm1, %v1491_v4 }
 0xaec   :  { %3830 = vmatprep.mubr.msk.f32.mxu0 %vm391_vm1, %v1492_v7  ;;  %v1859_v7 = vld [vmem:[%s6028_s3 + $0x30] sm:$0xff] }
 0xaed   :  { %4018 = vmatpush1.bf16.msra.mxu1 %v4017_v36  ;;  %v4266_v3 = vpack.i.bf16 %v1860_v1, %v1859_v7 }
 0xaee   :  { %4019 = vmatprep.subr.bf16.mxu1 %v4630_v16 }
 0xaef   :  { %3831 = vmatmul.mubr.msk.f32.gmra.mrb[38].mxu0 %vm391_vm1, %v1493_v60  ;;  %4267 = vrot.lane.b32.xlu0 %v4266_v3, %s4631_s30 }
 0xaf0   :  { %2016 = vmatprep.mubr.f32.mxu0 %v4626_v12 }
 0xaf1   :  { %4021 = vmatpush1.bf16.msra.mxu1 %v4020_v19 }
 0xaf2   :  { %4022 = vmatprep.subr.bf16.mxu1 %v4630_v16 }
 0xaf5   :  { %4024 = vmatpush1.bf16.msra.mxu1 %v4023_v27 }
 0xaf6   :  { %4025 = vmatprep.subr.bf16.mxu1 %v4630_v16 }
 0xaf9   :  { %4027 = vmatpush1.bf16.msra.mxu1 %v4026_v44 }
 0xafa   :  { %4028 = vmatprep.subr.bf16.mxu1 %v4630_v16 }
 0xafd   :  { %4030 = vmatpush1.bf16.msra.mxu1 %v4029_v38 }
 0xafe   :  { %4031 = vmatprep.subr.bf16.mxu1 %v4630_v16 }
 0xb01   :  { %4033 = vmatpush1.bf16.msra.mxu1 %v4032_v32 }
 0xb02   :  { %4034 = vmatprep.subr.bf16.mxu1 %v4630_v16 }
 0xb05   :  { %4036 = vmatpush1.bf16.msra.mxu1 %v4035_v18 }
 0xb06   :  { %4037 = vmatprep.subr.bf16.mxu1 %v4630_v16 }
 0xb09   :  { %4039 = vmatpush1.bf16.msra.mxu1 %v4038_v51 }
 0xb0a   :  { %4066 = vmatprep.subr.bf16.mxu1 %v4630_v16 }
 0xb61   :  { %v5415_v32 = vpop.permute.xlu0 %4267 }
 0xb62   :  { %v4270_v35 = vunpack.i.h.bf16 %v5415_v32  ;;  %v4269_v18 = vunpack.i.l.bf16 %v5415_v32 }
 0xbb6   :  { %v3823_v37 = vpop.f32.mrb[32].mxu0 }
 0xbb7   :  { %v1592_v39 = vpop.f32.mrb[33].mxu0 }
 0xbba   :  { %v3826_v53 = vpop.f32.mrb[34].mxu0 }
 0xbbb   :  { %v1602_v58 = vpop.f32.mrb[35].mxu0 }
 0xbbc   :  { %v4251_v59 = vpack.i.bf16 %v3826_v53, %v1602_v58 }
 0xbbe   :  { %4252 = vrot.lane.b32.xlu1 %v4251_v59, %s4631_s30  ;;  %v3829_v63 = vpop.f32.mrb[36].mxu0 }
 0xbbf   :  { %v1612_v4 = vpop.f32.mrb[37].mxu0 }
 0xbc0   :  { %v4256_v6 = vpack.i.bf16 %v3829_v63, %v1612_v4 }
 0xbc2   :  { %4257 = vrot.lane.b32.xlu1 %v4256_v6, %s4625_s13  ;;  %v3832_v60 = vpop.f32.mrb[38].mxu0 }
 0xbc3   :  { %v1622_v14 = vpop.f32.mrb[39].mxu0 }
 0xbc4   :  { %v4261_v15 = vpack.i.bf16 %v3832_v60, %v1622_v14 }
 0xbc6   :  { %4262 = vrot.lane.b32.xlu1 %v4261_v15, %s4632_s11 }
 0xbca   :  { %1727 = vrot.lane.b32.xlu1 %v5220_v54, %s4631_s30 }
 0xbce   :  { %4272 = vrot.lane.b32.xlu1 %v4271_v2, %s4631_s30 }
 0xbd2   :  { %4277 = vrot.lane.b32.xlu1 %v5149_v40, %s4631_s30 }
 0xbd6   :  { %4282 = vrot.lane.b32.xlu1 %v4281_v29, %s4631_s30  ;;  %v1871_v29 = vld [vmem:[%s6028_s3 + $0x168] sm:$0xff] }
 0xc30   :  { %v4253_v48 = vpop.permute.xlu1 %4252 }
 0xc31   :  { %v4254_v54 = vunpack.i.l.bf16 %v4253_v48  ;;  %v4255_v8 = vunpack.i.h.bf16 %v4253_v48  ;;  %v1872_v48 = vld [vmem:[%s6028_s3 + $0x170] sm:$0xff] }
 0xc33   :  { %v1655_v11 = vsel %vm391_vm1, %v1592_v39, %v4254_v54  ;;  %v1656_v27 = vsel %vm391_vm1, %v3823_v37, %v4255_v8  ;;  %v1923_v37 = vsel %vm391_vm1, %v4269_v18, %v4270_v35  ;;  %v1861_v54 = vld [vmem:[%s6028_s3 + $0x40] sm:$0xff] }
 0xc34   :  { %v4258_v56 = vpop.permute.xlu1 %4257 }
 0xc35   :  { %v4259_v31 = vunpack.i.l.bf16 %v4258_v56  ;;  %v4260_v36 = vunpack.i.h.bf16 %v4258_v56  ;;  %v4286_v56 = vpack.i.bf16 %v1872_v48, %v1871_v29 }
 0xc37   :  { %v1657_v22 = vsel %vm72_vm0, %v1655_v11, %v4259_v31  ;;  %v1658_v21 = vsel %vm72_vm0, %v1656_v27, %v4260_v36 }
 0xc38   :  { %v4263_v5 = vpop.permute.xlu1 %4262 }
 0xc39   :  { %v4265_v19 = vunpack.i.h.bf16 %v4263_v5  ;;  %v4264_v0 = vunpack.i.l.bf16 %v4263_v5 }
 0xc3b   :  { %v1659_v40 = vsel %vm770_vm4, %v1657_v22, %v4264_v0  ;;  %v1660_v38 = vsel %vm770_vm4, %v1658_v21, %v4265_v19 }
 0xc3c   :  { %v1728_v30 = vpop.permute.xlu1 %1727  ;;  %v1733_v44 = vsel %vm829_vm3, %v1659_v40, %v5276_v9  ;;  %v1734_v42 = vsel %vm829_vm3, %v1660_v38, %v1726_v28 }
 0xc3d   :  { %v1730_v17 = vsel %vm391_vm1, %v1726_v28, %v1728_v30  ;;  %1804 = vmatmul.mubr.f32.vlgmr.msra.gmra.mrb[12].mxu1 %v1733_v44 }
 0xc3e   :  { %3588 = vmatprep.mubr.msk.f32.mxu1 %vm829_vm3, %v1730_v17 }
 0xc40   :  { %v5413_v52 = vpop.permute.xlu1 %4272 }
 0xc41   :  { %1809 = vmatmul.mubr.f32.gmra.mrb[14].mxu1 %v1734_v42  ;;  %v4275_v33 = vunpack.i.h.bf16 %v5413_v52  ;;  %v4274_v9 = vunpack.i.l.bf16 %v5413_v52 }
 0xc43   :  { %v1926_v39 = vsel %vm391_vm1, %v4274_v9, %v4275_v33 }
 0xc44   :  { %v4278_v43 = vpop.permute.xlu1 %4277  ;;  %v4040_v50 = vpack.c.bf16 %v1926_v39, %v1923_v37 }
 0xc45   :  { %v4280_v51 = vunpack.i.h.bf16 %v4278_v43  ;;  %v4279_v53 = vunpack.i.l.bf16 %v4278_v43 }
 0xc46   :  { %4041 = vmatprep.subr.bf16.mxu0 %v4040_v50 }
 0xc47   :  { %v1922_v58 = vsel %vm391_vm1, %v4279_v53, %v4269_v18  ;;  %v1925_v59 = vsel %vm391_vm1, %v4280_v51, %v4274_v9 }
 0xc48   :  { %v4042_v63 = vpack.c.bf16 %v1925_v59, %v1922_v58  ;;  %v4283_v8 = vpop.permute.xlu1 %4282 }
 0xc49   :  { %v4285_v38 = vunpack.i.h.bf16 %v4283_v8  ;;  %v4284_v42 = vunpack.i.l.bf16 %v4283_v8 }
 0xc4a   :  { %4043 = vmatpush1.bf16.msra.mxu0 %v4042_v63 }
 0xc4b   :  { %v1929_v53 = vsel %vm391_vm1, %v4284_v42, %v4285_v38 }
 0xd10   :  { %v1805_v4 = vpop.f32.mrb[12].mxu1 }
 0xd11   :  { %v5430_v6 = vadd.f32 %v1805_v4, %v5055_v62  ;;  %v1807_v7 = vpop.f32.mrb[13].mxu1 }
 0xd13   :  { %v1816_v60 = vsel %vm72_vm0, %v5430_v6, 0.0  ;;  %v1824_v1 = vmul.f32 %v5430_v6, %v5430_v6 }
 0xd14   :  { %v1810_v14 = vpop.f32.mrb[14].mxu1  ;;  %1817 = vadd.xlane.f32.xlu0 %v1816_v60 }
 0xd15   :  { %v5437_v3 = vadd.f32 %v1810_v14, %v5063_v47  ;;  %v1812_v15 = vpop.f32.mrb[15].mxu1  ;;  %v1826_v24 = vsel %vm72_vm0, %v1824_v1, 0.0  ;;  %v1873_v47 = vld [vmem:[%s6028_s3 + $0x178] sm:$0xff] }
 0xd16   :  { %1827 = vadd.xlane.f32.xlu1 %v1826_v24  ;;  %v5453_v20 = vpack.i.bf16 %v1873_v47, %v1869_v13 }
 0xd17   :  { %v1819_v62 = vsel %vm72_vm0, %v5437_v3, 0.0  ;;  %v1825_v46 = vmul.f32 %v5437_v3, %v5437_v3 }
 0xd18   :  { %1820 = vadd.xlane.f32.xlu0 %v1819_v62 }
 0xd19   :  { %v1829_v2 = vsel %vm72_vm0, %v1825_v46, 0.0  ;;  %v3589_v46 = vld [vmem:[%s6030_s5 + $0x4] ss:$0 sm:$0xff] }
 0xd1c   :  { %1830 = vadd.xlane.f32.xlu0 %v1829_v2 }
 0xd27   :  { %4292 = vrot.lane.b32.xlu1 %v5152_v41, %s4631_s30  ;;  %v1865_v41 = vld [vmem:[%s6028_s3 + $0xa8] sm:$0xff] }
 0xd28   :  { %v5470_v31 = vpack.i.bf16 %v1865_v41, %v1861_v54  ;;  %v3590_v54 = vld [vmem:[%s6030_s5 + $0x5] ss:$0 sm:$0xff] }
 0xd2b   :  { %4302 = vrot.lane.b32.xlu1 %v5453_v20, %s4631_s30 }
 0xd32   :  { %4287 = vrot.lane.b32.xlu0 %v4286_v56, %s4631_s30 }
 0xd36   :  { %4297 = vrot.lane.b32.xlu0 %v5470_v31, %s4631_s30 }
 0xd3a   :  { %4307 = vrot.lane.b32.xlu0 %v4805_v26, %s4628_s27 }
 0xda1   :  { %v1818_v36 = vpop.xlane.xlu0 %1817 }
 0xda2   :  { %v1822_v5 = vmul.f32 0.03125, %v1818_v36 }
 0xda3   :  { %v1828_v11 = vpop.xlane.xlu1 %1827 }
 0xda4   :  { %v1834_v19 = vmul.f32 %v1822_v5, %v1822_v5  ;;  %v1832_v0 = vmul.f32 0.03125, %v1828_v11  ;;  %v1838_v15 = vsub.f32 %v5430_v6, %v1822_v5 }
 0xda5   :  { %v1821_v22 = vpop.xlane.xlu0 %1820 }
 0xda6   :  { %v1836_v27 = vsub.f32 %v1832_v0, %v1834_v19  ;;  %v1823_v40 = vmul.f32 0.03125, %v1821_v22 }
 0xda7   :  { %v4293_v30 = vpop.permute.xlu1 %4292 }
 0xda8   :  { %v1840_v28 = vadd.f32 1e-05, %v1836_v27  ;;  %v1835_v21 = vmul.f32 %v1823_v40, %v1823_v40  ;;  %v4295_v9 = vunpack.i.h.bf16 %v4293_v30  ;;  %v4294_v18 = vunpack.i.l.bf16 %v4293_v30 }
 0xda9   :  { %v1831_v44 = vpop.xlane.xlu0 %1830  ;;  %v1839_v32 = vsub.f32 %v5437_v3, %v1823_v40 }
 0xdaa   :  { %4485 = vrsqrt.f32 %v1840_v28  ;;  %v1833_v17 = vmul.f32 0.03125, %v1831_v44  ;;  %v1928_v58 = vsel %vm391_vm1, %v4294_v18, %v4284_v42 }
 0xdab   :  { %v4303_v24 = vpop.permute.xlu1 %4302 }
 0xdac   :  { %v1837_v37 = vsub.f32 %v1833_v17, %v1835_v21  ;;  %v4305_v2 = vunpack.i.h.bf16 %v4303_v24  ;;  %v4304_v56 = vunpack.i.l.bf16 %v4303_v24 }
 0xdad   :  { %v4288_v39 = vpop.permute.xlu0 %4287 }
 0xdae   :  { %v1841_v43 = vadd.f32 1e-05, %v1837_v37  ;;  %v4290_v50 = vunpack.i.h.bf16 %v4288_v39  ;;  %v4289_v51 = vunpack.i.l.bf16 %v4288_v39  ;;  %v1930_v52 = vsel %vm391_vm1, %v4285_v38, %v4304_v56 }
 0xdb0   :  { %4487 = vrsqrt.f32 %v1841_v43  ;;  %v1931_v59 = vsel %vm391_vm1, %v4295_v9, %v4289_v51  ;;  %v1932_v63 = vsel %vm391_vm1, %v4289_v51, %v4290_v50  ;;  %v1933_v36 = vsel %vm391_vm1, %v4290_v50, %v4305_v2 }
 0xdb1   :  { %v4046_v4 = vpack.c.bf16 %v1931_v59, %v1928_v58  ;;  %v4298_v7 = vpop.permute.xlu0 %4297  ;;  %v4044_v60 = vpack.c.bf16 %v1932_v63, %v1929_v53  ;;  %v4052_v19 = vpack.c.bf16 %v1933_v36, %v1930_v52  ;;  %v4590_v52 = vld [vmem:[%s6026_s1] sm:$0xff] }
 0xdb2   :  { %v4300_v1 = vunpack.i.h.bf16 %v4298_v7  ;;  %v4299_v14 = vunpack.i.l.bf16 %v4298_v7 }
 0xdb3   :  { %4045 = vmatprep.subr.bf16.mxu0 %v4044_v60 }
 0xdb4   :  { %v4486_v62 = vpop.eup %4485  ;;  %4047 = vmatpush1.bf16.msra.mxu0 %v4046_v4  ;;  %v1924_v13 = vsel %vm391_vm1, %v4270_v35, %v4299_v14  ;;  %v1927_v47 = vsel %vm391_vm1, %v4275_v33, %v4300_v1 }
 0xdb5   :  { %v1844_v29 = vmul.f32 %v4486_v62, %v1838_v15  ;;  %v4048_v48 = vpack.c.bf16 %v1927_v47, %v1924_v13  ;;  %v4308_v8 = vpop.permute.xlu0 %4307 }
 0xdb6   :  { %v4310_v11 = vunpack.i.h.bf16 %v4308_v8  ;;  %v4309_v33 = vunpack.i.l.bf16 %v4308_v8 }
 0xdb7   :  { %v1850_v41 = vmul.f32 %v3589_v46, %v1844_v29  ;;  %4049 = vmatprep.subr.bf16.mxu0 %v4048_v48 }
 0xdb8   :  { %v4056_v27 = vpack.c.bf16 %v4310_v11, %v4309_v33 }
 0xdb9   :  { %v1856_v5 = vadd.f32 %v3590_v54, %v1850_v41 }
 0xdba   :  { %v4488_v35 = vpop.eup %4487 }
 0xdbb   :  { %3591 = vmatmul.mubr.msk.f32.vlgmr.msra.gmra.mrb[40].mxu0 %vm72_vm0, %v1856_v5  ;;  %v1845_v0 = vmul.f32 %v4488_v35, %v1839_v32  ;;  %v4589_v32 = vld [vmem:[%s6026_s1 + $0x8] sm:$0xff] }
 0xdbc   :  { %4051 = vmatpush3.bf16.msra.mxu0 %v4048_v48  ;;  %2022 = vmatprep.mubr.f32.mxu0 %v4626_v12 }
 0xdbd   :  { %4053 = vmatprep.subr.bf16.mxu0 %v4052_v19  ;;  %v1851_v22 = vmul.f32 %v3589_v46, %v1845_v0 }
 0xdbf   :  { %v1857_v28 = vadd.f32 %v3590_v54, %v1851_v22 }
 0xdc0   :  { %4055 = vmatpush3.bf16.msra.mxu0 %v4052_v19 }
 0xdc1   :  { %4058 = vmatprep.subr.msk.bf16.mxu0 %vm4801_vm2, %v4056_v27  ;;  %3592 = vmatmul.mubr.msk.f32.gmra.mrb[42].mxu0 %vm72_vm0, %v1857_v28 }
 0xdc2   :  { %3841 = vmatprep.mubr.msk.f32.mxu0 %vm72_vm0, %v1856_v5 }
 0xdc5   :  { %3842 = vmatmul.mubr.msk.f32.vlgmr.msra.gmra.mrb[44].mxu0 %vm72_vm0, %v1857_v28 }
 0xdc9   :  { %4061 = vmatpush3.bf16.xpose.msk.msra.mxu0 %vm4801_vm2, %v4056_v27  ;;  %v4591_v27 = vld [vmem:[%s6026_s1 + $0x10] sm:$0xff] }
 0xe8e   :  { %v2018_v40 = vpop.f32.mrb[40].mxu0 }
 0xe8f   :  { %2106 = vrot.lane.b32.xlu1 %v2018_v40, %s4627_s26  ;;  %v2020_v30 = vpop.f32.mrb[41].mxu0  ;;  %3848 = vmatprep.mubr.msk.f32.mxu0 %vm391_vm1, %v2018_v40 }
 0xe90   :  { %v3613_v44 = vmul.f32 -1.442695, %v2020_v30 }
 0xe92   :  { %4489 = vpow2.f32 %v3613_v44 }
 0xe93   :  { %2110 = vrot.lane.b32.xlu1 %v2018_v40, %s4628_s27 }
 0xe94   :  { %v2024_v21 = vpop.f32.mrb[42].mxu0 }
 0xe95   :  { %2108 = vrot.lane.b32.xlu0 %v2024_v21, %s4627_s26  ;;  %v2026_v17 = vpop.f32.mrb[43].mxu0  ;;  %3849 = vmatmul.mubr.msk.f32.vlgmr.msra.gmra.mrb[46].mxu0 %vm391_vm1, %v2024_v21 }
 0xe96   :  { %v3615_v38 = vmul.f32 -1.442695, %v2026_v17 }
 0xe97   :  { %2114 = vrot.lane.b32.xlu1 %v2018_v40, %s4629_s28 }
 0xe98   :  { %4491 = vpow2.f32 %v3615_v38  ;;  %v3843_v42 = vpop.f32.mrb[44].mxu0  ;;  %v4593_v38 = vld [vmem:[%s6026_s1 + $0x20] sm:$0xff] }
 0xe99   :  { %v3616_v9 = vmul.f32 -1.442695, %v3843_v42  ;;  %2112 = vrot.lane.b32.xlu0 %v2024_v21, %s4628_s27  ;;  %v2095_v18 = vpop.f32.mrb[45].mxu0 }
 0xe9a   :  { %v3614_v37 = vmul.f32 -1.442695, %v2095_v18 }
 0xe9b   :  { %4493 = vpow2.f32 %v3616_v9  ;;  %v4594_v9 = vld [vmem:[%s6026_s1 + $0x28] sm:$0xff] }
 0xe9c   :  { %v4490_v39 = vpop.eup %4489  ;;  %4495 = vpow2.f32 %v3614_v37 }
 0xe9d   :  { %v2512_v43 = vadd.f32 1.0, %v4490_v39  ;;  %2116 = vrot.lane.b32.xlu0 %v2024_v21, %s4629_s28 }
 0xe9f   :  { %4497 = vrcp.f32 %v2512_v43 }
 0xea2   :  { %v4492_v50 = vpop.eup %4491 }
 0xea3   :  { %v2514_v51 = vadd.f32 1.0, %v4492_v50 }
 0xea5   :  { %v4494_v53 = vpop.eup %4493  ;;  %4499 = vrcp.f32 %v2514_v51  ;;  %v4595_v51 = vld [vmem:[%s6026_s1 + $0x30] sm:$0xff] }
 0xea6   :  { %v4496_v58 = vpop.eup %4495  ;;  %v2515_v59 = vadd.f32 1.0, %v4494_v53 }
 0xea7   :  { %v2513_v63 = vadd.f32 1.0, %v4496_v58  ;;  %v4596_v58 = vld [vmem:[%s6026_s1 + $0x38] sm:$0xff] }
 0xea8   :  { %4501 = vrcp.f32 %v2515_v59 }
 0xea9   :  { %v4498_v4 = vpop.eup %4497  ;;  %4503 = vrcp.f32 %v2513_v63 }
 0xeaa   :  { %v2524_v7 = vmul.f32 %v4498_v4, %v2020_v30 }
 0xeac   :  { %v5513_v60 = vmul.f32 %v2524_v7, %v2018_v40  ;;  %v4592_v40 = vld [vmem:[%s6026_s1 + $0x18] sm:$0xff] }
 0xeaf   :  { %v4500_v1 = vpop.eup %4499 }
 0xeb0   :  { %v2526_v14 = vmul.f32 %v4500_v1, %v2026_v17 }
 0xeb2   :  { %v4502_v15 = vpop.eup %4501  ;;  %v5515_v24 = vmul.f32 %v2526_v14, %v2024_v21 }
 0xeb3   :  { %v4504_v62 = vpop.eup %4503  ;;  %v2527_v46 = vmul.f32 %v4502_v15, %v3843_v42 }
 0xeb4   :  { %v2525_v2 = vmul.f32 %v4504_v62, %v2095_v18 }
 0xeb5   :  { %v5517_v13 = vmul.f32 %v2527_v46, %v2026_v17 }
 0xeb6   :  { %v2529_v47 = vmul.f32 %v2525_v2, %v2020_v30 }
 0xeb8   :  { %3617 = vmatprep.mubr.msk.f32.mxu1 %vm829_vm3, %v2529_v47 }
 0xf01   :  { %v2107_v29 = vpop.permute.xlu1 %2106 }
 0xf02   :  { %3851 = vmatprep.mubr.msk.f32.mxu0 %vm391_vm1, %v2107_v29 }
 0xf05   :  { %v2111_v48 = vpop.permute.xlu1 %2110 }
 0xf07   :  { %v2109_v56 = vpop.permute.xlu0 %2108 }
 0xf08   :  { %3852 = vmatmul.mubr.msk.f32.gmra.mrb[48].mxu0 %vm391_vm1, %v2109_v56 }
 0xf09   :  { %3854 = vmatprep.mubr.msk.f32.mxu0 %vm391_vm1, %v2111_v48  ;;  %v2115_v41 = vpop.permute.xlu1 %2114 }
 0xf0b   :  { %v2113_v54 = vpop.permute.xlu0 %2112 }
 0xf0c   :  { %3855 = vmatmul.mubr.msk.f32.gmra.mrb[50].mxu0 %vm391_vm1, %v2113_v54 }
 0xf0d   :  { %3857 = vmatprep.mubr.msk.f32.mxu0 %vm391_vm1, %v2115_v41 }
 0xf0f   :  { %v2117_v8 = vpop.permute.xlu0 %2116 }
 0xf10   :  { %3858 = vmatmul.mubr.msk.f32.gmra.mrb[52].mxu0 %vm391_vm1, %v2117_v8 }
 0xf68   :  { %v3850_v36 = vpop.f32.mrb[46].mxu0 }
 0xf69   :  { %v2214_v5 = vadd.f32 %v4589_v32, %v3850_v36  ;;  %v2208_v35 = vpop.f32.mrb[47].mxu0 }
 0xf6a   :  { %v2209_v11 = vadd.f32 %v4590_v52, %v2208_v35 }
 0xf6b   :  { %v2250_v33 = vsel %vm391_vm1, %v2214_v5, -inf }
 0xf6c   :  { %2251 = vmax.xlane.f32.xlu0 %v2250_v33  ;;  %v2247_v19 = vsel %vm391_vm1, %v2209_v11, -inf }
 0xf6d   :  { %2248 = vmax.xlane.f32.xlu1 %v2247_v19 }
 0xfdb   :  { %v3853_v0 = vpop.f32.mrb[48].mxu0 }
 0xfdc   :  { %v2218_v22 = vpop.f32.mrb[49].mxu0  ;;  %v2224_v30 = vadd.f32 %v4592_v40, %v3853_v0 }
 0xfdd   :  { %v2219_v28 = vadd.f32 %v4591_v27, %v2218_v22 }
 0xfde   :  { %v2256_v39 = vsel %vm391_vm1, %v2224_v30, -inf }
 0xfdf   :  { %v3856_v44 = vpop.f32.mrb[50].mxu0  ;;  %v2253_v21 = vsel %vm391_vm1, %v2219_v28, -inf }
 0xfe0   :  { %v2228_v17 = vpop.f32.mrb[51].mxu0  ;;  %2254 = vmax.xlane.f32.xlu0 %v2253_v21  ;;  %v2234_v18 = vadd.f32 %v4594_v9, %v3856_v44 }
 0xfe1   :  { %v2229_v42 = vadd.f32 %v4593_v38, %v2228_v17 }
 0xfe2   :  { %v2262_v63 = vsel %vm391_vm1, %v2234_v18, -inf }
 0xfe3   :  { %v3859_v37 = vpop.f32.mrb[52].mxu0  ;;  %v2259_v43 = vsel %vm391_vm1, %v2229_v42, -inf }
 0xfe4   :  { %v2238_v50 = vpop.f32.mrb[53].mxu0  ;;  %2257 = vmax.xlane.f32.xlu0 %v2256_v39  ;;  %2260 = vmax.xlane.f32.xlu1 %v2259_v43  ;;  %v2244_v59 = vadd.f32 %v4596_v58, %v3859_v37 }
 0xfe5   :  { %v2239_v53 = vadd.f32 %v4595_v51, %v2238_v50 }
 0xfe6   :  { %v2268_v7 = vsel %vm391_vm1, %v2244_v59, -inf }
 0xfe7   :  { %v2265_v4 = vsel %vm391_vm1, %v2239_v53, -inf }
 0xfe8   :  { %2263 = vmax.xlane.f32.xlu0 %v2262_v63  ;;  %2266 = vmax.xlane.f32.xlu1 %v2265_v4 }
 0xfec   :  { %2269 = vmax.xlane.f32.xlu0 %v2268_v7 }
 0xff9   :  { %v2252_v1 = vpop.xlane.xlu0 %2251 }
 0xffa   :  { %v2272_v14 = vsub.f32 %v2214_v5, %v2252_v1  ;;  %v2249_v15 = vpop.xlane.xlu1 %2248 }
 0xffb   :  { %v2271_v62 = vsub.f32 %v2209_v11, %v2249_v15 }
 0xffc   :  { %v2281_v46 = vmul.f32 1.442695, %v2272_v14 }
 0xffd   :  { %v2279_v2 = vmul.f32 1.442695, %v2271_v62 }
 0xffe   :  { %4505 = vpow2.f32 %v2281_v46 }
 0xfff   :  { %4507 = vpow2.f32 %v2279_v2 }
0x1008   :  { %v5558_v47 = vpop.eup %4505 }
0x1009   :  { %v4508_v29 = vpop.eup %4507  ;;  %v2298_v48 = vsel %vm391_vm1, %v5558_v47, 0.0 }
0x100a   :  { %2299 = vadd.xlane.f32.xlu0 %v2298_v48  ;;  %v2295_v56 = vsel %vm391_vm1, %v4508_v29, 0.0 }
0x100b   :  { %2296 = vadd.xlane.f32.xlu1 %v2295_v56 }
0x106d   :  { %v2255_v54 = vpop.xlane.xlu0 %2254 }
0x106e   :  { %v2273_v41 = vsub.f32 %v2219_v28, %v2255_v54 }
0x1070   :  { %v2283_v8 = vmul.f32 1.442695, %v2273_v41 }
0x1071   :  { %v2258_v36 = vpop.xlane.xlu0 %2257  ;;  %v2261_v32 = vpop.xlane.xlu1 %2260 }
0x1072   :  { %4509 = vpow2.f32 %v2283_v8  ;;  %v2274_v5 = vsub.f32 %v2224_v30, %v2258_v36  ;;  %v2275_v35 = vsub.f32 %v2229_v42, %v2261_v32 }
0x1074   :  { %v2285_v52 = vmul.f32 1.442695, %v2274_v5  ;;  %v2287_v11 = vmul.f32 1.442695, %v2275_v35 }
0x1075   :  { %v2264_v33 = vpop.xlane.xlu0 %2263  ;;  %v2267_v19 = vpop.xlane.xlu1 %2266 }
0x1076   :  { %4511 = vpow2.f32 %v2285_v52  ;;  %v2276_v0 = vsub.f32 %v2234_v18, %v2264_v33  ;;  %v2277_v22 = vsub.f32 %v2239_v53, %v2267_v19 }
0x1077   :  { %4513 = vpow2.f32 %v2287_v11 }
0x1078   :  { %v2289_v27 = vmul.f32 1.442695, %v2276_v0  ;;  %v2291_v40 = vmul.f32 1.442695, %v2277_v22  ;;  %v2532_v22 = vld [vmem:[%s6029_s4 + $0x180] sm:$0xff] }
0x1079   :  { %v2270_v44 = vpop.xlane.xlu0 %2269 }
0x107a   :  { %4515 = vpow2.f32 %v2289_v27  ;;  %v2278_v21 = vsub.f32 %v2244_v59, %v2270_v44  ;;  %v2533_v27 = vld [vmem:[%s6029_s4 + $0x188] sm:$0xff] }
0x107b   :  { %4517 = vpow2.f32 %v2291_v40  ;;  %v2534_v40 = vld [vmem:[%s6029_s4 + $0x190] sm:$0xff]  ;;  %v4067_v44 = vpack.c.bf16 %v2533_v27, %v2532_v22 }
0x107c   :  { %v4510_v28 = vpop.eup %4509  ;;  %v2293_v17 = vmul.f32 1.442695, %v2278_v21  ;;  %v2535_v21 = vld [vmem:[%s6029_s4 + $0x198] sm:$0xff]  ;;  %v2688_v27 = vld [vmem:[%s6028_s3 + $0xb0] sm:$0xff] }
0x107d   :  { %v2301_v38 = vsel %vm391_vm1, %v4510_v28, 0.0  ;;  %4068 = vmatpush1.bf16.msra.mxu1 %v4067_v44 }
0x107e   :  { %4519 = vpow2.f32 %v2293_v17  ;;  %2302 = vadd.xlane.f32.xlu1 %v2301_v38  ;;  %4069 = vmatprep.subr.bf16.mxu1 %v4630_v16  ;;  %v2536_v17 = vld [vmem:[%s6029_s4 + $0x1a0] sm:$0xff]  ;;  %v2537_v38 = vld [vmem:[%s6029_s4 + $0x1a8] sm:$0xff] }
0x1080   :  { %v4512_v30 = vpop.eup %4511 }
0x1081   :  { %v4514_v42 = vpop.eup %4513  ;;  %v2304_v9 = vsel %vm391_vm1, %v4512_v30, 0.0 }
0x1082   :  { %2305 = vadd.xlane.f32.xlu0 %v2304_v9  ;;  %v2307_v18 = vsel %vm391_vm1, %v4514_v42, 0.0  ;;  %v2539_v9 = vld [vmem:[%s6029_s4 + $0x1b8] sm:$0xff] }
0x1083   :  { %2308 = vadd.xlane.f32.xlu1 %v2307_v18 }
0x1084   :  { %v4516_v37 = vpop.eup %4515 }
0x1085   :  { %v4518_v39 = vpop.eup %4517  ;;  %v2310_v43 = vsel %vm391_vm1, %v4516_v37, 0.0 }
0x1086   :  { %2311 = vadd.xlane.f32.xlu0 %v2310_v43  ;;  %v2313_v50 = vsel %vm391_vm1, %v4518_v39, 0.0 }
0x1087   :  { %2314 = vadd.xlane.f32.xlu1 %v2313_v50  ;;  %v2542_v50 = vld [vmem:[%s6029_s4 + $0x1d0] sm:$0xff] }
0x1088   :  { %v4520_v51 = vpop.eup %4519 }
0x1089   :  { %v2316_v53 = vsel %vm391_vm1, %v4520_v51, 0.0 }
0x108a   :  { %2317 = vadd.xlane.f32.xlu0 %v2316_v53 }
0x1097   :  { %v2300_v4 = vpop.xlane.xlu0 %2299 }
0x1098   :  { %4312 = vrot.lane.b32.xlu1 %v4805_v26, %s4629_s28  ;;  %v2297_v58 = vpop.xlane.xlu1 %2296 }
0x1099   :  { %4521 = vrcp.f32 %v2297_v58  ;;  %v2544_v58 = vld [vmem:[%s6029_s4 + $0x1e0] sm:$0xff] }
0x109a   :  { %4523 = vrcp.f32 %v2300_v4  ;;  %v2546_v4 = vld [vmem:[%s6029_s4 + $0x1f0] sm:$0xff] }
0x10a3   :  { %v4522_v59 = vpop.eup %4521 }
0x10a4   :  { %v2327_v63 = vmul.f32 %v4522_v59, %v4508_v29  ;;  %v4524_v29 = vpop.eup %4523  ;;  %v2545_v59 = vld [vmem:[%s6029_s4 + $0x1e8] sm:$0xff] }
0x10a5   :  { %v2328_v41 = vmul.f32 %v4524_v29, %v5558_v47 }
0x10a6   :  { %3864 = vmatprep.mubr.msk.f32.mxu0 %vm391_vm1, %v2327_v63  ;;  %v4085_v63 = vpack.c.bf16 %v2545_v59, %v2544_v58 }
0x110b   :  { %v2303_v7 = vpop.xlane.xlu1 %2302 }
0x110c   :  { %4525 = vrcp.f32 %v2303_v7  ;;  %v2547_v7 = vld [vmem:[%s6029_s4 + $0x1f8] sm:$0xff] }
0x110f   :  { %v2306_v1 = vpop.xlane.xlu0 %2305 }
0x1110   :  { %v2309_v14 = vpop.xlane.xlu1 %2308  ;;  %4527 = vrcp.f32 %v2306_v1  ;;  %v4088_v1 = vpack.c.bf16 %v2547_v7, %v2546_v4 }
0x1111   :  { %4529 = vrcp.f32 %v2309_v14  ;;  %v2548_v14 = vld [vmem:[%s6029_s4 + $0x200] sm:$0xff] }
0x1113   :  { %v2312_v62 = vpop.xlane.xlu0 %2311 }
0x1114   :  { %v2315_v15 = vpop.xlane.xlu1 %2314  ;;  %4531 = vrcp.f32 %v2312_v62 }
0x1115   :  { %4533 = vrcp.f32 %v2315_v15  ;;  %v2549_v15 = vld [vmem:[%s6029_s4 + $0x208] sm:$0xff] }
0x1116   :  { %v4526_v54 = vpop.eup %4525  ;;  %v4091_v62 = vpack.c.bf16 %v2549_v15, %v2548_v14 }
0x1117   :  { %v2318_v26 = vpop.xlane.xlu0 %2317  ;;  %v2329_v36 = vmul.f32 %v4526_v54, %v4510_v28  ;;  %v4070_v28 = vpack.c.bf16 %v2535_v21, %v2534_v40  ;;  %v2554_v54 = vld [vmem:[%s6029_s4 + $0x230] sm:$0xff]  ;;  %v2689_v40 = vld [vmem:[%s6028_s3 + $0xb8] sm:$0xff] }
0x1118   :  { %v4313_v46 = vpop.permute.xlu1 %4312  ;;  %4535 = vrcp.f32 %v2318_v26  ;;  %v2552_v26 = vld [vmem:[%s6029_s4 + $0x220] sm:$0xff]  ;;  %v4321_v44 = vpack.i.bf16 %v2689_v40, %v2688_v27  ;;  %v2692_v21 = vld [vmem:[%s6028_s3 + $0x118] sm:$0xff] }
0x1119   :  { %v4315_v2 = vunpack.i.h.bf16 %v4313_v46  ;;  %v4314_v48 = vunpack.i.l.bf16 %v4313_v46  ;;  %4071 = vmatpush1.bf16.msra.mxu1 %v4070_v28  ;;  %v2550_v46 = vld [vmem:[%s6029_s4 + $0x210] sm:$0xff]  ;;  %v2693_v28 = vld [vmem:[%s6028_s3 + $0x120] sm:$0xff] }
0x111a   :  { %v4528_v8 = vpop.eup %4527  ;;  %4072 = vmatprep.subr.bf16.mxu1 %v4630_v16 }
0x111b   :  { %v4062_v56 = vpack.c.bf16 %v4315_v2, %v4314_v48  ;;  %v4530_v32 = vpop.eup %4529  ;;  %v2330_v5 = vmul.f32 %v4528_v8, %v4512_v30  ;;  %v4073_v30 = vpack.c.bf16 %v2537_v38, %v2536_v17  ;;  %v2551_v2 = vld [vmem:[%s6029_s4 + $0x218] sm:$0xff]  ;;  %v4331_v17 = vpack.i.bf16 %v2693_v28, %v2692_v21 }
0x111c   :  { %v2331_v52 = vmul.f32 %v4530_v32, %v4514_v42  ;;  %v2538_v42 = vld [vmem:[%s6029_s4 + $0x1b0] sm:$0xff]  ;;  %v4094_v48 = vpack.c.bf16 %v2551_v2, %v2550_v46 }
0x111d   :  { %4063 = vmatprep.subr.bf16.mxu0 %v4062_v56  ;;  %4074 = vmatpush1.bf16.msra.mxu1 %v4073_v30  ;;  %v4076_v18 = vpack.c.bf16 %v2539_v9, %v2538_v42 }
0x111e   :  { %4065 = vmatpush3.bf16.msra.mxu0 %v4062_v56  ;;  %v4532_v35 = vpop.eup %4531  ;;  %4075 = vmatprep.subr.bf16.mxu1 %v4630_v16  ;;  %v2553_v56 = vld [vmem:[%s6029_s4 + $0x228] sm:$0xff] }
0x111f   :  { %v4534_v11 = vpop.eup %4533  ;;  %v2332_v33 = vmul.f32 %v4532_v35, %v4516_v37  ;;  %v2540_v37 = vld [vmem:[%s6029_s4 + $0x1c0] sm:$0xff]  ;;  %v4097_v29 = vpack.c.bf16 %v2553_v56, %v2552_v26 }
0x1120   :  { %v2333_v0 = vmul.f32 %v4534_v11, %v4518_v39  ;;  %v2541_v39 = vld [vmem:[%s6029_s4 + $0x1c8] sm:$0xff] }
0x1121   :  { %3865 = vmatmul.mubr.msk.f32.vlgmr.msra.gmra.mrb[54].mxu0 %vm391_vm1, %v2328_v41  ;;  %4077 = vmatpush1.bf16.msra.mxu1 %v4076_v18  ;;  %v4079_v43 = vpack.c.bf16 %v2541_v39, %v2540_v37  ;;  %v2555_v41 = vld [vmem:[%s6029_s4 + $0x238] sm:$0xff] }
0x1122   :  { %3867 = vmatprep.mubr.msk.f32.mxu0 %vm391_vm1, %v2329_v36  ;;  %v4536_v19 = vpop.eup %4535  ;;  %4078 = vmatprep.subr.bf16.mxu1 %v4630_v16  ;;  %v4100_v8 = vpack.c.bf16 %v2555_v41, %v2554_v54 }
0x1123   :  { %v2334_v47 = vmul.f32 %v4536_v19, %v4520_v51  ;;  %v2543_v51 = vld [vmem:[%s6029_s4 + $0x1d8] sm:$0xff] }
0x1124   :  { %v4082_v53 = vpack.c.bf16 %v2543_v51, %v2542_v50 }
0x1125   :  { %3868 = vmatmul.mubr.msk.f32.gmra.mrb[56].mxu0 %vm391_vm1, %v2330_v5  ;;  %4080 = vmatpush1.bf16.msra.mxu1 %v4079_v43 }
0x1126   :  { %3870 = vmatprep.mubr.msk.f32.mxu0 %vm391_vm1, %v2331_v52  ;;  %4081 = vmatprep.subr.bf16.mxu1 %v4630_v16  ;;  %v2684_v52 = vld [vmem:[%s6028_s3 + $0x48] sm:$0xff] }
0x1129   :  { %3871 = vmatmul.mubr.msk.f32.gmra.mrb[58].mxu0 %vm391_vm1, %v2332_v33  ;;  %4083 = vmatpush1.bf16.msra.mxu1 %v4082_v53  ;;  %v2685_v33 = vld [vmem:[%s6028_s3 + $0x50] sm:$0xff] }
0x112a   :  { %3873 = vmatprep.mubr.msk.f32.mxu0 %vm391_vm1, %v2333_v0  ;;  %4084 = vmatprep.subr.bf16.mxu1 %v4630_v16  ;;  %v4316_v0 = vpack.i.bf16 %v2685_v33, %v2684_v52 }
0x112d   :  { %3874 = vmatmul.mubr.msk.f32.gmra.mrb[60].mxu0 %vm391_vm1, %v2334_v47  ;;  %4086 = vmatpush1.bf16.msra.mxu1 %v4085_v63 }
0x112e   :  { %2846 = vmatprep.mubr.f32.mxu0 %v4626_v12  ;;  %4087 = vmatprep.subr.bf16.mxu1 %v4630_v16 }
0x1131   :  { %4089 = vmatpush1.bf16.msra.mxu1 %v4088_v1 }
0x1132   :  { %4090 = vmatprep.subr.bf16.mxu1 %v4630_v16 }
0x1135   :  { %4092 = vmatpush1.bf16.msra.mxu1 %v4091_v62 }
0x1136   :  { %4093 = vmatprep.subr.bf16.mxu1 %v4630_v16 }
0x1139   :  { %4095 = vmatpush1.bf16.msra.mxu1 %v4094_v48 }
0x113a   :  { %4096 = vmatprep.subr.bf16.mxu1 %v4630_v16 }
0x113d   :  { %4098 = vmatpush1.bf16.msra.mxu1 %v4097_v29 }
0x113e   :  { %4099 = vmatprep.subr.bf16.mxu1 %v4630_v16 }
0x1141   :  { %4101 = vmatpush1.bf16.msra.mxu1 %v4100_v8 }
0x1142   :  { %4128 = vmatprep.subr.bf16.mxu1 %v4630_v16 }
0x11f4   :  { %v3866_v36 = vpop.f32.mrb[54].mxu0 }
0x11f5   :  { %v2431_v32 = vpop.f32.mrb[55].mxu0 }
0x11f8   :  { %v3869_v5 = vpop.f32.mrb[56].mxu0 }
0x11f9   :  { %2474 = vrot.lane.b32.xlu1 %v3869_v5, %s4631_s30  ;;  %v2441_v35 = vpop.f32.mrb[57].mxu0 }
0x11fa   :  { %2472 = vrot.lane.b32.xlu0 %v2441_v35, %s4631_s30 }
0x11fc   :  { %v3872_v11 = vpop.f32.mrb[58].mxu0 }
0x11fd   :  { %v2451_v19 = vpop.f32.mrb[59].mxu0 }
0x11fe   :  { %2482 = vrot.lane.b32.xlu0 %v3872_v11, %s4625_s13  ;;  %2480 = vrot.lane.b32.xlu1 %v2451_v19, %s4625_s13  ;;  %v2697_v19 = vld [vmem:[%s6028_s3 + $0x188] sm:$0xff] }
0x1200   :  { %v3875_v47 = vpop.f32.mrb[60].mxu0 }
0x1201   :  { %v2461_v22 = vpop.f32.mrb[61].mxu0 }
0x1202   :  { %2488 = vrot.lane.b32.xlu1 %v2461_v22, %s4632_s11  ;;  %4317 = vrot.lane.b32.xlu0 %v4316_v0, %s4629_s28 }
0x1206   :  { %2490 = vrot.lane.b32.xlu1 %v3875_v47, %s4632_s11 }
0x120a   :  { %4322 = vrot.lane.b32.xlu1 %v4321_v44, %s4629_s28 }
0x120e   :  { %4327 = vrot.lane.b32.xlu1 %v5470_v31, %s4629_s28 }
0x1212   :  { %4332 = vrot.lane.b32.xlu1 %v4331_v17, %s4629_s28 }
0x126b   :  { %v2475_v38 = vpop.permute.xlu1 %2474 }
0x126c   :  { %v2473_v30 = vpop.permute.xlu0 %2472  ;;  %v2495_v51 = vsel %vm391_vm1, %v3866_v36, %v2475_v38 }
0x126d   :  { %v2494_v9 = vsel %vm391_vm1, %v2431_v32, %v2473_v30 }
0x1270   :  { %v2481_v42 = vpop.permute.xlu1 %2480  ;;  %v2483_v39 = vpop.permute.xlu0 %2482 }
0x1271   :  { %v2496_v18 = vsel %vm72_vm0, %v2494_v9, %v2481_v42  ;;  %v2497_v31 = vsel %vm72_vm0, %v2495_v51, %v2483_v39 }
0x1274   :  { %v2489_v37 = vpop.permute.xlu1 %2488  ;;  %v5708_v4 = vpop.permute.xlu0 %4317 }
0x1275   :  { %v2498_v43 = vsel %vm770_vm4, %v2496_v18, %v2489_v37  ;;  %v4320_v1 = vunpack.i.h.bf16 %v5708_v4 }
0x1276   :  { %v2556_v50 = vsel %vm829_vm3, %v2498_v43, %v5513_v60 }
0x1277   :  { %2629 = vmatmul.mubr.f32.vlgmr.msra.gmra.mrb[16].mxu1 %v2556_v50 }
0x1278   :  { %3618 = vmatprep.mubr.msk.f32.mxu1 %vm829_vm3, %v5517_v13  ;;  %v2491_v53 = vpop.permute.xlu1 %2490  ;;  %v4319_v13 = vunpack.i.l.bf16 %v5708_v4 }
0x1279   :  { %v2499_v58 = vsel %vm770_vm4, %v2497_v31, %v2491_v53 }
0x127a   :  { %v2557_v59 = vsel %vm829_vm3, %v2499_v58, %v5515_v24  ;;  %v2749_v14 = vsel %vm2747_vm5, %v4319_v13, %v4320_v1 }
0x127b   :  { %2634 = vmatmul.mubr.f32.gmra.mrb[18].mxu1 %v2557_v59 }
0x127c   :  { %v5706_v63 = vpop.permute.xlu1 %4322 }
0x127d   :  { %v4325_v60 = vunpack.i.h.bf16 %v5706_v63  ;;  %v4324_v7 = vunpack.i.l.bf16 %v5706_v63 }
0x127f   :  { %v2752_v24 = vsel %vm2747_vm5, %v4324_v7, %v4325_v60 }
0x1280   :  { %v4328_v15 = vpop.permute.xlu1 %4327  ;;  %v4102_v62 = vpack.c.bf16 %v2752_v24, %v2749_v14 }
0x1281   :  { %v4330_v46 = vunpack.i.h.bf16 %v4328_v15  ;;  %v4329_v2 = vunpack.i.l.bf16 %v4328_v15 }
0x1282   :  { %4103 = vmatprep.subr.bf16.mxu0 %v4102_v62 }
0x1283   :  { %v2748_v48 = vsel %vm2747_vm5, %v4329_v2, %v4319_v13  ;;  %v2751_v26 = vsel %vm2747_vm5, %v4330_v46, %v4324_v7 }
0x1284   :  { %v4104_v56 = vpack.c.bf16 %v2751_v26, %v2748_v48  ;;  %v5747_v47 = vpop.permute.xlu1 %4332  ;;  %v3619_v48 = vld [vmem:[%s6030_s5 + $0x6] ss:$0 sm:$0xff] }
0x1285   :  { %v4335_v37 = vunpack.i.h.bf16 %v5747_v47  ;;  %v4334_v39 = vunpack.i.l.bf16 %v5747_v47 }
0x1286   :  { %4105 = vmatpush1.bf16.msra.mxu0 %v4104_v56  ;;  %v3620_v56 = vld [vmem:[%s6030_s5 + $0x7] ss:$0 sm:$0xff] }
0x1287   :  { %v2755_v7 = vsel %vm2747_vm5, %v4334_v39, %v4335_v37 }
0x134a   :  { %v2630_v29 = vpop.f32.mrb[16].mxu1 }
0x134b   :  { %v5723_v54 = vadd.f32 %v2630_v29, %v5430_v6  ;;  %v2632_v41 = vpop.f32.mrb[17].mxu1 }
0x134d   :  { %v2641_v8 = vsel %vm72_vm0, %v5723_v54, 0.0  ;;  %v2649_v36 = vmul.f32 %v5723_v54, %v5723_v54 }
0x134e   :  { %2642 = vadd.xlane.f32.xlu0 %v2641_v8  ;;  %v2635_v32 = vpop.f32.mrb[18].mxu1 }
0x134f   :  { %v5730_v5 = vadd.f32 %v2635_v32, %v5437_v3  ;;  %v2637_v35 = vpop.f32.mrb[19].mxu1  ;;  %v2651_v52 = vsel %vm72_vm0, %v2649_v36, 0.0  ;;  %v2696_v3 = vld [vmem:[%s6028_s3 + $0x180] sm:$0xff] }
0x1350   :  { %2652 = vadd.xlane.f32.xlu1 %v2651_v52  ;;  %v4336_v0 = vpack.i.bf16 %v2697_v19, %v2696_v3  ;;  %v4598_v19 = vld [vmem:[%s6027_s2 + $0x8] sm:$0xff] }
0x1351   :  { %v2644_v6 = vsel %vm72_vm0, %v5730_v5, 0.0  ;;  %v2650_v11 = vmul.f32 %v5730_v5, %v5730_v5 }
0x1352   :  { %2645 = vadd.xlane.f32.xlu0 %v2644_v6 }
0x1353   :  { %v2654_v33 = vsel %vm72_vm0, %v2650_v11, 0.0  ;;  %v4597_v11 = vld [vmem:[%s6027_s2] sm:$0xff] }
0x1356   :  { %2655 = vadd.xlane.f32.xlu0 %v2654_v33 }
0x1361   :  { %4342 = vrot.lane.b32.xlu1 %v5453_v20, %s4629_s28 }
0x136c   :  { %4337 = vrot.lane.b32.xlu0 %v4336_v0, %s4629_s28 }
0x13db   :  { %v2643_v22 = vpop.xlane.xlu0 %2642 }
0x13dc   :  { %v2647_v27 = vmul.f32 0.03125, %v2643_v22 }
0x13dd   :  { %v2653_v40 = vpop.xlane.xlu1 %2652 }
0x13de   :  { %v2659_v44 = vmul.f32 %v2647_v27, %v2647_v27  ;;  %v2657_v21 = vmul.f32 0.03125, %v2653_v40  ;;  %v2663_v46 = vsub.f32 %v5723_v54, %v2647_v27  ;;  %v2686_v27 = vld [vmem:[%s6028_s3 + $0x58] sm:$0xff]  ;;  %v2690_v40 = vld [vmem:[%s6028_s3 + $0xc0] sm:$0xff] }
0x13df   :  { %v2646_v28 = vpop.xlane.xlu0 %2645 }
0x13e0   :  { %v2661_v20 = vsub.f32 %v2657_v21, %v2659_v44  ;;  %v2648_v17 = vmul.f32 0.03125, %v2646_v28  ;;  %v4599_v44 = vld [vmem:[%s6027_s2 + $0x10] sm:$0xff] }
0x13e1   :  { %v4343_v30 = vpop.permute.xlu1 %4342 }
0x13e2   :  { %v2665_v38 = vadd.f32 1e-05, %v2661_v20  ;;  %v2660_v9 = vmul.f32 %v2648_v17, %v2648_v17  ;;  %v4345_v43 = vunpack.i.h.bf16 %v4343_v30  ;;  %v4344_v50 = vunpack.i.l.bf16 %v4343_v30  ;;  %v2694_v20 = vld [vmem:[%s6028_s3 + $0x128] sm:$0xff]  ;;  %v4600_v30 = vld [vmem:[%s6027_s2 + $0x18] sm:$0xff] }
0x13e3   :  { %v2656_v42 = vpop.xlane.xlu0 %2655  ;;  %v2664_v41 = vsub.f32 %v5730_v5, %v2648_v17  ;;  %v2698_v17 = vld [vmem:[%s6028_s3 + $0x190] sm:$0xff] }
0x13e4   :  { %4537 = vrsqrt.f32 %v2665_v38  ;;  %v2658_v18 = vmul.f32 0.03125, %v2656_v42  ;;  %v2754_v13 = vsel %vm2747_vm5, %v4344_v50, %v4334_v39 }
0x13e6   :  { %v2662_v51 = vsub.f32 %v2658_v18, %v2660_v9  ;;  %v4346_v9 = vpack.i.bf16 %v2690_v40, %v2686_v27  ;;  %v4351_v18 = vpack.i.bf16 %v2698_v17, %v2694_v20 }
0x13e7   :  { %v5751_v31 = vpop.permute.xlu0 %4337 }
0x13e8   :  { %v2666_v53 = vadd.f32 1e-05, %v2662_v51  ;;  %v4340_v58 = vunpack.i.h.bf16 %v5751_v31  ;;  %v4339_v59 = vunpack.i.l.bf16 %v5751_v31 }
0x13ea   :  { %4539 = vrsqrt.f32 %v2666_v53  ;;  %v2757_v14 = vsel %vm2747_vm5, %v4345_v43, %v4339_v59  ;;  %v2758_v24 = vsel %vm2747_vm5, %v4339_v59, %v4340_v58 }
0x13eb   :  { %v4108_v15 = vpack.c.bf16 %v2757_v14, %v2754_v13  ;;  %v4106_v62 = vpack.c.bf16 %v2758_v24, %v2755_v7 }
0x13ed   :  { %4107 = vmatprep.subr.bf16.mxu0 %v4106_v62 }
0x13ee   :  { %v4538_v2 = vpop.eup %4537  ;;  %4109 = vmatpush1.bf16.msra.mxu0 %v4108_v15 }
0x13ef   :  { %v2669_v26 = vmul.f32 %v4538_v2, %v2663_v46 }
0x13f1   :  { %v2675_v29 = vmul.f32 %v3619_v48, %v2669_v26 }
0x13f3   :  { %v5771_v8 = vadd.f32 %v3620_v56, %v2675_v29 }
0x13f4   :  { %v4540_v36 = vpop.eup %4539 }
0x13f5   :  { %3621 = vmatmul.mubr.msk.f32.vlgmr.msra.gmra.mrb[62].mxu0 %vm72_vm0, %v5771_v8  ;;  %v2670_v32 = vmul.f32 %v4540_v36, %v2664_v41 }
0x13f6   :  { %2852 = vmatprep.mubr.f32.mxu0 %v4626_v12 }
0x13f7   :  { %v2676_v35 = vmul.f32 %v3619_v48, %v2670_v32 }
0x13f9   :  { %v5776_v52 = vadd.f32 %v3620_v56, %v2676_v35 }
0x13fb   :  { %3622 = vmatmul.mubr.msk.f32.gmra.mrb[64].mxu0 %vm72_vm0, %v5776_v52 }
0x13fc   :  { %2923 = vmatprep.mubr.f32.mxu0 %v4626_v12 }
0x14c8   :  { %v2848_v6 = vpop.f32.mrb[62].mxu0 }
0x14c9   :  { %v2936_v33 = vmul.f32 %v4597_v11, %v2848_v6  ;;  %v5784_v3 = vpop.f32.mrb[63].mxu0 }
0x14ca   :  { %v2938_v0 = vmul.f32 %v4598_v19, %v5784_v3 }
0x14cb   :  { %2944 = vrot.lane.b32.xlu0 %v2936_v33, %s4632_s11 }
0x14cc   :  { %2946 = vrot.lane.b32.xlu1 %v2938_v0, %s4632_s11 }
0x14ce   :  { %v2854_v22 = vpop.f32.mrb[64].mxu0 }
0x14cf   :  { %v2937_v21 = vmul.f32 %v4599_v44, %v2854_v22  ;;  %v5801_v28 = vpop.f32.mrb[65].mxu0 }
0x14d0   :  { %v4361_v38 = vpack.i.bf16 %v5801_v28, %v5784_v3  ;;  %v2939_v42 = vmul.f32 %v4600_v30, %v5801_v28 }
0x14d1   :  { %2948 = vrot.lane.b32.xlu0 %v2937_v21, %s4632_s11 }
0x14d2   :  { %2950 = vrot.lane.b32.xlu1 %v2939_v42, %s4632_s11 }
0x14d5   :  { %4347 = vrot.lane.b32.xlu0 %v4346_v9, %s4629_s28 }
0x14d6   :  { %4352 = vrot.lane.b32.xlu1 %v4351_v18, %s4629_s28 }
0x153d   :  { %v2945_v39 = vpop.permute.xlu0 %2944 }
0x153e   :  { %v2947_v43 = vpop.permute.xlu1 %2946 }
0x153f   :  { %v2952_v50 = vsel %vm770_vm4, %v2945_v39, %v2947_v43 }
0x1540   :  { %v2956_v51 = vadd.f32 %v2952_v50, %v2936_v33 }
0x1542   :  { %2960 = vrot.lane.b32.xlu1 %v2956_v51, %s4627_s26 }
0x1543   :  { %v2949_v53 = vpop.permute.xlu0 %2948 }
0x1544   :  { %v2951_v59 = vpop.permute.xlu1 %2950 }
0x1545   :  { %v2953_v7 = vsel %vm770_vm4, %v2949_v53, %v2951_v59 }
0x1546   :  { %v2957_v13 = vadd.f32 %v2953_v7, %v2937_v21  ;;  %2964 = vrot.lane.b32.xlu1 %v2956_v51, %s4628_s27 }
0x1547   :  { %v4348_v14 = vpop.permute.xlu0 %4347 }
0x1548   :  { %v4350_v24 = vunpack.i.h.bf16 %v4348_v14  ;;  %v4349_v15 = vunpack.i.l.bf16 %v4348_v14  ;;  %v4353_v62 = vpop.permute.xlu1 %4352  ;;  %v4356_v46 = vpack.i.bf16 %v2957_v13, %v2956_v51 }
0x1549   :  { %v4355_v2 = vunpack.i.h.bf16 %v4353_v62  ;;  %v4354_v48 = vunpack.i.l.bf16 %v4353_v62 }
0x154a   :  { %v2753_v26 = vsel %vm2747_vm5, %v4325_v60, %v4350_v24  ;;  %v2750_v56 = vsel %vm2747_vm5, %v4320_v1, %v4349_v15  ;;  %v4110_v29 = vpack.c.bf16 %v4350_v24, %v4349_v15  ;;  %2968 = vrot.lane.b32.xlu1 %v2956_v51, %s4629_s28  ;;  %4357 = vrot.lane.b32.xlu0 %v4356_v46, %s4633_s17 }
0x154b   :  { %v4112_v41 = vpack.c.bf16 %v2753_v26, %v2750_v56  ;;  %v4114_v36 = vpack.c.bf16 %v4355_v2, %v4354_v48  ;;  %v2759_v32 = vsel %vm2747_vm5, %v4340_v58, %v4355_v2  ;;  %v2756_v63 = vsel %vm2747_vm5, %v4335_v37, %v4354_v48 }
0x154c   :  { %4111 = vmatprep.subr.bf16.mxu0 %v4110_v29  ;;  %v4116_v4 = vpack.c.bf16 %v2759_v32, %v2756_v63 }
0x154d   :  { %4113 = vmatpush1.bf16.msra.mxu0 %v4112_v41 }
0x154e   :  { %2962 = vrot.lane.b32.xlu0 %v2957_v13, %s4627_s26  ;;  %4115 = vmatprep.subr.bf16.mxu0 %v4114_v36 }
0x1551   :  { %4117 = vmatpush1.bf16.msra.mxu0 %v4116_v4 }
0x1552   :  { %2966 = vrot.lane.b32.xlu0 %v2957_v13, %s4628_s27 }
0x1554   :  { %3623 = vmatmul.mubr.msk.f32.vlgmr.msra.gmra.mrb[66].mxu0 %vm72_vm0, %v5771_v8 }
0x1555   :  { %2929 = vmatprep.mubr.f32.mxu0 %v4626_v12 }
0x1556   :  { %2970 = vrot.lane.b32.xlu0 %v2957_v13, %s4629_s28 }
0x1558   :  { %3624 = vmatmul.mubr.msk.f32.gmra.mrb[68].mxu0 %vm72_vm0, %v5776_v52 }
0x1559   :  { %3880 = vmatprep.mubr.msk.f32.mxu0 %vm391_vm1, %v2956_v51 }
0x15b4   :  { %v2961_v31 = vpop.permute.xlu1 %2960 }
0x15b8   :  { %v2965_v12 = vpop.permute.xlu1 %2964 }
0x15bc   :  { %v4358_v60 = vpop.permute.xlu0 %4357  ;;  %v2969_v35 = vpop.permute.xlu1 %2968 }
0x15bd   :  { %v4360_v1 = vunpack.i.h.bf16 %v4358_v60  ;;  %v4359_v47 = vunpack.i.l.bf16 %v4358_v60 }
0x15bf   :  { %v4118_v37 = vpack.c.bf16 %v4360_v1, %v4359_v47 }
0x15c0   :  { %v2963_v58 = vpop.permute.xlu0 %2962 }
0x15c1   :  { %4120 = vmatprep.subr.msk.bf16.mxu0 %vm4801_vm2, %v4118_v37 }
0x15c2   :  { %4123 = vmatpush3.bf16.xpose.msk.msra.mxu0 %vm4801_vm2, %v4118_v37 }
0x15c4   :  { %v2967_v8 = vpop.permute.xlu0 %2966 }
0x15c8   :  { %v2971_v52 = vpop.permute.xlu0 %2970 }
0x15c9   :  { %3881 = vmatmul.mubr.msk.f32.vlgmr.msra.gmra.mrb[70].mxu0 %vm391_vm1, %v2957_v13 }
0x15ca   :  { %3883 = vmatprep.mubr.msk.f32.mxu0 %vm391_vm1, %v2961_v31 }
0x15cd   :  { %3884 = vmatmul.mubr.msk.f32.gmra.mrb[72].mxu0 %vm391_vm1, %v2963_v58 }
0x15ce   :  { %3886 = vmatprep.mubr.msk.f32.mxu0 %vm391_vm1, %v2965_v12 }
0x15d1   :  { %3887 = vmatmul.mubr.msk.f32.gmra.mrb[74].mxu0 %vm391_vm1, %v2967_v8 }
0x15d2   :  { %3889 = vmatprep.mubr.msk.f32.mxu0 %vm391_vm1, %v2969_v35 }
0x15d5   :  { %3890 = vmatmul.mubr.msk.f32.gmra.mrb[76].mxu0 %vm391_vm1, %v2971_v52 }
0x1627   :  { %v2925_v25 = vpop.f32.mrb[66].mxu0 }
0x1628   :  { %v3643_v6 = vmul.f32 -1.442695, %v2925_v25  ;;  %v2927_v11 = vpop.f32.mrb[67].mxu0 }
0x1629   :  { %v3644_v33 = vmul.f32 -1.442695, %v2927_v11 }
0x162a   :  { %4541 = vpow2.f32 %v3643_v6 }
0x162b   :  { %4543 = vpow2.f32 %v3644_v33  ;;  %v2931_v19 = vpop.f32.mrb[68].mxu0 }
0x162c   :  { %v3645_v0 = vmul.f32 -1.442695, %v2931_v19  ;;  %v2933_v22 = vpop.f32.mrb[69].mxu0 }
0x162d   :  { %v3646_v27 = vmul.f32 -1.442695, %v2933_v22 }
0x162e   :  { %4545 = vpow2.f32 %v3645_v0 }
0x162f   :  { %4547 = vpow2.f32 %v3646_v27 }
0x1634   :  { %v4542_v40 = vpop.eup %4541 }
0x1635   :  { %v4544_v44 = vpop.eup %4543  ;;  %v3368_v21 = vadd.f32 1.0, %v4542_v40 }
0x1636   :  { %v3369_v20 = vadd.f32 1.0, %v4544_v44 }
0x1637   :  { %4549 = vrcp.f32 %v3368_v21 }
0x1638   :  { %v4546_v17 = vpop.eup %4545  ;;  %4551 = vrcp.f32 %v3369_v20 }
0x1639   :  { %v4548_v30 = vpop.eup %4547  ;;  %v3370_v42 = vadd.f32 1.0, %v4546_v17 }
0x163a   :  { %v3371_v9 = vadd.f32 1.0, %v4548_v30 }
0x163b   :  { %4553 = vrcp.f32 %v3370_v42 }
0x163c   :  { %4555 = vrcp.f32 %v3371_v9 }
0x1641   :  { %v4550_v18 = vpop.eup %4549 }
0x1642   :  { %v4552_v39 = vpop.eup %4551  ;;  %v3380_v43 = vmul.f32 %v4550_v18, %v2925_v25 }
0x1643   :  { %v3381_v50 = vmul.f32 %v4552_v39, %v2927_v11 }
0x1644   :  { %v5858_v51 = vmul.f32 %v3380_v43, %v5784_v3 }
0x1645   :  { %v4554_v53 = vpop.eup %4553  ;;  %v5860_v59 = vmul.f32 %v3381_v50, %v2925_v25 }
0x1646   :  { %v4556_v7 = vpop.eup %4555  ;;  %v3382_v13 = vmul.f32 %v4554_v53, %v2931_v19 }
0x1647   :  { %v3383_v14 = vmul.f32 %v4556_v7, %v2933_v22 }
0x1648   :  { %v5863_v24 = vmul.f32 %v3382_v13, %v5801_v28 }
0x1649   :  { %v5865_v15 = vmul.f32 %v3383_v14, %v2931_v19 }
0x169c   :  { %v3882_v62 = vpop.f32.mrb[70].mxu0 }
0x169d   :  { %v3068_v46 = vadd.f32 %v3882_v62, %v5222_v49  ;;  %v3062_v2 = vpop.f32.mrb[71].mxu0 }
0x169e   :  { %v3063_v48 = vadd.f32 %v3062_v2, %v5224_v55 }
0x169f   :  { %v3104_v26 = vsel %vm391_vm1, %v3068_v46, -inf }
0x16a0   :  { %3105 = vmax.xlane.f32.xlu0 %v3104_v26  ;;  %v3885_v56 = vpop.f32.mrb[72].mxu0  ;;  %v3101_v29 = vsel %vm391_vm1, %v3063_v48, -inf }
0x16a1   :  { %v3072_v41 = vpop.f32.mrb[73].mxu0  ;;  %3102 = vmax.xlane.f32.xlu1 %v3101_v29  ;;  %v3078_v32 = vadd.f32 %v3885_v56, %v5226_v57 }
0x16a2   :  { %v3073_v36 = vadd.f32 %v3072_v41, %v5229_v61 }
0x16a3   :  { %v3110_v47 = vsel %vm391_vm1, %v3078_v32, -inf }
0x16a4   :  { %v3888_v63 = vpop.f32.mrb[74].mxu0  ;;  %v3107_v4 = vsel %vm391_vm1, %v3073_v36, -inf }
0x16a5   :  { %v3082_v60 = vpop.f32.mrb[75].mxu0  ;;  %3108 = vmax.xlane.f32.xlu0 %v3107_v4  ;;  %v3088_v55 = vadd.f32 %v3888_v63, %v5234_v10 }
0x16a6   :  { %v3083_v49 = vadd.f32 %v3082_v60, %v5237_v45 }
0x16a7   :  { %v3116_v58 = vsel %vm391_vm1, %v3088_v55, -inf }
0x16a8   :  { %v3891_v1 = vpop.f32.mrb[76].mxu0  ;;  %v3113_v37 = vsel %vm391_vm1, %v3083_v49, -inf }
0x16a9   :  { %v3092_v31 = vpop.f32.mrb[77].mxu0  ;;  %3111 = vmax.xlane.f32.xlu0 %v3110_v47  ;;  %3114 = vmax.xlane.f32.xlu1 %v3113_v37  ;;  %v3098_v57 = vadd.f32 %v3891_v1, %v5242_v34 }
0x16aa   :  { %v3093_v61 = vadd.f32 %v3092_v31, %v5248_v23 }
0x16ab   :  { %v3122_v10 = vsel %vm391_vm1, %v3098_v57, -inf }
0x16ac   :  { %v3119_v12 = vsel %vm391_vm1, %v3093_v61, -inf }
0x16ad   :  { %3117 = vmax.xlane.f32.xlu0 %v3116_v58  ;;  %3120 = vmax.xlane.f32.xlu1 %v3119_v12 }
0x16b1   :  { %3123 = vmax.xlane.f32.xlu0 %v3122_v10 }
0x172d   :  { %v3106_v45 = vpop.xlane.xlu0 %3105 }
0x172e   :  { %v3126_v8 = vsub.f32 %v3068_v46, %v3106_v45  ;;  %v3103_v35 = vpop.xlane.xlu1 %3102 }
0x172f   :  { %v3125_v52 = vsub.f32 %v3063_v48, %v3103_v35 }
0x1730   :  { %v3135_v25 = vmul.f32 1.442695, %v3126_v8 }
0x1731   :  { %v3133_v6 = vmul.f32 1.442695, %v3125_v52 }
0x1732   :  { %4557 = vpow2.f32 %v3135_v25  ;;  %v3109_v11 = vpop.xlane.xlu0 %3108 }
0x1733   :  { %4559 = vpow2.f32 %v3133_v6  ;;  %v3127_v23 = vsub.f32 %v3073_v36, %v3109_v11 }
0x1735   :  { %v3137_v34 = vmul.f32 1.442695, %v3127_v23 }
0x1736   :  { %v3112_v33 = vpop.xlane.xlu0 %3111  ;;  %v3115_v19 = vpop.xlane.xlu1 %3114 }
0x1737   :  { %4561 = vpow2.f32 %v3137_v34  ;;  %v3128_v0 = vsub.f32 %v3078_v32, %v3112_v33  ;;  %v3129_v22 = vsub.f32 %v3083_v49, %v3115_v19  ;;  %v3388_v19 = vld [vmem:[%s6029_s4 + $0x240] sm:$0xff] }
0x1739   :  { %v3139_v27 = vmul.f32 1.442695, %v3128_v0  ;;  %v3141_v40 = vmul.f32 1.442695, %v3129_v22  ;;  %v3389_v0 = vld [vmem:[%s6029_s4 + $0x248] sm:$0xff]  ;;  %v3390_v22 = vld [vmem:[%s6029_s4 + $0x250] sm:$0xff] }
0x173a   :  { %v3118_v44 = vpop.xlane.xlu0 %3117  ;;  %v3121_v21 = vpop.xlane.xlu1 %3120 }
0x173b   :  { %4563 = vpow2.f32 %v3139_v27  ;;  %v3130_v20 = vsub.f32 %v3088_v55, %v3118_v44  ;;  %v3131_v17 = vsub.f32 %v3093_v61, %v3121_v21  ;;  %v4129_v27 = vpack.c.bf16 %v3389_v0, %v3388_v19  ;;  %v3392_v21 = vld [vmem:[%s6029_s4 + $0x260] sm:$0xff] }
0x173c   :  { %v4558_v30 = vpop.eup %4557  ;;  %4565 = vpow2.f32 %v3141_v40  ;;  %v3391_v40 = vld [vmem:[%s6029_s4 + $0x258] sm:$0xff] }
0x173d   :  { %v4560_v42 = vpop.eup %4559  ;;  %v3143_v9 = vmul.f32 1.442695, %v3130_v20  ;;  %v3145_v18 = vmul.f32 1.442695, %v3131_v17  ;;  %v3152_v39 = vsel %vm391_vm1, %v4558_v30, 0.0  ;;  %4130 = vmatpush1.bf16.msra.mxu1 %v4129_v27  ;;  %v4132_v44 = vpack.c.bf16 %v3391_v40, %v3390_v22  ;;  %v3393_v20 = vld [vmem:[%s6029_s4 + $0x268] sm:$0xff] }
0x173e   :  { %3153 = vadd.xlane.f32.xlu0 %v3152_v39  ;;  %v3124_v43 = vpop.xlane.xlu0 %3123  ;;  %v3149_v50 = vsel %vm391_vm1, %v4560_v42, 0.0  ;;  %4131 = vmatprep.subr.bf16.mxu1 %v4630_v16  ;;  %v4135_v17 = vpack.c.bf16 %v3393_v20, %v3392_v21  ;;  %v3397_v39 = vld [vmem:[%s6029_s4 + $0x288] sm:$0xff] }
0x173f   :  { %4567 = vpow2.f32 %v3143_v9  ;;  %v3132_v53 = vsub.f32 %v3098_v57, %v3124_v43  ;;  %3150 = vadd.xlane.f32.xlu1 %v3149_v50  ;;  %v3398_v50 = vld [vmem:[%s6029_s4 + $0x290] sm:$0xff] }
0x1740   :  { %4569 = vpow2.f32 %v3145_v18  ;;  %v3396_v18 = vld [vmem:[%s6029_s4 + $0x280] sm:$0xff] }
0x1741   :  { %v4562_v7 = vpop.eup %4561  ;;  %v3147_v13 = vmul.f32 1.442695, %v3132_v53  ;;  %4133 = vmatpush1.bf16.msra.mxu1 %v4132_v44  ;;  %v4141_v43 = vpack.c.bf16 %v3397_v39, %v3396_v18  ;;  %v3399_v53 = vld [vmem:[%s6029_s4 + $0x298] sm:$0xff] }
0x1742   :  { %v3155_v14 = vsel %vm391_vm1, %v4562_v7, 0.0  ;;  %4134 = vmatprep.subr.bf16.mxu1 %v4630_v16 }
0x1743   :  { %4571 = vpow2.f32 %v3147_v13  ;;  %3156 = vadd.xlane.f32.xlu1 %v3155_v14  ;;  %v3400_v13 = vld [vmem:[%s6029_s4 + $0x2a0] sm:$0xff]  ;;  %v3401_v14 = vld [vmem:[%s6029_s4 + $0x2a8] sm:$0xff] }
0x1745   :  { %v4564_v62 = vpop.eup %4563  ;;  %4136 = vmatpush1.bf16.msra.mxu1 %v4135_v17 }
0x1746   :  { %v4566_v46 = vpop.eup %4565  ;;  %v3158_v2 = vsel %vm391_vm1, %v4564_v62, 0.0  ;;  %4137 = vmatprep.subr.bf16.mxu1 %v4630_v16 }
0x1747   :  { %3159 = vadd.xlane.f32.xlu0 %v3158_v2  ;;  %v3161_v48 = vsel %vm391_vm1, %v4566_v46, 0.0  ;;  %v3403_v2 = vld [vmem:[%s6029_s4 + $0x2b8] sm:$0xff] }
0x1748   :  { %3162 = vadd.xlane.f32.xlu1 %v3161_v48 }
0x1749   :  { %v4568_v26 = vpop.eup %4567 }
0x174a   :  { %v4570_v56 = vpop.eup %4569  ;;  %v3164_v29 = vsel %vm391_vm1, %v4568_v26, 0.0 }
0x174b   :  { %3165 = vadd.xlane.f32.xlu0 %v3164_v29  ;;  %v3167_v41 = vsel %vm391_vm1, %v4570_v56, 0.0 }
0x174c   :  { %3168 = vadd.xlane.f32.xlu1 %v3167_v41  ;;  %v3406_v41 = vld [vmem:[%s6029_s4 + $0x2d0] sm:$0xff] }
0x174d   :  { %v4572_v36 = vpop.eup %4571 }
0x174e   :  { %v3170_v32 = vsel %vm391_vm1, %v4572_v36, 0.0 }
0x174f   :  { %3171 = vadd.xlane.f32.xlu0 %v3170_v32 }
0x175d   :  { %4362 = vrot.lane.b32.xlu1 %v4361_v38, %s4628_s27 }
0x1761   :  { %3416 = vrot.lane.b32.xlu1 %v5858_v51, %s4631_s30 }
0x17cb   :  { %v3154_v4 = vpop.xlane.xlu0 %3153 }
0x17cc   :  { %v3151_v63 = vpop.xlane.xlu1 %3150 }
0x17cd   :  { %4573 = vrcp.f32 %v3151_v63  ;;  %v3408_v63 = vld [vmem:[%s6029_s4 + $0x2e0] sm:$0xff] }
0x17ce   :  { %4575 = vrcp.f32 %v3154_v4  ;;  %v3409_v4 = vld [vmem:[%s6029_s4 + $0x2e8] sm:$0xff] }
0x17d0   :  { %v3157_v60 = vpop.xlane.xlu1 %3156 }
0x17d1   :  { %4577 = vrcp.f32 %v3157_v60  ;;  %v4159_v60 = vpack.c.bf16 %v3409_v4, %v3408_v63 }
0x17d4   :  { %v3160_v49 = vpop.xlane.xlu0 %3159 }
0x17d5   :  { %v3163_v55 = vpop.xlane.xlu1 %3162  ;;  %4579 = vrcp.f32 %v3160_v49 }
0x17d6   :  { %4581 = vrcp.f32 %v3163_v55 }
0x17d7   :  { %v4574_v1 = vpop.eup %4573 }
0x17d8   :  { %v3181_v47 = vmul.f32 %v4574_v1, %v4560_v42  ;;  %v3166_v31 = vpop.xlane.xlu0 %3165  ;;  %v4576_v57 = vpop.eup %4575  ;;  %v3395_v42 = vld [vmem:[%s6029_s4 + $0x278] sm:$0xff]  ;;  %v3410_v1 = vld [vmem:[%s6029_s4 + $0x2f0] sm:$0xff] }
0x17d9   :  { %v3169_v37 = vpop.xlane.xlu1 %3168  ;;  %4583 = vrcp.f32 %v3166_v31  ;;  %v3182_v12 = vmul.f32 %v4576_v57, %v4558_v30  ;;  %v3394_v30 = vld [vmem:[%s6029_s4 + $0x270] sm:$0xff] }
0x17da   :  { %3896 = vmatprep.mubr.msk.f32.mxu0 %vm391_vm1, %v3181_v47  ;;  %4585 = vrcp.f32 %v3169_v37  ;;  %v4138_v9 = vpack.c.bf16 %v3395_v42, %v3394_v30  ;;  %v3411_v47 = vld [vmem:[%s6029_s4 + $0x2f8] sm:$0xff] }
0x17db   :  { %v4578_v58 = vpop.eup %4577  ;;  %v4162_v37 = vpack.c.bf16 %v3411_v47, %v3410_v1 }
0x17dc   :  { %v3172_v51 = vpop.xlane.xlu0 %3171  ;;  %v3183_v45 = vmul.f32 %v4578_v58, %v4562_v7  ;;  %4139 = vmatpush1.bf16.msra.mxu1 %v4138_v9  ;;  %v4144_v7 = vpack.c.bf16 %v3399_v53, %v3398_v50 }
0x17dd   :  { %v4363_v3 = vpop.permute.xlu1 %4362  ;;  %4587 = vrcp.f32 %v3172_v51  ;;  %4140 = vmatprep.subr.bf16.mxu1 %v4630_v16 }
0x17de   :  { %v4365_v28 = vunpack.i.h.bf16 %v4363_v3  ;;  %v4364_v38 = vunpack.i.l.bf16 %v4363_v3 }
0x17df   :  { %v4580_v10 = vpop.eup %4579 }
0x17e0   :  { %v4124_v61 = vpack.c.bf16 %v4365_v28, %v4364_v38  ;;  %v4582_v8 = vpop.eup %4581  ;;  %v3184_v35 = vmul.f32 %v4580_v10, %v4564_v62  ;;  %4142 = vmatpush1.bf16.msra.mxu1 %v4141_v43  ;;  %v4147_v62 = vpack.c.bf16 %v3401_v14, %v3400_v13 }
0x17e1   :  { %v3185_v25 = vmul.f32 %v4582_v8, %v4566_v46  ;;  %4143 = vmatprep.subr.bf16.mxu1 %v4630_v16  ;;  %v3402_v46 = vld [vmem:[%s6029_s4 + $0x2b0] sm:$0xff] }
0x17e2   :  { %4125 = vmatprep.subr.bf16.mxu0 %v4124_v61  ;;  %v4150_v48 = vpack.c.bf16 %v3403_v2, %v3402_v46 }
0x17e3   :  { %4127 = vmatpush3.bf16.msra.mxu0 %v4124_v61  ;;  %v4584_v52 = vpop.eup %4583 }
0x17e4   :  { %v4586_v6 = vpop.eup %4585  ;;  %v3186_v11 = vmul.f32 %v4584_v52, %v4568_v26  ;;  %4145 = vmatpush1.bf16.msra.mxu1 %v4144_v7  ;;  %v3404_v26 = vld [vmem:[%s6029_s4 + $0x2c0] sm:$0xff] }
0x17e5   :  { %v3187_v34 = vmul.f32 %v4586_v6, %v4570_v56  ;;  %4146 = vmatprep.subr.bf16.mxu1 %v4630_v16  ;;  %v3405_v56 = vld [vmem:[%s6029_s4 + $0x2c8] sm:$0xff] }
0x17e6   :  { %3897 = vmatmul.mubr.msk.f32.vlgmr.msra.gmra.mrb[78].mxu0 %vm391_vm1, %v3182_v12  ;;  %v4153_v29 = vpack.c.bf16 %v3405_v56, %v3404_v26  ;;  %v3417_v12 = vpop.permute.xlu1 %3416 }
0x17e7   :  { %3899 = vmatprep.mubr.msk.f32.mxu0 %vm391_vm1, %v3183_v45  ;;  %v4588_v23 = vpop.eup %4587 }
0x17e8   :  { %v3188_v33 = vmul.f32 %v4588_v23, %v4572_v36  ;;  %4148 = vmatpush1.bf16.msra.mxu1 %v4147_v62  ;;  %v3407_v36 = vld [vmem:[%s6029_s4 + $0x2d8] sm:$0xff]  ;;  %s4634_s4 = smov [#allocation2]  }
0x17e9   :  { %4149 = vmatprep.subr.bf16.mxu1 %v4630_v16  ;;  %v4156_v32 = vpack.c.bf16 %v3407_v36, %v3406_v41 }
0x17ea   :  { %3900 = vmatmul.mubr.msk.f32.gmra.mrb[80].mxu0 %vm391_vm1, %v3184_v35 }
0x17eb   :  { %3902 = vmatprep.mubr.msk.f32.mxu0 %vm391_vm1, %v3185_v25 }
0x17ec   :  { %4151 = vmatpush1.bf16.msra.mxu1 %v4150_v48 }
0x17ed   :  { %4152 = vmatprep.subr.bf16.mxu1 %v4630_v16 }
0x17ee   :  { %3903 = vmatmul.mubr.msk.f32.gmra.mrb[82].mxu0 %vm391_vm1, %v3186_v11 }
0x17ef   :  { %3905 = vmatprep.mubr.msk.f32.mxu0 %vm391_vm1, %v3187_v34 }
0x17f0   :  { %4154 = vmatpush1.bf16.msra.mxu1 %v4153_v29 }
0x17f1   :  { %4155 = vmatprep.subr.bf16.mxu1 %v4630_v16 }
0x17f2   :  { %3906 = vmatmul.mubr.msk.f32.gmra.mrb[84].mxu0 %vm391_vm1, %v3188_v33 }
0x17f4   :  { %4157 = vmatpush1.bf16.msra.mxu1 %v4156_v32 }
0x17f5   :  { %4158 = vmatprep.subr.bf16.mxu1 %v4630_v16 }
0x17f8   :  { %4160 = vmatpush1.bf16.msra.mxu1 %v4159_v60 }
0x17f9   :  { %4161 = vmatprep.subr.bf16.mxu1 %v4630_v16 }
0x17fc   :  { %4163 = vmatpush1.bf16.msra.mxu1 %v4162_v37 }
0x18b9   :  { %v3898_v49 = vpop.f32.mrb[78].mxu0 }
0x18ba   :  { %v3287_v55 = vpop.f32.mrb[79].mxu0 }
0x18bd   :  { %v3901_v31 = vpop.f32.mrb[80].mxu0 }
0x18be   :  { %v3297_v3 = vpop.f32.mrb[81].mxu0 }
0x18bf   :  { %v4366_v28 = vpack.i.bf16 %v3901_v31, %v3297_v3 }
0x18c1   :  { %4367 = vrot.lane.b32.xlu0 %v4366_v28, %s4631_s30  ;;  %v3904_v38 = vpop.f32.mrb[82].mxu0 }
0x18c2   :  { %v3307_v51 = vpop.f32.mrb[83].mxu0 }
0x18c3   :  { %v4371_v61 = vpack.i.bf16 %v3904_v38, %v3307_v51 }
0x18c5   :  { %3418 = vrot.lane.b32.xlu0 %v5860_v59, %s4631_s30  ;;  %4372 = vrot.lane.b32.xlu1 %v4371_v61, %s4625_s13  ;;  %v3907_v16 = vpop.f32.mrb[84].mxu0  ;;  %s3516_s13 = sshll.u32 %s4634_s4, 4  ;;  %s3517_s13 = int_to_ptr.vmem [resolvable:$true] %s3516_s13 }
0x18c6   :  { %v3317_v57 = vpop.f32.mrb[85].mxu0  ;;  %p4606_p1 = scmp.lt.s32.totalorder %s3517_s13, %s3517_s13 }
0x18c7   :  { %v4376_v58 = vpack.i.bf16 %v3907_v16, %v3317_v57 }
0x18c9   :  { %3422 = vrot.lane.b32.xlu0 %v5865_v15, %s4631_s30  ;;  %4377 = vrot.lane.b32.xlu1 %v4376_v58, %s4632_s11 }
0x18cd   :  { %3420 = vrot.lane.b32.xlu1 %v5863_v24, %s4631_s30  ;;  %s4601_s30 = scalar_lea.vmem %s3517_s13, 256 }
0x18ce   :  { %p4602_p0 = scmp.ne.s32.totalorder %s3517_s13, %s4601_s30  ;;  %p4607_p2 = scmp.lt.s32.totalorder %s4601_s30, %s4601_s30 }
0x18d0   :  { %p4608_p3 = por %p4607_p2, %p4606_p1 }
0x18d2   :  { %p4609_p4 = pnand %p4608_p3, %p4602_p0 }
0x1933   :  { %v4368_v10 = vpop.permute.xlu0 %4367 }
0x1934   :  { %v4369_v35 = vunpack.i.l.bf16 %v4368_v10  ;;  %v4370_v25 = vunpack.i.h.bf16 %v4368_v10 }
0x1936   :  { %v3350_v15 = vsel %vm391_vm1, %v3287_v55, %v4369_v35  ;;  %v3351_v24 = vsel %vm391_vm1, %v3898_v49, %v4370_v25 }
0x1937   :  { %v3419_v45 = vpop.permute.xlu0 %3418  ;;  %v4373_v8 = vpop.permute.xlu1 %4372 }
0x1938   :  { %v3424_v59 = vsel %vm391_vm1, %v3417_v12, %v3419_v45  ;;  %v4374_v52 = vunpack.i.l.bf16 %v4373_v8  ;;  %v4375_v6 = vunpack.i.h.bf16 %v4373_v8 }
0x1939   :  { %3647 = vmatprep.mubr.msk.f32.mxu1 %vm829_vm3, %v3424_v59 }
0x193a   :  { %v3352_v33 = vsel %vm72_vm0, %v3350_v15, %v4374_v52  ;;  %v3353_v40 = vsel %vm72_vm0, %v3351_v24, %v4375_v6 }
0x193b   :  { %v4378_v11 = vpop.permute.xlu1 %4377  ;;  %v3423_v0 = vpop.permute.xlu0 %3422 }
0x193c   :  { %v4380_v23 = vunpack.i.h.bf16 %v4378_v11  ;;  %v4379_v34 = vunpack.i.l.bf16 %v4378_v11 }
0x193e   :  { %v3354_v19 = vsel %vm770_vm4, %v3352_v33, %v4379_v34  ;;  %v3355_v21 = vsel %vm770_vm4, %v3353_v40, %v4380_v23 }
0x193f   :  { %v3421_v22 = vpop.permute.xlu1 %3420  ;;  %v3428_v27 = vsel %vm829_vm3, %v3354_v19, %v3417_v12 }
0x1940   :  { %v3425_v44 = vsel %vm391_vm1, %v3421_v22, %v3423_v0  ;;  %3499 = vmatmul.mubr.f32.vlgmr.msra.gmra.mrb[20].mxu1 %v3428_v27  ;;  %v3429_v20 = vsel %vm829_vm3, %v3355_v21, %v3421_v22 }
0x1941   :  { %3648 = vmatprep.mubr.msk.f32.mxu1 %vm829_vm3, %v3425_v44 }
0x1944   :  { %3504 = vmatmul.mubr.f32.gmra.mrb[22].mxu1 %v3429_v20 }
0x1a13   :  { %v3500_v17 = vpop.f32.mrb[20].mxu1 }
0x1a14   :  { %v3501_v30 = vadd.f32 %v3500_v17, %v5723_v54  ;;  %v3502_v42 = vpop.f32.mrb[21].mxu1 }
0x1a16   :  { %3509 = vst.msk [vmem:[#allocation2] sm:$0xff] %vm72_vm0, %v3501_v30 }
0x1a17   :  { %v3505_v9 = vpop.f32.mrb[22].mxu1 }
0x1a18   :  { %v3506_v18 = vadd.f32 %v3505_v9, %v5730_v5  ;;  %v3507_v39 = vpop.f32.mrb[23].mxu1 }
0x1a1a   :  { %3510 = vst.msk [vmem:[#allocation2 + $0x8] sm:$0xff] %vm72_vm0, %v3506_v18 }
0x1a1b   :  { %4612 = shalt.err (!%p4609_p4)
}
0x1a1c   :  { %s4613_s14 = scalar_lea.hbm %s6031_s6, 256 }
0x1a1d   :  { %p4614_p5 = scmp.ne.s32.totalorder %s6031_s6, %s4613_s14  ;;  %p4617_p6 = scmp.lt.u32.totalorder %s4613_s14, %s6031_s6 }
0x1a1f   :  { %p4619_p7 = pnand %p4617_p6, %p4614_p5 }
0x1a21   :  { %4622 = shalt.err (!%p4619_p7)
}
0x1a22   :  { %s4635_s26 = smov 128   ;;  %s4636_s27 = smov 8  }
0x1a23   :  { %3522 = dma.vmem_to_hbm [thread:$0]  %s3517_s13, 256, %s6031_s6, [#allocation3], %s4635_s26, %s4635_s26, %s4636_s27  }
0x1a24   :  { %4623 = dma.done.wait [#allocation3], 256  }
0x1a25   :  { %4624 = vsyncadd [#allocation3], 4294967040 }
0x1a26   :  { %3526 = vsyncpa [#allocation3], 1 }

</bundles_post_ra>
